<compile_context>
chip_gen: v7x
topology: tpu7x:2x2x1
jax: 0.10.0
libtpu: 0.0.40
codegen_flags: <defaults>
</compile_context>

<pallas_src>
import jax
import jax.numpy as jnp
import numpy as np
from jax.experimental import pallas as pl
from jax.experimental.pallas import tpu as pltpu

EPS = 1e-8


# ------------------------------ fused kernel ----------------------------------
def _make_tcn_kernel(kernel_size, dilations, paddings, T_valid):
    K = kernel_size
    L = len(dilations)
    for d, pad in zip(dilations, paddings):
        # The TCN always uses length-preserving depthwise convs (pad == dilation, K == 3).
        assert 2 * pad == d * (K - 1), "only length-preserving depthwise conv supported"
        # TODO(synk): general T_out != T (other kernel/padding/dilation combos) not needed here.

    def tcn_kernel(x_ref, ln_w_ref, ln_b_ref, bn_w_ref, bn_b_ref,
                   w1_ref, b1_ref, p1_ref, g1w_ref, g1b_ref,
                   dw_ref, db_ref, p2_ref, g2w_ref, g2b_ref,
                   wrs_ref, brs_ref,
                   outp_ref, ow_ref, ob_ref,
                   o_ref):
        x = x_ref[0].astype(jnp.float32)                    # (Cin, Tp)
        Tp = x.shape[1]

        # validity mask along the (lane-padded) time axis -- built once
        col = jax.lax.broadcasted_iota(jnp.int32, (1, Tp), 1)
        tmask = (col < T_valid).astype(jnp.float32)         # (1, Tp)

        def gn(v, w, b, *, mask_in, mask_out):
            # GroupNorm(1, C): single-pass stats over the valid (C, T_valid) region,
            # biased variance, eps inside sqrt (PyTorch semantics); affine folded
            # into one FMA.
            #   mask_in : input carries junk in the padded time columns.
            #   mask_out: caller needs padded columns exactly zero (depthwise rolls).
            vm = v * tmask if mask_in else v
            n = v.shape[0] * T_valid
            mean = jnp.sum(vm) / n
            var = jnp.maximum(jnp.sum(vm * vm) / n - mean * mean, 0.0)
            scale = w * jax.lax.rsqrt(var + EPS)            # (C, 1)
            y = vm * scale + (b - mean * scale)
            return y * tmask if mask_out else y

        def prelu(v, p):                                    # p: f32 scalar (SMEM)
            return jnp.where(v > 0, v, v * p)

        def dot32(w, v):                                    # bf16 MXU, f32 accumulate
            return jnp.dot(w, v.astype(w.dtype), preferred_element_type=jnp.float32)

        # --- GroupNorm(LN) + bottleneck 1x1 conv ---
        # x is zero in the padded columns (wrapper pads) and the GN output only
        # feeds a 1x1 matmul -> neither mask needed here.
        out = dot32(bn_w_ref[...],
                    gn(x, ln_w_ref[...], ln_b_ref[...],
                       mask_in=False, mask_out=False)) + bn_b_ref[...]
        BN = out.shape[0]
        skip = None

        # --- DepthConv1d blocks (unrolled; per-block weights stacked on axis 0) ---
        for l in range(L):
            d, pad = dilations[l], paddings[l]

            # 1x1 conv -> PReLU -> GroupNorm (output masked: the rolls below
            # rely on h being exactly zero for time columns >= T_valid).
            h = dot32(w1_ref[l], out) + b1_ref[l]
            h = gn(prelu(h, p1_ref[l]), g1w_ref[l], g1b_ref[l],
                   mask_in=True, mask_out=True)

            # Depthwise dilated conv: one static lane-rotation (XLU) + FMA (VPU)
            # per tap.  Wrapper guarantees Tp - T_valid >= pad, so wrapped lanes
            # either bring zeros (h tail is zero) or land in the already-invalid
            # tail that the next GroupNorm re-masks.
            dw = dw_ref[l]                                  # (H, K)
            acc = None
            for k in range(K):
                off = k * d - pad                           # static tap offset
                tap = h if off == 0 else pltpu.roll(h, shift=(-off) % Tp, axis=1)
                term = dw[:, k:k + 1] * tap
                acc = term if acc is None else acc + term
            h2 = gn(prelu(acc + db_ref[l], p2_ref[l]), g2w_ref[l], g2b_ref[l],
                    mask_in=True, mask_out=False)

            # residual + skip 1x1 convs fused into one matmul, then split rows
            rs = dot32(wrs_ref[l], h2) + brs_ref[l]         # (2*BN, Tp)
            out = out + rs[:BN]
            skip = rs[BN:] if skip is None else skip + rs[BN:]

        if skip is None:                                    # L == 0 corner case
            skip = jnp.zeros_like(out)

        # --- output head: PReLU + 1x1 conv ---
        y = dot32(ow_ref[...], prelu(skip, outp_ref[0])) + ob_ref[...]
        o_ref[0, :, :] = y.astype(o_ref.dtype)

    return tcn_kernel


# ------------------------------ wrapper ---------------------------------------
def _full_spec(a):
    nd = a.ndim
    return pl.BlockSpec(a.shape, lambda b, _nd=nd: (0,) * _nd)


def _smem_spec():
    return pl.BlockSpec(memory_space=pltpu.MemorySpace.SMEM)


def tcn_forward(x, params):
    # TODO(synk): skip=False variant (output head fed from `out`) not implemented.
    B, Cin, T = x.shape
    K = params["kernel"]
    dils = tuple(params["dilations"])
    pads = tuple(params["paddings"])
    blocks = params["blocks"]
    L = len(blocks)
    BN = params["bn_w"].shape[0]
    H = blocks[0]["w1"].shape[0] if blocks else 0
    Od = params["out_w"].shape[0]

    # lane-dense time axis with >= max(pad) columns of zero slack at the end,
    # so the depthwise lane rotations never wrap valid data into valid lanes.
    max_pad = max(pads) if pads else 0
    Tp = ((T + max_pad + 127) // 128) * 128
    xp = jnp.pad(x, ((0, 0), (0, 0), (0, Tp - T))) if Tp != T else x

    bf16, f32 = jnp.bfloat16, jnp.float32

    def stack(name, dtype=f32):
        return jnp.stack([bp[name] for bp in blocks]).astype(dtype)

    w1 = stack("w1", bf16)
    b1, g1w, g1b = stack("b1"), stack("g1w"), stack("g1b")
    dw, db = stack("dw"), stack("db")
    g2w, g2b = stack("g2w"), stack("g2b")
    wrs = jnp.stack([jnp.concatenate([bp["wr"], bp["ws"]], axis=0)
                     for bp in blocks]).astype(bf16)
    brs = jnp.stack([jnp.concatenate([bp["br"], bp["bs"]], axis=0) for bp in blocks])
    p1 = jnp.stack([bp["p1"].reshape(()) for bp in blocks]).astype(f32)   # (L,)
    p2 = jnp.stack([bp["p2"].reshape(()) for bp in blocks]).astype(f32)
    outp = params["out_p"].reshape((1,)).astype(f32)
    bn_w = params["bn_w"].astype(bf16)
    out_w = params["out_w"].astype(bf16)

    args = [xp, params["ln_w"], params["ln_b"], bn_w, params["bn_b"],
            w1, b1, p1, g1w, g1b, dw, db, p2, g2w, g2b, wrs, brs,
            outp, out_w, params["out_b"]]

    in_specs = [pl.BlockSpec((1, Cin, Tp), lambda b: (b, 0, 0)),
                _full_spec(params["ln_w"]), _full_spec(params["ln_b"]),
                _full_spec(bn_w), _full_spec(params["bn_b"]),
                _full_spec(w1), _full_spec(b1), _smem_spec(),
                _full_spec(g1w), _full_spec(g1b),
                _full_spec(dw), _full_spec(db), _smem_spec(),
                _full_spec(g2w), _full_spec(g2b),
                _full_spec(wrs), _full_spec(brs),
                _smem_spec(), _full_spec(out_w), _full_spec(params["out_b"])]

    # --- VMEM budget + cost estimate -------------------------------------------
    weight_bytes = int(sum(int(a.size) * a.dtype.itemsize for a in args[1:]))
    act_bytes = 4 * Tp * (4 * BN + 6 * max(H, 1) + 2 * Cin + 2 * Od)
    io_bytes = 4 * Tp * (Cin + Od) * 2                       # double-buffered I/O blocks
    vmem_est = 2 * weight_bytes + 2 * act_bytes + io_bytes
    vmem_limit = int(min(64 << 20, max(32 << 20, vmem_est)))  # valid on v5e/v6e/v7x

    flops_blk = (2 * H * BN * Tp + 2 * (2 * BN) * H * Tp +   # 1x1 + fused res/skip matmuls
                 2 * K * H * Tp +                            # depthwise taps
                 20 * H * Tp + 2 * BN * Tp)                  # PReLU + 2x GN + res/skip adds
    flops = B * (8 * Cin * Tp + 2 * BN * Cin * Tp + L * flops_blk
                 + 2 * BN * Tp + 2 * Od * BN * Tp)
    cost = pl.CostEstimate(flops=int(flops),
                           transcendentals=int(B * (1 + 2 * L)),
                           bytes_accessed=int(B * Cin * Tp * 4 + B * Od * Tp * 4
                                              + weight_bytes))

    kfn = _make_tcn_kernel(K, dils, pads, T)
    yp = pl.pallas_call(
        kfn,
        out_shape=jax.ShapeDtypeStruct((B, Od, Tp), x.dtype),
        grid=(B,),
        in_specs=in_specs,
        out_specs=pl.BlockSpec((1, Od, Tp), lambda b: (b, 0, 0)),
        compiler_params=pltpu.CompilerParams(
            dimension_semantics=("parallel",),
            vmem_limit_bytes=vmem_limit),
        cost_estimate=cost,
    )(*args)
    return yp[:, :, :T]


# -------------------------- parameters (deterministic) ------------------------
def init_params(key, input_dim, output_dim, BN_dim, hidden_dim, layer, stack,
                kernel=3, dilated=True):
    keys = list(jax.random.split(key, 16 + 12 * layer * stack))
    ctr = [0]

    def nrm(shape, scale=0.1):
        k = keys[ctr[0]]
        ctr[0] += 1
        return (scale * jax.random.normal(k, shape)).astype(jnp.float32)

    f32 = jnp.float32
    p = {
        "kernel": kernel,
        "ln_w": 1.0 + nrm((input_dim, 1)),
        "ln_b": nrm((input_dim, 1)),
        "bn_w": nrm((BN_dim, input_dim)),
        "bn_b": nrm((BN_dim, 1)),
        "out_p": jnp.full((1, 1), 0.25, f32),
        "out_w": nrm((output_dim, BN_dim)),
        "out_b": nrm((output_dim, 1)),
        "blocks": [], "dilations": [], "paddings": [],
    }
    for _ in range(stack):
        for i in range(layer):
            d = 2 ** i if dilated else 1
            pad = d if dilated else 1
            bp = {
                "w1": nrm((hidden_dim, BN_dim)), "b1": nrm((hidden_dim, 1)),
                "p1": jnp.full((1, 1), 0.25, f32),
                "g1w": 1.0 + nrm((hidden_dim, 1)), "g1b": nrm((hidden_dim, 1)),
                "dw": nrm((hidden_dim, kernel)), "db": nrm((hidden_dim, 1)),
                "p2": jnp.full((1, 1), 0.25, f32),
                "g2w": 1.0 + nrm((hidden_dim, 1)), "g2b": nrm((hidden_dim, 1)),
                "wr": nrm((BN_dim, hidden_dim)), "br": nrm((BN_dim, 1)),
                "ws": nrm((BN_dim, hidden_dim)), "bs": nrm((BN_dim, 1)),
            }
            p["blocks"].append(bp)
            p["dilations"].append(d)
            p["paddings"].append(pad)
    return p


# ---------------------------- pure-JAX reference -------------------------------
def ref_forward(x, params):
    def gn(x, w, b):
        mean = jnp.mean(x, axis=(1, 2), keepdims=True)
        var = jnp.mean((x - mean) ** 2, axis=(1, 2), keepdims=True)
        return (x - mean) / jnp.sqrt(var + EPS) * w[None] + b[None]

    def prelu(x, p):
        return jnp.where(x > 0, x, x * p[None])

    def conv1x1(x, w, b):
        return jnp.einsum("oc,bct->bot", w, x) + b[None]

    out = conv1x1(gn(x, params["ln_w"], params["ln_b"]), params["bn_w"], params["bn_b"])
    skip = jnp.zeros_like(out)
    K = params["kernel"]
    for bp, d, pad in zip(params["blocks"], params["dilations"], params["paddings"]):
        h = gn(prelu(conv1x1(out, bp["w1"], bp["b1"]), bp["p1"]), bp["g1w"], bp["g1b"])
        T = h.shape[-1]
        T_out = T + 2 * pad - d * (K - 1)
        hp = jnp.pad(h, ((0, 0), (0, 0), (pad, pad)))
        acc = jnp.zeros(h.shape[:2] + (T_out,), h.dtype)
        for k in range(K):
            acc = acc + bp["dw"][None, :, k:k + 1] * hp[:, :, k * d:k * d + T_out]
        h2 = acc + bp["db"][None]
        h2 = gn(prelu(h2, bp["p2"]), bp["g2w"], bp["g2b"])
        out = out + conv1x1(h2, bp["wr"], bp["br"])
        skip = skip + conv1x1(h2, bp["ws"], bp["bs"])
    return conv1x1(prelu(skip, params["out_p"]), params["out_w"], params["out_b"])


# ------------------------------------ main -------------------------------------
if __name__ == "__main__":
    B = 2
    input_dim, output_dim = 8, 8
    BN_dim, hidden_dim = 16, 32
    layer, stack, kernel = 2, 2, 3
    T = 64

    key = jax.random.PRNGKey(0)
    kx, kp = jax.random.split(key)
    x = jax.random.normal(kx, (B, input_dim, T), jnp.float32)
    params = init_params(kp, input_dim, output_dim, BN_dim, hidden_dim,
                         layer, stack, kernel=kernel, dilated=True)

    y = tcn_forward(x, params)
    y = jax.block_until_ready(y)

    y_ref = ref_forward(x, params)
    # matmuls run with bf16 operands (f32 accumulation) -> slightly looser tolerance
    np.testing.assert_allclose(np.asarray(y), np.asarray(y_ref), rtol=3e-2, atol=3e-2)

    print("KERNEL_OK")
</pallas_src>

<mosaic_0001>
module attributes {stable_mosaic.version = 11 : i64} {
  func.func @tcn_kernel(%arg0: i32, %arg1: memref<1x8x128xf32, #tpu.memory_space<vmem>>, %arg2: memref<8x1xf32, #tpu.memory_space<vmem>>, %arg3: memref<8x1xf32, #tpu.memory_space<vmem>>, %arg4: memref<16x8xbf16, #tpu.memory_space<vmem>>, %arg5: memref<16x1xf32, #tpu.memory_space<vmem>>, %arg6: memref<4x32x16xbf16, #tpu.memory_space<vmem>>, %arg7: memref<4x32x1xf32, #tpu.memory_space<vmem>>, %arg8: memref<4xf32, #tpu.memory_space<smem>>, %arg9: memref<4x32x1xf32, #tpu.memory_space<vmem>>, %arg10: memref<4x32x1xf32, #tpu.memory_space<vmem>>, %arg11: memref<4x32x3xf32, #tpu.memory_space<vmem>>, %arg12: memref<4x32x1xf32, #tpu.memory_space<vmem>>, %arg13: memref<4xf32, #tpu.memory_space<smem>>, %arg14: memref<4x32x1xf32, #tpu.memory_space<vmem>>, %arg15: memref<4x32x1xf32, #tpu.memory_space<vmem>>, %arg16: memref<4x32x32xbf16, #tpu.memory_space<vmem>>, %arg17: memref<4x32x1xf32, #tpu.memory_space<vmem>>, %arg18: memref<1xf32, #tpu.memory_space<smem>>, %arg19: memref<8x16xbf16, #tpu.memory_space<vmem>>, %arg20: memref<8x1xf32, #tpu.memory_space<vmem>>, %arg21: memref<1x8x128xf32, #tpu.memory_space<vmem>>) attributes {dimension_semantics = [#tpu.dimension_semantics<parallel>], iteration_bounds = array<i64: 2>, scalar_prefetch = 0 : i64, scratch_operands = 0 : i64, tpu.core_type = #tpu.core_type<tc>, window_params = [{transform_indices = @transform_0, window_bounds = array<i64: 1, 8, 128>}, {pipeline_mode = #tpu.pipeline_mode<synchronous>, transform_indices = @transform_1, window_bounds = array<i64: 8, 1>}, {pipeline_mode = #tpu.pipeline_mode<synchronous>, transform_indices = @transform_2, window_bounds = array<i64: 8, 1>}, {pipeline_mode = #tpu.pipeline_mode<synchronous>, transform_indices = @transform_3, window_bounds = array<i64: 16, 8>}, {pipeline_mode = #tpu.pipeline_mode<synchronous>, transform_indices = @transform_4, window_bounds = array<i64: 16, 1>}, {pipeline_mode = #tpu.pipeline_mode<synchronous>, transform_indices = @transform_5, window_bounds = array<i64: 4, 32, 16>}, {pipeline_mode = #tpu.pipeline_mode<synchronous>, transform_indices = @transform_6, window_bounds = array<i64: 4, 32, 1>}, {transform_indices = @transform_7, window_bounds = array<i64: 4>}, {pipeline_mode = #tpu.pipeline_mode<synchronous>, transform_indices = @transform_8, window_bounds = array<i64: 4, 32, 1>}, {pipeline_mode = #tpu.pipeline_mode<synchronous>, transform_indices = @transform_9, window_bounds = array<i64: 4, 32, 1>}, {pipeline_mode = #tpu.pipeline_mode<synchronous>, transform_indices = @transform_10, window_bounds = array<i64: 4, 32, 3>}, {pipeline_mode = #tpu.pipeline_mode<synchronous>, transform_indices = @transform_11, window_bounds = array<i64: 4, 32, 1>}, {transform_indices = @transform_12, window_bounds = array<i64: 4>}, {pipeline_mode = #tpu.pipeline_mode<synchronous>, transform_indices = @transform_13, window_bounds = array<i64: 4, 32, 1>}, {pipeline_mode = #tpu.pipeline_mode<synchronous>, transform_indices = @transform_14, window_bounds = array<i64: 4, 32, 1>}, {pipeline_mode = #tpu.pipeline_mode<synchronous>, transform_indices = @transform_15, window_bounds = array<i64: 4, 32, 32>}, {pipeline_mode = #tpu.pipeline_mode<synchronous>, transform_indices = @transform_16, window_bounds = array<i64: 4, 32, 1>}, {transform_indices = @transform_17, window_bounds = array<i64: 1>}, {pipeline_mode = #tpu.pipeline_mode<synchronous>, transform_indices = @transform_18, window_bounds = array<i64: 8, 16>}, {pipeline_mode = #tpu.pipeline_mode<synchronous>, transform_indices = @transform_19, window_bounds = array<i64: 8, 1>}, {transform_indices = @transform_20, window_bounds = array<i64: 1, 8, 128>}]} {
    %c0 = arith.constant 0 : index
    %c0_0 = arith.constant 0 : index
    %c0_1 = arith.constant 0 : index
    %0 = vector.load %arg1[%c0, %c0_0, %c0_1] : memref<1x8x128xf32, #tpu.memory_space<vmem>>, vector<1x8x128xf32>
    %1 = vector.shape_cast %0 : vector<1x8x128xf32> to vector<8x128xf32>
    %2 = tpu.iota {dimensions = array<i32: 1>} : vector<1x128xi32>
    %c64_i32 = arith.constant 64 : i32
    %3 = vector.broadcast %c64_i32 : i32 to vector<1x128xi32>
    %4 = arith.cmpi slt, %2, %3 : vector<1x128xi32>
    %5 = arith.extui %4 : vector<1x128xi1> to vector<1x128xi32>
    %6 = arith.sitofp %5 : vector<1x128xi32> to vector<1x128xf32>
    %c0_2 = arith.constant 0 : index
    %c0_3 = arith.constant 0 : index
    %7 = vector.load %arg4[%c0_2, %c0_3] : memref<16x8xbf16, #tpu.memory_space<vmem>>, vector<16x8xbf16>
    %c0_4 = arith.constant 0 : index
    %c0_5 = arith.constant 0 : index
    %8 = vector.load %arg2[%c0_4, %c0_5] : memref<8x1xf32, #tpu.memory_space<vmem>>, vector<8x1xf32>
    %c0_6 = arith.constant 0 : index
    %c0_7 = arith.constant 0 : index
    %9 = vector.load %arg3[%c0_6, %c0_7] : memref<8x1xf32, #tpu.memory_space<vmem>>, vector<8x1xf32>
    %10 = vector.shape_cast %1 : vector<8x128xf32> to vector<1x8x128xf32>
    %cst = arith.constant dense<0.000000e+00> : vector<1xf32>
    %11 = vector.multi_reduction <add>, %10, %cst [1, 2] : vector<1x8x128xf32> to vector<1xf32>
    %12 = vector.shape_cast %11 : vector<1xf32> to vector<1x1x1xf32>
    %13 = vector.extract %12[0, 0, 0] : f32 from vector<1x1x1xf32>
    %cst_8 = arith.constant 5.120000e+02 : f32
    %14 = arith.divf %13, %cst_8 : f32
    %15 = arith.mulf %1, %1 : vector<8x128xf32>
    %16 = vector.shape_cast %15 : vector<8x128xf32> to vector<1x8x128xf32>
    %cst_9 = arith.constant dense<0.000000e+00> : vector<1xf32>
    %17 = vector.multi_reduction <add>, %16, %cst_9 [1, 2] : vector<1x8x128xf32> to vector<1xf32>
    %18 = vector.shape_cast %17 : vector<1xf32> to vector<1x1x1xf32>
    %19 = vector.extract %18[0, 0, 0] : f32 from vector<1x1x1xf32>
    %cst_10 = arith.constant 5.120000e+02 : f32
    %20 = arith.divf %19, %cst_10 : f32
    %21 = arith.mulf %14, %14 : f32
    %22 = arith.subf %20, %21 : f32
    %cst_11 = arith.constant 0.000000e+00 : f32
    %23 = arith.maximumf %22, %cst_11 : f32
    %cst_12 = arith.constant 9.99999993E-9 : f32
    %24 = arith.addf %23, %cst_12 : f32
    %25 = math.rsqrt %24 : f32
    %26 = vector.broadcast %25 : f32 to vector<8x1xf32>
    %27 = arith.mulf %8, %26 : vector<8x1xf32>
    %28 = vector.broadcast %27 : vector<8x1xf32> to vector<8x128xf32>
    %29 = arith.mulf %1, %28 : vector<8x128xf32>
    %30 = vector.broadcast %14 : f32 to vector<8x1xf32>
    %31 = arith.mulf %30, %27 : vector<8x1xf32>
    %32 = arith.subf %9, %31 : vector<8x1xf32>
    %33 = vector.broadcast %32 : vector<8x1xf32> to vector<8x128xf32>
    %34 = arith.addf %29, %33 : vector<8x128xf32>
    %35 = arith.truncf %34 : vector<8x128xf32> to vector<8x128xbf16>
    %cst_13 = arith.constant dense<0.000000e+00> : vector<16x128xf32>
    %36 = tpu.matmul %7, %35, %cst_13 {dimension_numbers = #tpu.dot_dimension_numbers<[1], [0], [0], [1], [0, 0, 1, 1], [], []>} : vector<16x8xbf16>, vector<8x128xbf16>, vector<16x128xf32> -> vector<16x128xf32>
    %c0_14 = arith.constant 0 : index
    %c0_15 = arith.constant 0 : index
    %37 = vector.load %arg5[%c0_14, %c0_15] : memref<16x1xf32, #tpu.memory_space<vmem>>, vector<16x1xf32>
    %38 = vector.broadcast %37 : vector<16x1xf32> to vector<16x128xf32>
    %39 = arith.addf %36, %38 : vector<16x128xf32>
    %c0_16 = arith.constant 0 : index
    %c0_17 = arith.constant 0 : index
    %c0_18 = arith.constant 0 : index
    %40 = vector.load %arg6[%c0_16, %c0_17, %c0_18] : memref<4x32x16xbf16, #tpu.memory_space<vmem>>, vector<1x32x16xbf16>
    %41 = vector.shape_cast %40 : vector<1x32x16xbf16> to vector<32x16xbf16>
    %42 = arith.truncf %39 : vector<16x128xf32> to vector<16x128xbf16>
    %cst_19 = arith.constant dense<0.000000e+00> : vector<32x128xf32>
    %43 = tpu.matmul %41, %42, %cst_19 {dimension_numbers = #tpu.dot_dimension_numbers<[1], [0], [0], [1], [0, 0, 1, 1], [], []>} : vector<32x16xbf16>, vector<16x128xbf16>, vector<32x128xf32> -> vector<32x128xf32>
    %c0_20 = arith.constant 0 : index
    %c0_21 = arith.constant 0 : index
    %c0_22 = arith.constant 0 : index
    %44 = vector.load %arg7[%c0_20, %c0_21, %c0_22] : memref<4x32x1xf32, #tpu.memory_space<vmem>>, vector<1x32x1xf32>
    %45 = vector.shape_cast %44 : vector<1x32x1xf32> to vector<32x1xf32>
    %46 = vector.broadcast %45 : vector<32x1xf32> to vector<32x128xf32>
    %47 = arith.addf %43, %46 : vector<32x128xf32>
    %c0_23 = arith.constant 0 : index
    %48 = memref.load %arg8[%c0_23] : memref<4xf32, #tpu.memory_space<smem>>
    %cst_24 = arith.constant 0.000000e+00 : f32
    %49 = vector.broadcast %cst_24 : f32 to vector<32x128xf32>
    %50 = arith.cmpf ogt, %47, %49 : vector<32x128xf32>
    %51 = vector.broadcast %48 : f32 to vector<32x128xf32>
    %52 = arith.mulf %47, %51 : vector<32x128xf32>
    %53 = arith.select %50, %47, %52 : vector<32x128xi1>, vector<32x128xf32>
    %c0_25 = arith.constant 0 : index
    %c0_26 = arith.constant 0 : index
    %c0_27 = arith.constant 0 : index
    %54 = vector.load %arg9[%c0_25, %c0_26, %c0_27] : memref<4x32x1xf32, #tpu.memory_space<vmem>>, vector<1x32x1xf32>
    %55 = vector.shape_cast %54 : vector<1x32x1xf32> to vector<32x1xf32>
    %c0_28 = arith.constant 0 : index
    %c0_29 = arith.constant 0 : index
    %c0_30 = arith.constant 0 : index
    %56 = vector.load %arg10[%c0_28, %c0_29, %c0_30] : memref<4x32x1xf32, #tpu.memory_space<vmem>>, vector<1x32x1xf32>
    %57 = vector.shape_cast %56 : vector<1x32x1xf32> to vector<32x1xf32>
    %58 = vector.broadcast %6 : vector<1x128xf32> to vector<32x128xf32>
    %59 = arith.mulf %53, %58 : vector<32x128xf32>
    %60 = vector.shape_cast %59 : vector<32x128xf32> to vector<1x32x128xf32>
    %cst_31 = arith.constant dense<0.000000e+00> : vector<1xf32>
    %61 = vector.multi_reduction <add>, %60, %cst_31 [1, 2] : vector<1x32x128xf32> to vector<1xf32>
    %62 = vector.shape_cast %61 : vector<1xf32> to vector<1x1x1xf32>
    %63 = vector.extract %62[0, 0, 0] : f32 from vector<1x1x1xf32>
    %cst_32 = arith.constant 2.048000e+03 : f32
    %64 = arith.divf %63, %cst_32 : f32
    %65 = arith.mulf %59, %59 : vector<32x128xf32>
    %66 = vector.shape_cast %65 : vector<32x128xf32> to vector<1x32x128xf32>
    %cst_33 = arith.constant dense<0.000000e+00> : vector<1xf32>
    %67 = vector.multi_reduction <add>, %66, %cst_33 [1, 2] : vector<1x32x128xf32> to vector<1xf32>
    %68 = vector.shape_cast %67 : vector<1xf32> to vector<1x1x1xf32>
    %69 = vector.extract %68[0, 0, 0] : f32 from vector<1x1x1xf32>
    %cst_34 = arith.constant 2.048000e+03 : f32
    %70 = arith.divf %69, %cst_34 : f32
    %71 = arith.mulf %64, %64 : f32
    %72 = arith.subf %70, %71 : f32
    %cst_35 = arith.constant 0.000000e+00 : f32
    %73 = arith.maximumf %72, %cst_35 : f32
    %cst_36 = arith.constant 9.99999993E-9 : f32
    %74 = arith.addf %73, %cst_36 : f32
    %75 = math.rsqrt %74 : f32
    %76 = vector.broadcast %75 : f32 to vector<32x1xf32>
    %77 = arith.mulf %55, %76 : vector<32x1xf32>
    %78 = vector.broadcast %77 : vector<32x1xf32> to vector<32x128xf32>
    %79 = arith.mulf %59, %78 : vector<32x128xf32>
    %80 = vector.broadcast %64 : f32 to vector<32x1xf32>
    %81 = arith.mulf %80, %77 : vector<32x1xf32>
    %82 = arith.subf %57, %81 : vector<32x1xf32>
    %83 = vector.broadcast %82 : vector<32x1xf32> to vector<32x128xf32>
    %84 = arith.addf %79, %83 : vector<32x128xf32>
    %85 = vector.broadcast %6 : vector<1x128xf32> to vector<32x128xf32>
    %86 = arith.mulf %84, %85 : vector<32x128xf32>
    %c0_37 = arith.constant 0 : index
    %c0_38 = arith.constant 0 : index
    %c0_39 = arith.constant 0 : index
    %87 = vector.load %arg11[%c0_37, %c0_38, %c0_39] : memref<4x32x3xf32, #tpu.memory_space<vmem>>, vector<1x32x3xf32>
    %88 = vector.shape_cast %87 : vector<1x32x3xf32> to vector<32x3xf32>
    %c1_i32 = arith.constant 1 : i32
    %89 = tpu.dynamic_rotate %86 by %c1_i32 dim 1 : vector<32x128xf32>, i32 -> vector<32x128xf32>
    %90 = vector.extract_strided_slice %88 {offsets = [0, 0], sizes = [32, 1], strides = [1, 1]} : vector<32x3xf32> to vector<32x1xf32>
    %91 = vector.broadcast %90 : vector<32x1xf32> to vector<32x128xf32>
    %92 = arith.mulf %91, %89 : vector<32x128xf32>
    %93 = vector.extract_strided_slice %88 {offsets = [0, 1], sizes = [32, 1], strides = [1, 1]} : vector<32x3xf32> to vector<32x1xf32>
    %94 = vector.broadcast %93 : vector<32x1xf32> to vector<32x128xf32>
    %95 = arith.mulf %94, %86 : vector<32x128xf32>
    %96 = arith.addf %92, %95 : vector<32x128xf32>
    %c127_i32 = arith.constant 127 : i32
    %97 = tpu.dynamic_rotate %86 by %c127_i32 dim 1 : vector<32x128xf32>, i32 -> vector<32x128xf32>
    %98 = vector.extract_strided_slice %88 {offsets = [0, 2], sizes = [32, 1], strides = [1, 1]} : vector<32x3xf32> to vector<32x1xf32>
    %99 = vector.broadcast %98 : vector<32x1xf32> to vector<32x128xf32>
    %100 = arith.mulf %99, %97 : vector<32x128xf32>
    %101 = arith.addf %96, %100 : vector<32x128xf32>
    %c0_40 = arith.constant 0 : index
    %c0_41 = arith.constant 0 : index
    %c0_42 = arith.constant 0 : index
    %102 = vector.load %arg12[%c0_40, %c0_41, %c0_42] : memref<4x32x1xf32, #tpu.memory_space<vmem>>, vector<1x32x1xf32>
    %103 = vector.shape_cast %102 : vector<1x32x1xf32> to vector<32x1xf32>
    %104 = vector.broadcast %103 : vector<32x1xf32> to vector<32x128xf32>
    %105 = arith.addf %101, %104 : vector<32x128xf32>
    %c0_43 = arith.constant 0 : index
    %106 = memref.load %arg13[%c0_43] : memref<4xf32, #tpu.memory_space<smem>>
    %cst_44 = arith.constant 0.000000e+00 : f32
    %107 = vector.broadcast %cst_44 : f32 to vector<32x128xf32>
    %108 = arith.cmpf ogt, %105, %107 : vector<32x128xf32>
    %109 = vector.broadcast %106 : f32 to vector<32x128xf32>
    %110 = arith.mulf %105, %109 : vector<32x128xf32>
    %111 = arith.select %108, %105, %110 : vector<32x128xi1>, vector<32x128xf32>
    %c0_45 = arith.constant 0 : index
    %c0_46 = arith.constant 0 : index
    %c0_47 = arith.constant 0 : index
    %112 = vector.load %arg14[%c0_45, %c0_46, %c0_47] : memref<4x32x1xf32, #tpu.memory_space<vmem>>, vector<1x32x1xf32>
    %113 = vector.shape_cast %112 : vector<1x32x1xf32> to vector<32x1xf32>
    %c0_48 = arith.constant 0 : index
    %c0_49 = arith.constant 0 : index
    %c0_50 = arith.constant 0 : index
    %114 = vector.load %arg15[%c0_48, %c0_49, %c0_50] : memref<4x32x1xf32, #tpu.memory_space<vmem>>, vector<1x32x1xf32>
    %115 = vector.shape_cast %114 : vector<1x32x1xf32> to vector<32x1xf32>
    %116 = vector.broadcast %6 : vector<1x128xf32> to vector<32x128xf32>
    %117 = arith.mulf %111, %116 : vector<32x128xf32>
    %118 = vector.shape_cast %117 : vector<32x128xf32> to vector<1x32x128xf32>
    %cst_51 = arith.constant dense<0.000000e+00> : vector<1xf32>
    %119 = vector.multi_reduction <add>, %118, %cst_51 [1, 2] : vector<1x32x128xf32> to vector<1xf32>
    %120 = vector.shape_cast %119 : vector<1xf32> to vector<1x1x1xf32>
    %121 = vector.extract %120[0, 0, 0] : f32 from vector<1x1x1xf32>
    %cst_52 = arith.constant 2.048000e+03 : f32
    %122 = arith.divf %121, %cst_52 : f32
    %123 = arith.mulf %117, %117 : vector<32x128xf32>
    %124 = vector.shape_cast %123 : vector<32x128xf32> to vector<1x32x128xf32>
    %cst_53 = arith.constant dense<0.000000e+00> : vector<1xf32>
    %125 = vector.multi_reduction <add>, %124, %cst_53 [1, 2] : vector<1x32x128xf32> to vector<1xf32>
    %126 = vector.shape_cast %125 : vector<1xf32> to vector<1x1x1xf32>
    %127 = vector.extract %126[0, 0, 0] : f32 from vector<1x1x1xf32>
    %cst_54 = arith.constant 2.048000e+03 : f32
    %128 = arith.divf %127, %cst_54 : f32
    %129 = arith.mulf %122, %122 : f32
    %130 = arith.subf %128, %129 : f32
    %cst_55 = arith.constant 0.000000e+00 : f32
    %131 = arith.maximumf %130, %cst_55 : f32
    %cst_56 = arith.constant 9.99999993E-9 : f32
    %132 = arith.addf %131, %cst_56 : f32
    %133 = math.rsqrt %132 : f32
    %134 = vector.broadcast %133 : f32 to vector<32x1xf32>
    %135 = arith.mulf %113, %134 : vector<32x1xf32>
    %136 = vector.broadcast %135 : vector<32x1xf32> to vector<32x128xf32>
    %137 = arith.mulf %117, %136 : vector<32x128xf32>
    %138 = vector.broadcast %122 : f32 to vector<32x1xf32>
    %139 = arith.mulf %138, %135 : vector<32x1xf32>
    %140 = arith.subf %115, %139 : vector<32x1xf32>
    %141 = vector.broadcast %140 : vector<32x1xf32> to vector<32x128xf32>
    %142 = arith.addf %137, %141 : vector<32x128xf32>
    %c0_57 = arith.constant 0 : index
    %c0_58 = arith.constant 0 : index
    %c0_59 = arith.constant 0 : index
    %143 = vector.load %arg16[%c0_57, %c0_58, %c0_59] : memref<4x32x32xbf16, #tpu.memory_space<vmem>>, vector<1x32x32xbf16>
    %144 = vector.shape_cast %143 : vector<1x32x32xbf16> to vector<32x32xbf16>
    %145 = arith.truncf %142 : vector<32x128xf32> to vector<32x128xbf16>
    %cst_60 = arith.constant dense<0.000000e+00> : vector<32x128xf32>
    %146 = tpu.matmul %144, %145, %cst_60 {dimension_numbers = #tpu.dot_dimension_numbers<[1], [0], [0], [1], [0, 0, 1, 1], [], []>} : vector<32x32xbf16>, vector<32x128xbf16>, vector<32x128xf32> -> vector<32x128xf32>
    %c0_61 = arith.constant 0 : index
    %c0_62 = arith.constant 0 : index
    %c0_63 = arith.constant 0 : index
    %147 = vector.load %arg17[%c0_61, %c0_62, %c0_63] : memref<4x32x1xf32, #tpu.memory_space<vmem>>, vector<1x32x1xf32>
    %148 = vector.shape_cast %147 : vector<1x32x1xf32> to vector<32x1xf32>
    %149 = vector.broadcast %148 : vector<32x1xf32> to vector<32x128xf32>
    %150 = arith.addf %146, %149 : vector<32x128xf32>
    %151 = vector.extract_strided_slice %150 {offsets = [0, 0], sizes = [16, 128], strides = [1, 1]} : vector<32x128xf32> to vector<16x128xf32>
    %152 = arith.addf %39, %151 : vector<16x128xf32>
    %153 = vector.extract_strided_slice %150 {offsets = [16, 0], sizes = [16, 128], strides = [1, 1]} : vector<32x128xf32> to vector<16x128xf32>
    %c1 = arith.constant 1 : index
    %c0_64 = arith.constant 0 : index
    %c0_65 = arith.constant 0 : index
    %154 = vector.load %arg6[%c1, %c0_64, %c0_65] : memref<4x32x16xbf16, #tpu.memory_space<vmem>>, vector<1x32x16xbf16>
    %155 = vector.shape_cast %154 : vector<1x32x16xbf16> to vector<32x16xbf16>
    %156 = arith.truncf %152 : vector<16x128xf32> to vector<16x128xbf16>
    %cst_66 = arith.constant dense<0.000000e+00> : vector<32x128xf32>
    %157 = tpu.matmul %155, %156, %cst_66 {dimension_numbers = #tpu.dot_dimension_numbers<[1], [0], [0], [1], [0, 0, 1, 1], [], []>} : vector<32x16xbf16>, vector<16x128xbf16>, vector<32x128xf32> -> vector<32x128xf32>
    %c1_67 = arith.constant 1 : index
    %c0_68 = arith.constant 0 : index
    %c0_69 = arith.constant 0 : index
    %158 = vector.load %arg7[%c1_67, %c0_68, %c0_69] : memref<4x32x1xf32, #tpu.memory_space<vmem>>, vector<1x32x1xf32>
    %159 = vector.shape_cast %158 : vector<1x32x1xf32> to vector<32x1xf32>
    %160 = vector.broadcast %159 : vector<32x1xf32> to vector<32x128xf32>
    %161 = arith.addf %157, %160 : vector<32x128xf32>
    %c1_70 = arith.constant 1 : index
    %162 = memref.load %arg8[%c1_70] : memref<4xf32, #tpu.memory_space<smem>>
    %cst_71 = arith.constant 0.000000e+00 : f32
    %163 = vector.broadcast %cst_71 : f32 to vector<32x128xf32>
    %164 = arith.cmpf ogt, %161, %163 : vector<32x128xf32>
    %165 = vector.broadcast %162 : f32 to vector<32x128xf32>
    %166 = arith.mulf %161, %165 : vector<32x128xf32>
    %167 = arith.select %164, %161, %166 : vector<32x128xi1>, vector<32x128xf32>
    %c1_72 = arith.constant 1 : index
    %c0_73 = arith.constant 0 : index
    %c0_74 = arith.constant 0 : index
    %168 = vector.load %arg9[%c1_72, %c0_73, %c0_74] : memref<4x32x1xf32, #tpu.memory_space<vmem>>, vector<1x32x1xf32>
    %169 = vector.shape_cast %168 : vector<1x32x1xf32> to vector<32x1xf32>
    %c1_75 = arith.constant 1 : index
    %c0_76 = arith.constant 0 : index
    %c0_77 = arith.constant 0 : index
    %170 = vector.load %arg10[%c1_75, %c0_76, %c0_77] : memref<4x32x1xf32, #tpu.memory_space<vmem>>, vector<1x32x1xf32>
    %171 = vector.shape_cast %170 : vector<1x32x1xf32> to vector<32x1xf32>
    %172 = vector.broadcast %6 : vector<1x128xf32> to vector<32x128xf32>
    %173 = arith.mulf %167, %172 : vector<32x128xf32>
    %174 = vector.shape_cast %173 : vector<32x128xf32> to vector<1x32x128xf32>
    %cst_78 = arith.constant dense<0.000000e+00> : vector<1xf32>
    %175 = vector.multi_reduction <add>, %174, %cst_78 [1, 2] : vector<1x32x128xf32> to vector<1xf32>
    %176 = vector.shape_cast %175 : vector<1xf32> to vector<1x1x1xf32>
    %177 = vector.extract %176[0, 0, 0] : f32 from vector<1x1x1xf32>
    %cst_79 = arith.constant 2.048000e+03 : f32
    %178 = arith.divf %177, %cst_79 : f32
    %179 = arith.mulf %173, %173 : vector<32x128xf32>
    %180 = vector.shape_cast %179 : vector<32x128xf32> to vector<1x32x128xf32>
    %cst_80 = arith.constant dense<0.000000e+00> : vector<1xf32>
    %181 = vector.multi_reduction <add>, %180, %cst_80 [1, 2] : vector<1x32x128xf32> to vector<1xf32>
    %182 = vector.shape_cast %181 : vector<1xf32> to vector<1x1x1xf32>
    %183 = vector.extract %182[0, 0, 0] : f32 from vector<1x1x1xf32>
    %cst_81 = arith.constant 2.048000e+03 : f32
    %184 = arith.divf %183, %cst_81 : f32
    %185 = arith.mulf %178, %178 : f32
    %186 = arith.subf %184, %185 : f32
    %cst_82 = arith.constant 0.000000e+00 : f32
    %187 = arith.maximumf %186, %cst_82 : f32
    %cst_83 = arith.constant 9.99999993E-9 : f32
    %188 = arith.addf %187, %cst_83 : f32
    %189 = math.rsqrt %188 : f32
    %190 = vector.broadcast %189 : f32 to vector<32x1xf32>
    %191 = arith.mulf %169, %190 : vector<32x1xf32>
    %192 = vector.broadcast %191 : vector<32x1xf32> to vector<32x128xf32>
    %193 = arith.mulf %173, %192 : vector<32x128xf32>
    %194 = vector.broadcast %178 : f32 to vector<32x1xf32>
    %195 = arith.mulf %194, %191 : vector<32x1xf32>
    %196 = arith.subf %171, %195 : vector<32x1xf32>
    %197 = vector.broadcast %196 : vector<32x1xf32> to vector<32x128xf32>
    %198 = arith.addf %193, %197 : vector<32x128xf32>
    %199 = vector.broadcast %6 : vector<1x128xf32> to vector<32x128xf32>
    %200 = arith.mulf %198, %199 : vector<32x128xf32>
    %c1_84 = arith.constant 1 : index
    %c0_85 = arith.constant 0 : index
    %c0_86 = arith.constant 0 : index
    %201 = vector.load %arg11[%c1_84, %c0_85, %c0_86] : memref<4x32x3xf32, #tpu.memory_space<vmem>>, vector<1x32x3xf32>
    %202 = vector.shape_cast %201 : vector<1x32x3xf32> to vector<32x3xf32>
    %c2_i32 = arith.constant 2 : i32
    %203 = tpu.dynamic_rotate %200 by %c2_i32 dim 1 : vector<32x128xf32>, i32 -> vector<32x128xf32>
    %204 = vector.extract_strided_slice %202 {offsets = [0, 0], sizes = [32, 1], strides = [1, 1]} : vector<32x3xf32> to vector<32x1xf32>
    %205 = vector.broadcast %204 : vector<32x1xf32> to vector<32x128xf32>
    %206 = arith.mulf %205, %203 : vector<32x128xf32>
    %207 = vector.extract_strided_slice %202 {offsets = [0, 1], sizes = [32, 1], strides = [1, 1]} : vector<32x3xf32> to vector<32x1xf32>
    %208 = vector.broadcast %207 : vector<32x1xf32> to vector<32x128xf32>
    %209 = arith.mulf %208, %200 : vector<32x128xf32>
    %210 = arith.addf %206, %209 : vector<32x128xf32>
    %c126_i32 = arith.constant 126 : i32
    %211 = tpu.dynamic_rotate %200 by %c126_i32 dim 1 : vector<32x128xf32>, i32 -> vector<32x128xf32>
    %212 = vector.extract_strided_slice %202 {offsets = [0, 2], sizes = [32, 1], strides = [1, 1]} : vector<32x3xf32> to vector<32x1xf32>
    %213 = vector.broadcast %212 : vector<32x1xf32> to vector<32x128xf32>
    %214 = arith.mulf %213, %211 : vector<32x128xf32>
    %215 = arith.addf %210, %214 : vector<32x128xf32>
    %c1_87 = arith.constant 1 : index
    %c0_88 = arith.constant 0 : index
    %c0_89 = arith.constant 0 : index
    %216 = vector.load %arg12[%c1_87, %c0_88, %c0_89] : memref<4x32x1xf32, #tpu.memory_space<vmem>>, vector<1x32x1xf32>
    %217 = vector.shape_cast %216 : vector<1x32x1xf32> to vector<32x1xf32>
    %218 = vector.broadcast %217 : vector<32x1xf32> to vector<32x128xf32>
    %219 = arith.addf %215, %218 : vector<32x128xf32>
    %c1_90 = arith.constant 1 : index
    %220 = memref.load %arg13[%c1_90] : memref<4xf32, #tpu.memory_space<smem>>
    %cst_91 = arith.constant 0.000000e+00 : f32
    %221 = vector.broadcast %cst_91 : f32 to vector<32x128xf32>
    %222 = arith.cmpf ogt, %219, %221 : vector<32x128xf32>
    %223 = vector.broadcast %220 : f32 to vector<32x128xf32>
    %224 = arith.mulf %219, %223 : vector<32x128xf32>
    %225 = arith.select %222, %219, %224 : vector<32x128xi1>, vector<32x128xf32>
    %c1_92 = arith.constant 1 : index
    %c0_93 = arith.constant 0 : index
    %c0_94 = arith.constant 0 : index
    %226 = vector.load %arg14[%c1_92, %c0_93, %c0_94] : memref<4x32x1xf32, #tpu.memory_space<vmem>>, vector<1x32x1xf32>
    %227 = vector.shape_cast %226 : vector<1x32x1xf32> to vector<32x1xf32>
    %c1_95 = arith.constant 1 : index
    %c0_96 = arith.constant 0 : index
    %c0_97 = arith.constant 0 : index
    %228 = vector.load %arg15[%c1_95, %c0_96, %c0_97] : memref<4x32x1xf32, #tpu.memory_space<vmem>>, vector<1x32x1xf32>
    %229 = vector.shape_cast %228 : vector<1x32x1xf32> to vector<32x1xf32>
    %230 = vector.broadcast %6 : vector<1x128xf32> to vector<32x128xf32>
    %231 = arith.mulf %225, %230 : vector<32x128xf32>
    %232 = vector.shape_cast %231 : vector<32x128xf32> to vector<1x32x128xf32>
    %cst_98 = arith.constant dense<0.000000e+00> : vector<1xf32>
    %233 = vector.multi_reduction <add>, %232, %cst_98 [1, 2] : vector<1x32x128xf32> to vector<1xf32>
    %234 = vector.shape_cast %233 : vector<1xf32> to vector<1x1x1xf32>
    %235 = vector.extract %234[0, 0, 0] : f32 from vector<1x1x1xf32>
    %cst_99 = arith.constant 2.048000e+03 : f32
    %236 = arith.divf %235, %cst_99 : f32
    %237 = arith.mulf %231, %231 : vector<32x128xf32>
    %238 = vector.shape_cast %237 : vector<32x128xf32> to vector<1x32x128xf32>
    %cst_100 = arith.constant dense<0.000000e+00> : vector<1xf32>
    %239 = vector.multi_reduction <add>, %238, %cst_100 [1, 2] : vector<1x32x128xf32> to vector<1xf32>
    %240 = vector.shape_cast %239 : vector<1xf32> to vector<1x1x1xf32>
    %241 = vector.extract %240[0, 0, 0] : f32 from vector<1x1x1xf32>
    %cst_101 = arith.constant 2.048000e+03 : f32
    %242 = arith.divf %241, %cst_101 : f32
    %243 = arith.mulf %236, %236 : f32
    %244 = arith.subf %242, %243 : f32
    %cst_102 = arith.constant 0.000000e+00 : f32
    %245 = arith.maximumf %244, %cst_102 : f32
    %cst_103 = arith.constant 9.99999993E-9 : f32
    %246 = arith.addf %245, %cst_103 : f32
    %247 = math.rsqrt %246 : f32
    %248 = vector.broadcast %247 : f32 to vector<32x1xf32>
    %249 = arith.mulf %227, %248 : vector<32x1xf32>
    %250 = vector.broadcast %249 : vector<32x1xf32> to vector<32x128xf32>
    %251 = arith.mulf %231, %250 : vector<32x128xf32>
    %252 = vector.broadcast %236 : f32 to vector<32x1xf32>
    %253 = arith.mulf %252, %249 : vector<32x1xf32>
    %254 = arith.subf %229, %253 : vector<32x1xf32>
    %255 = vector.broadcast %254 : vector<32x1xf32> to vector<32x128xf32>
    %256 = arith.addf %251, %255 : vector<32x128xf32>
    %c1_104 = arith.constant 1 : index
    %c0_105 = arith.constant 0 : index
    %c0_106 = arith.constant 0 : index
    %257 = vector.load %arg16[%c1_104, %c0_105, %c0_106] : memref<4x32x32xbf16, #tpu.memory_space<vmem>>, vector<1x32x32xbf16>
    %258 = vector.shape_cast %257 : vector<1x32x32xbf16> to vector<32x32xbf16>
    %259 = arith.truncf %256 : vector<32x128xf32> to vector<32x128xbf16>
    %cst_107 = arith.constant dense<0.000000e+00> : vector<32x128xf32>
    %260 = tpu.matmul %258, %259, %cst_107 {dimension_numbers = #tpu.dot_dimension_numbers<[1], [0], [0], [1], [0, 0, 1, 1], [], []>} : vector<32x32xbf16>, vector<32x128xbf16>, vector<32x128xf32> -> vector<32x128xf32>
    %c1_108 = arith.constant 1 : index
    %c0_109 = arith.constant 0 : index
    %c0_110 = arith.constant 0 : index
    %261 = vector.load %arg17[%c1_108, %c0_109, %c0_110] : memref<4x32x1xf32, #tpu.memory_space<vmem>>, vector<1x32x1xf32>
    %262 = vector.shape_cast %261 : vector<1x32x1xf32> to vector<32x1xf32>
    %263 = vector.broadcast %262 : vector<32x1xf32> to vector<32x128xf32>
    %264 = arith.addf %260, %263 : vector<32x128xf32>
    %265 = vector.extract_strided_slice %264 {offsets = [0, 0], sizes = [16, 128], strides = [1, 1]} : vector<32x128xf32> to vector<16x128xf32>
    %266 = arith.addf %152, %265 : vector<16x128xf32>
    %267 = vector.extract_strided_slice %264 {offsets = [16, 0], sizes = [16, 128], strides = [1, 1]} : vector<32x128xf32> to vector<16x128xf32>
    %268 = arith.addf %153, %267 : vector<16x128xf32>
    %c2 = arith.constant 2 : index
    %c0_111 = arith.constant 0 : index
    %c0_112 = arith.constant 0 : index
    %269 = vector.load %arg6[%c2, %c0_111, %c0_112] : memref<4x32x16xbf16, #tpu.memory_space<vmem>>, vector<1x32x16xbf16>
    %270 = vector.shape_cast %269 : vector<1x32x16xbf16> to vector<32x16xbf16>
    %271 = arith.truncf %266 : vector<16x128xf32> to vector<16x128xbf16>
    %cst_113 = arith.constant dense<0.000000e+00> : vector<32x128xf32>
    %272 = tpu.matmul %270, %271, %cst_113 {dimension_numbers = #tpu.dot_dimension_numbers<[1], [0], [0], [1], [0, 0, 1, 1], [], []>} : vector<32x16xbf16>, vector<16x128xbf16>, vector<32x128xf32> -> vector<32x128xf32>
    %c2_114 = arith.constant 2 : index
    %c0_115 = arith.constant 0 : index
    %c0_116 = arith.constant 0 : index
    %273 = vector.load %arg7[%c2_114, %c0_115, %c0_116] : memref<4x32x1xf32, #tpu.memory_space<vmem>>, vector<1x32x1xf32>
    %274 = vector.shape_cast %273 : vector<1x32x1xf32> to vector<32x1xf32>
    %275 = vector.broadcast %274 : vector<32x1xf32> to vector<32x128xf32>
    %276 = arith.addf %272, %275 : vector<32x128xf32>
    %c2_117 = arith.constant 2 : index
    %277 = memref.load %arg8[%c2_117] : memref<4xf32, #tpu.memory_space<smem>>
    %cst_118 = arith.constant 0.000000e+00 : f32
    %278 = vector.broadcast %cst_118 : f32 to vector<32x128xf32>
    %279 = arith.cmpf ogt, %276, %278 : vector<32x128xf32>
    %280 = vector.broadcast %277 : f32 to vector<32x128xf32>
    %281 = arith.mulf %276, %280 : vector<32x128xf32>
    %282 = arith.select %279, %276, %281 : vector<32x128xi1>, vector<32x128xf32>
    %c2_119 = arith.constant 2 : index
    %c0_120 = arith.constant 0 : index
    %c0_121 = arith.constant 0 : index
    %283 = vector.load %arg9[%c2_119, %c0_120, %c0_121] : memref<4x32x1xf32, #tpu.memory_space<vmem>>, vector<1x32x1xf32>
    %284 = vector.shape_cast %283 : vector<1x32x1xf32> to vector<32x1xf32>
    %c2_122 = arith.constant 2 : index
    %c0_123 = arith.constant 0 : index
    %c0_124 = arith.constant 0 : index
    %285 = vector.load %arg10[%c2_122, %c0_123, %c0_124] : memref<4x32x1xf32, #tpu.memory_space<vmem>>, vector<1x32x1xf32>
    %286 = vector.shape_cast %285 : vector<1x32x1xf32> to vector<32x1xf32>
    %287 = vector.broadcast %6 : vector<1x128xf32> to vector<32x128xf32>
    %288 = arith.mulf %282, %287 : vector<32x128xf32>
    %289 = vector.shape_cast %288 : vector<32x128xf32> to vector<1x32x128xf32>
    %cst_125 = arith.constant dense<0.000000e+00> : vector<1xf32>
    %290 = vector.multi_reduction <add>, %289, %cst_125 [1, 2] : vector<1x32x128xf32> to vector<1xf32>
    %291 = vector.shape_cast %290 : vector<1xf32> to vector<1x1x1xf32>
    %292 = vector.extract %291[0, 0, 0] : f32 from vector<1x1x1xf32>
    %cst_126 = arith.constant 2.048000e+03 : f32
    %293 = arith.divf %292, %cst_126 : f32
    %294 = arith.mulf %288, %288 : vector<32x128xf32>
    %295 = vector.shape_cast %294 : vector<32x128xf32> to vector<1x32x128xf32>
    %cst_127 = arith.constant dense<0.000000e+00> : vector<1xf32>
    %296 = vector.multi_reduction <add>, %295, %cst_127 [1, 2] : vector<1x32x128xf32> to vector<1xf32>
    %297 = vector.shape_cast %296 : vector<1xf32> to vector<1x1x1xf32>
    %298 = vector.extract %297[0, 0, 0] : f32 from vector<1x1x1xf32>
    %cst_128 = arith.constant 2.048000e+03 : f32
    %299 = arith.divf %298, %cst_128 : f32
    %300 = arith.mulf %293, %293 : f32
    %301 = arith.subf %299, %300 : f32
    %cst_129 = arith.constant 0.000000e+00 : f32
    %302 = arith.maximumf %301, %cst_129 : f32
    %cst_130 = arith.constant 9.99999993E-9 : f32
    %303 = arith.addf %302, %cst_130 : f32
    %304 = math.rsqrt %303 : f32
    %305 = vector.broadcast %304 : f32 to vector<32x1xf32>
    %306 = arith.mulf %284, %305 : vector<32x1xf32>
    %307 = vector.broadcast %306 : vector<32x1xf32> to vector<32x128xf32>
    %308 = arith.mulf %288, %307 : vector<32x128xf32>
    %309 = vector.broadcast %293 : f32 to vector<32x1xf32>
    %310 = arith.mulf %309, %306 : vector<32x1xf32>
    %311 = arith.subf %286, %310 : vector<32x1xf32>
    %312 = vector.broadcast %311 : vector<32x1xf32> to vector<32x128xf32>
    %313 = arith.addf %308, %312 : vector<32x128xf32>
    %314 = vector.broadcast %6 : vector<1x128xf32> to vector<32x128xf32>
    %315 = arith.mulf %313, %314 : vector<32x128xf32>
    %c2_131 = arith.constant 2 : index
    %c0_132 = arith.constant 0 : index
    %c0_133 = arith.constant 0 : index
    %316 = vector.load %arg11[%c2_131, %c0_132, %c0_133] : memref<4x32x3xf32, #tpu.memory_space<vmem>>, vector<1x32x3xf32>
    %317 = vector.shape_cast %316 : vector<1x32x3xf32> to vector<32x3xf32>
    %c1_i32_134 = arith.constant 1 : i32
    %318 = tpu.dynamic_rotate %315 by %c1_i32_134 dim 1 : vector<32x128xf32>, i32 -> vector<32x128xf32>
    %319 = vector.extract_strided_slice %317 {offsets = [0, 0], sizes = [32, 1], strides = [1, 1]} : vector<32x3xf32> to vector<32x1xf32>
    %320 = vector.broadcast %319 : vector<32x1xf32> to vector<32x128xf32>
    %321 = arith.mulf %320, %318 : vector<32x128xf32>
    %322 = vector.extract_strided_slice %317 {offsets = [0, 1], sizes = [32, 1], strides = [1, 1]} : vector<32x3xf32> to vector<32x1xf32>
    %323 = vector.broadcast %322 : vector<32x1xf32> to vector<32x128xf32>
    %324 = arith.mulf %323, %315 : vector<32x128xf32>
    %325 = arith.addf %321, %324 : vector<32x128xf32>
    %c127_i32_135 = arith.constant 127 : i32
    %326 = tpu.dynamic_rotate %315 by %c127_i32_135 dim 1 : vector<32x128xf32>, i32 -> vector<32x128xf32>
    %327 = vector.extract_strided_slice %317 {offsets = [0, 2], sizes = [32, 1], strides = [1, 1]} : vector<32x3xf32> to vector<32x1xf32>
    %328 = vector.broadcast %327 : vector<32x1xf32> to vector<32x128xf32>
    %329 = arith.mulf %328, %326 : vector<32x128xf32>
    %330 = arith.addf %325, %329 : vector<32x128xf32>
    %c2_136 = arith.constant 2 : index
    %c0_137 = arith.constant 0 : index
    %c0_138 = arith.constant 0 : index
    %331 = vector.load %arg12[%c2_136, %c0_137, %c0_138] : memref<4x32x1xf32, #tpu.memory_space<vmem>>, vector<1x32x1xf32>
    %332 = vector.shape_cast %331 : vector<1x32x1xf32> to vector<32x1xf32>
    %333 = vector.broadcast %332 : vector<32x1xf32> to vector<32x128xf32>
    %334 = arith.addf %330, %333 : vector<32x128xf32>
    %c2_139 = arith.constant 2 : index
    %335 = memref.load %arg13[%c2_139] : memref<4xf32, #tpu.memory_space<smem>>
    %cst_140 = arith.constant 0.000000e+00 : f32
    %336 = vector.broadcast %cst_140 : f32 to vector<32x128xf32>
    %337 = arith.cmpf ogt, %334, %336 : vector<32x128xf32>
    %338 = vector.broadcast %335 : f32 to vector<32x128xf32>
    %339 = arith.mulf %334, %338 : vector<32x128xf32>
    %340 = arith.select %337, %334, %339 : vector<32x128xi1>, vector<32x128xf32>
    %c2_141 = arith.constant 2 : index
    %c0_142 = arith.constant 0 : index
    %c0_143 = arith.constant 0 : index
    %341 = vector.load %arg14[%c2_141, %c0_142, %c0_143] : memref<4x32x1xf32, #tpu.memory_space<vmem>>, vector<1x32x1xf32>
    %342 = vector.shape_cast %341 : vector<1x32x1xf32> to vector<32x1xf32>
    %c2_144 = arith.constant 2 : index
    %c0_145 = arith.constant 0 : index
    %c0_146 = arith.constant 0 : index
    %343 = vector.load %arg15[%c2_144, %c0_145, %c0_146] : memref<4x32x1xf32, #tpu.memory_space<vmem>>, vector<1x32x1xf32>
    %344 = vector.shape_cast %343 : vector<1x32x1xf32> to vector<32x1xf32>
    %345 = vector.broadcast %6 : vector<1x128xf32> to vector<32x128xf32>
    %346 = arith.mulf %340, %345 : vector<32x128xf32>
    %347 = vector.shape_cast %346 : vector<32x128xf32> to vector<1x32x128xf32>
    %cst_147 = arith.constant dense<0.000000e+00> : vector<1xf32>
    %348 = vector.multi_reduction <add>, %347, %cst_147 [1, 2] : vector<1x32x128xf32> to vector<1xf32>
    %349 = vector.shape_cast %348 : vector<1xf32> to vector<1x1x1xf32>
    %350 = vector.extract %349[0, 0, 0] : f32 from vector<1x1x1xf32>
    %cst_148 = arith.constant 2.048000e+03 : f32
    %351 = arith.divf %350, %cst_148 : f32
    %352 = arith.mulf %346, %346 : vector<32x128xf32>
    %353 = vector.shape_cast %352 : vector<32x128xf32> to vector<1x32x128xf32>
    %cst_149 = arith.constant dense<0.000000e+00> : vector<1xf32>
    %354 = vector.multi_reduction <add>, %353, %cst_149 [1, 2] : vector<1x32x128xf32> to vector<1xf32>
    %355 = vector.shape_cast %354 : vector<1xf32> to vector<1x1x1xf32>
    %356 = vector.extract %355[0, 0, 0] : f32 from vector<1x1x1xf32>
    %cst_150 = arith.constant 2.048000e+03 : f32
    %357 = arith.divf %356, %cst_150 : f32
    %358 = arith.mulf %351, %351 : f32
    %359 = arith.subf %357, %358 : f32
    %cst_151 = arith.constant 0.000000e+00 : f32
    %360 = arith.maximumf %359, %cst_151 : f32
    %cst_152 = arith.constant 9.99999993E-9 : f32
    %361 = arith.addf %360, %cst_152 : f32
    %362 = math.rsqrt %361 : f32
    %363 = vector.broadcast %362 : f32 to vector<32x1xf32>
    %364 = arith.mulf %342, %363 : vector<32x1xf32>
    %365 = vector.broadcast %364 : vector<32x1xf32> to vector<32x128xf32>
    %366 = arith.mulf %346, %365 : vector<32x128xf32>
    %367 = vector.broadcast %351 : f32 to vector<32x1xf32>
    %368 = arith.mulf %367, %364 : vector<32x1xf32>
    %369 = arith.subf %344, %368 : vector<32x1xf32>
    %370 = vector.broadcast %369 : vector<32x1xf32> to vector<32x128xf32>
    %371 = arith.addf %366, %370 : vector<32x128xf32>
    %c2_153 = arith.constant 2 : index
    %c0_154 = arith.constant 0 : index
    %c0_155 = arith.constant 0 : index
    %372 = vector.load %arg16[%c2_153, %c0_154, %c0_155] : memref<4x32x32xbf16, #tpu.memory_space<vmem>>, vector<1x32x32xbf16>
    %373 = vector.shape_cast %372 : vector<1x32x32xbf16> to vector<32x32xbf16>
    %374 = arith.truncf %371 : vector<32x128xf32> to vector<32x128xbf16>
    %cst_156 = arith.constant dense<0.000000e+00> : vector<32x128xf32>
    %375 = tpu.matmul %373, %374, %cst_156 {dimension_numbers = #tpu.dot_dimension_numbers<[1], [0], [0], [1], [0, 0, 1, 1], [], []>} : vector<32x32xbf16>, vector<32x128xbf16>, vector<32x128xf32> -> vector<32x128xf32>
    %c2_157 = arith.constant 2 : index
    %c0_158 = arith.constant 0 : index
    %c0_159 = arith.constant 0 : index
    %376 = vector.load %arg17[%c2_157, %c0_158, %c0_159] : memref<4x32x1xf32, #tpu.memory_space<vmem>>, vector<1x32x1xf32>
    %377 = vector.shape_cast %376 : vector<1x32x1xf32> to vector<32x1xf32>
    %378 = vector.broadcast %377 : vector<32x1xf32> to vector<32x128xf32>
    %379 = arith.addf %375, %378 : vector<32x128xf32>
    %380 = vector.extract_strided_slice %379 {offsets = [0, 0], sizes = [16, 128], strides = [1, 1]} : vector<32x128xf32> to vector<16x128xf32>
    %381 = arith.addf %266, %380 : vector<16x128xf32>
    %382 = vector.extract_strided_slice %379 {offsets = [16, 0], sizes = [16, 128], strides = [1, 1]} : vector<32x128xf32> to vector<16x128xf32>
    %383 = arith.addf %268, %382 : vector<16x128xf32>
    %c3 = arith.constant 3 : index
    %c0_160 = arith.constant 0 : index
    %c0_161 = arith.constant 0 : index
    %384 = vector.load %arg6[%c3, %c0_160, %c0_161] : memref<4x32x16xbf16, #tpu.memory_space<vmem>>, vector<1x32x16xbf16>
    %385 = vector.shape_cast %384 : vector<1x32x16xbf16> to vector<32x16xbf16>
    %386 = arith.truncf %381 : vector<16x128xf32> to vector<16x128xbf16>
    %cst_162 = arith.constant dense<0.000000e+00> : vector<32x128xf32>
    %387 = tpu.matmul %385, %386, %cst_162 {dimension_numbers = #tpu.dot_dimension_numbers<[1], [0], [0], [1], [0, 0, 1, 1], [], []>} : vector<32x16xbf16>, vector<16x128xbf16>, vector<32x128xf32> -> vector<32x128xf32>
    %c3_163 = arith.constant 3 : index
    %c0_164 = arith.constant 0 : index
    %c0_165 = arith.constant 0 : index
    %388 = vector.load %arg7[%c3_163, %c0_164, %c0_165] : memref<4x32x1xf32, #tpu.memory_space<vmem>>, vector<1x32x1xf32>
    %389 = vector.shape_cast %388 : vector<1x32x1xf32> to vector<32x1xf32>
    %390 = vector.broadcast %389 : vector<32x1xf32> to vector<32x128xf32>
    %391 = arith.addf %387, %390 : vector<32x128xf32>
    %c3_166 = arith.constant 3 : index
    %392 = memref.load %arg8[%c3_166] : memref<4xf32, #tpu.memory_space<smem>>
    %cst_167 = arith.constant 0.000000e+00 : f32
    %393 = vector.broadcast %cst_167 : f32 to vector<32x128xf32>
    %394 = arith.cmpf ogt, %391, %393 : vector<32x128xf32>
    %395 = vector.broadcast %392 : f32 to vector<32x128xf32>
    %396 = arith.mulf %391, %395 : vector<32x128xf32>
    %397 = arith.select %394, %391, %396 : vector<32x128xi1>, vector<32x128xf32>
    %c3_168 = arith.constant 3 : index
    %c0_169 = arith.constant 0 : index
    %c0_170 = arith.constant 0 : index
    %398 = vector.load %arg9[%c3_168, %c0_169, %c0_170] : memref<4x32x1xf32, #tpu.memory_space<vmem>>, vector<1x32x1xf32>
    %399 = vector.shape_cast %398 : vector<1x32x1xf32> to vector<32x1xf32>
    %c3_171 = arith.constant 3 : index
    %c0_172 = arith.constant 0 : index
    %c0_173 = arith.constant 0 : index
    %400 = vector.load %arg10[%c3_171, %c0_172, %c0_173] : memref<4x32x1xf32, #tpu.memory_space<vmem>>, vector<1x32x1xf32>
    %401 = vector.shape_cast %400 : vector<1x32x1xf32> to vector<32x1xf32>
    %402 = vector.broadcast %6 : vector<1x128xf32> to vector<32x128xf32>
    %403 = arith.mulf %397, %402 : vector<32x128xf32>
    %404 = vector.shape_cast %403 : vector<32x128xf32> to vector<1x32x128xf32>
    %cst_174 = arith.constant dense<0.000000e+00> : vector<1xf32>
    %405 = vector.multi_reduction <add>, %404, %cst_174 [1, 2] : vector<1x32x128xf32> to vector<1xf32>
    %406 = vector.shape_cast %405 : vector<1xf32> to vector<1x1x1xf32>
    %407 = vector.extract %406[0, 0, 0] : f32 from vector<1x1x1xf32>
    %cst_175 = arith.constant 2.048000e+03 : f32
    %408 = arith.divf %407, %cst_175 : f32
    %409 = arith.mulf %403, %403 : vector<32x128xf32>
    %410 = vector.shape_cast %409 : vector<32x128xf32> to vector<1x32x128xf32>
    %cst_176 = arith.constant dense<0.000000e+00> : vector<1xf32>
    %411 = vector.multi_reduction <add>, %410, %cst_176 [1, 2] : vector<1x32x128xf32> to vector<1xf32>
    %412 = vector.shape_cast %411 : vector<1xf32> to vector<1x1x1xf32>
    %413 = vector.extract %412[0, 0, 0] : f32 from vector<1x1x1xf32>
    %cst_177 = arith.constant 2.048000e+03 : f32
    %414 = arith.divf %413, %cst_177 : f32
    %415 = arith.mulf %408, %408 : f32
    %416 = arith.subf %414, %415 : f32
    %cst_178 = arith.constant 0.000000e+00 : f32
    %417 = arith.maximumf %416, %cst_178 : f32
    %cst_179 = arith.constant 9.99999993E-9 : f32
    %418 = arith.addf %417, %cst_179 : f32
    %419 = math.rsqrt %418 : f32
    %420 = vector.broadcast %419 : f32 to vector<32x1xf32>
    %421 = arith.mulf %399, %420 : vector<32x1xf32>
    %422 = vector.broadcast %421 : vector<32x1xf32> to vector<32x128xf32>
    %423 = arith.mulf %403, %422 : vector<32x128xf32>
    %424 = vector.broadcast %408 : f32 to vector<32x1xf32>
    %425 = arith.mulf %424, %421 : vector<32x1xf32>
    %426 = arith.subf %401, %425 : vector<32x1xf32>
    %427 = vector.broadcast %426 : vector<32x1xf32> to vector<32x128xf32>
    %428 = arith.addf %423, %427 : vector<32x128xf32>
    %429 = vector.broadcast %6 : vector<1x128xf32> to vector<32x128xf32>
    %430 = arith.mulf %428, %429 : vector<32x128xf32>
    %c3_180 = arith.constant 3 : index
    %c0_181 = arith.constant 0 : index
    %c0_182 = arith.constant 0 : index
    %431 = vector.load %arg11[%c3_180, %c0_181, %c0_182] : memref<4x32x3xf32, #tpu.memory_space<vmem>>, vector<1x32x3xf32>
    %432 = vector.shape_cast %431 : vector<1x32x3xf32> to vector<32x3xf32>
    %c2_i32_183 = arith.constant 2 : i32
    %433 = tpu.dynamic_rotate %430 by %c2_i32_183 dim 1 : vector<32x128xf32>, i32 -> vector<32x128xf32>
    %434 = vector.extract_strided_slice %432 {offsets = [0, 0], sizes = [32, 1], strides = [1, 1]} : vector<32x3xf32> to vector<32x1xf32>
    %435 = vector.broadcast %434 : vector<32x1xf32> to vector<32x128xf32>
    %436 = arith.mulf %435, %433 : vector<32x128xf32>
    %437 = vector.extract_strided_slice %432 {offsets = [0, 1], sizes = [32, 1], strides = [1, 1]} : vector<32x3xf32> to vector<32x1xf32>
    %438 = vector.broadcast %437 : vector<32x1xf32> to vector<32x128xf32>
    %439 = arith.mulf %438, %430 : vector<32x128xf32>
    %440 = arith.addf %436, %439 : vector<32x128xf32>
    %c126_i32_184 = arith.constant 126 : i32
    %441 = tpu.dynamic_rotate %430 by %c126_i32_184 dim 1 : vector<32x128xf32>, i32 -> vector<32x128xf32>
    %442 = vector.extract_strided_slice %432 {offsets = [0, 2], sizes = [32, 1], strides = [1, 1]} : vector<32x3xf32> to vector<32x1xf32>
    %443 = vector.broadcast %442 : vector<32x1xf32> to vector<32x128xf32>
    %444 = arith.mulf %443, %441 : vector<32x128xf32>
    %445 = arith.addf %440, %444 : vector<32x128xf32>
    %c3_185 = arith.constant 3 : index
    %c0_186 = arith.constant 0 : index
    %c0_187 = arith.constant 0 : index
    %446 = vector.load %arg12[%c3_185, %c0_186, %c0_187] : memref<4x32x1xf32, #tpu.memory_space<vmem>>, vector<1x32x1xf32>
    %447 = vector.shape_cast %446 : vector<1x32x1xf32> to vector<32x1xf32>
    %448 = vector.broadcast %447 : vector<32x1xf32> to vector<32x128xf32>
    %449 = arith.addf %445, %448 : vector<32x128xf32>
    %c3_188 = arith.constant 3 : index
    %450 = memref.load %arg13[%c3_188] : memref<4xf32, #tpu.memory_space<smem>>
    %cst_189 = arith.constant 0.000000e+00 : f32
    %451 = vector.broadcast %cst_189 : f32 to vector<32x128xf32>
    %452 = arith.cmpf ogt, %449, %451 : vector<32x128xf32>
    %453 = vector.broadcast %450 : f32 to vector<32x128xf32>
    %454 = arith.mulf %449, %453 : vector<32x128xf32>
    %455 = arith.select %452, %449, %454 : vector<32x128xi1>, vector<32x128xf32>
    %c3_190 = arith.constant 3 : index
    %c0_191 = arith.constant 0 : index
    %c0_192 = arith.constant 0 : index
    %456 = vector.load %arg14[%c3_190, %c0_191, %c0_192] : memref<4x32x1xf32, #tpu.memory_space<vmem>>, vector<1x32x1xf32>
    %457 = vector.shape_cast %456 : vector<1x32x1xf32> to vector<32x1xf32>
    %c3_193 = arith.constant 3 : index
    %c0_194 = arith.constant 0 : index
    %c0_195 = arith.constant 0 : index
    %458 = vector.load %arg15[%c3_193, %c0_194, %c0_195] : memref<4x32x1xf32, #tpu.memory_space<vmem>>, vector<1x32x1xf32>
    %459 = vector.shape_cast %458 : vector<1x32x1xf32> to vector<32x1xf32>
    %460 = vector.broadcast %6 : vector<1x128xf32> to vector<32x128xf32>
    %461 = arith.mulf %455, %460 : vector<32x128xf32>
    %462 = vector.shape_cast %461 : vector<32x128xf32> to vector<1x32x128xf32>
    %cst_196 = arith.constant dense<0.000000e+00> : vector<1xf32>
    %463 = vector.multi_reduction <add>, %462, %cst_196 [1, 2] : vector<1x32x128xf32> to vector<1xf32>
    %464 = vector.shape_cast %463 : vector<1xf32> to vector<1x1x1xf32>
    %465 = vector.extract %464[0, 0, 0] : f32 from vector<1x1x1xf32>
    %cst_197 = arith.constant 2.048000e+03 : f32
    %466 = arith.divf %465, %cst_197 : f32
    %467 = arith.mulf %461, %461 : vector<32x128xf32>
    %468 = vector.shape_cast %467 : vector<32x128xf32> to vector<1x32x128xf32>
    %cst_198 = arith.constant dense<0.000000e+00> : vector<1xf32>
    %469 = vector.multi_reduction <add>, %468, %cst_198 [1, 2] : vector<1x32x128xf32> to vector<1xf32>
    %470 = vector.shape_cast %469 : vector<1xf32> to vector<1x1x1xf32>
    %471 = vector.extract %470[0, 0, 0] : f32 from vector<1x1x1xf32>
    %cst_199 = arith.constant 2.048000e+03 : f32
    %472 = arith.divf %471, %cst_199 : f32
    %473 = arith.mulf %466, %466 : f32
    %474 = arith.subf %472, %473 : f32
    %cst_200 = arith.constant 0.000000e+00 : f32
    %475 = arith.maximumf %474, %cst_200 : f32
    %cst_201 = arith.constant 9.99999993E-9 : f32
    %476 = arith.addf %475, %cst_201 : f32
    %477 = math.rsqrt %476 : f32
    %478 = vector.broadcast %477 : f32 to vector<32x1xf32>
    %479 = arith.mulf %457, %478 : vector<32x1xf32>
    %480 = vector.broadcast %479 : vector<32x1xf32> to vector<32x128xf32>
    %481 = arith.mulf %461, %480 : vector<32x128xf32>
    %482 = vector.broadcast %466 : f32 to vector<32x1xf32>
    %483 = arith.mulf %482, %479 : vector<32x1xf32>
    %484 = arith.subf %459, %483 : vector<32x1xf32>
    %485 = vector.broadcast %484 : vector<32x1xf32> to vector<32x128xf32>
    %486 = arith.addf %481, %485 : vector<32x128xf32>
    %c3_202 = arith.constant 3 : index
    %c0_203 = arith.constant 0 : index
    %c0_204 = arith.constant 0 : index
    %487 = vector.load %arg16[%c3_202, %c0_203, %c0_204] : memref<4x32x32xbf16, #tpu.memory_space<vmem>>, vector<1x32x32xbf16>
    %488 = vector.shape_cast %487 : vector<1x32x32xbf16> to vector<32x32xbf16>
    %489 = arith.truncf %486 : vector<32x128xf32> to vector<32x128xbf16>
    %cst_205 = arith.constant dense<0.000000e+00> : vector<32x128xf32>
    %490 = tpu.matmul %488, %489, %cst_205 {dimension_numbers = #tpu.dot_dimension_numbers<[1], [0], [0], [1], [0, 0, 1, 1], [], []>} : vector<32x32xbf16>, vector<32x128xbf16>, vector<32x128xf32> -> vector<32x128xf32>
    %c3_206 = arith.constant 3 : index
    %c0_207 = arith.constant 0 : index
    %c0_208 = arith.constant 0 : index
    %491 = vector.load %arg17[%c3_206, %c0_207, %c0_208] : memref<4x32x1xf32, #tpu.memory_space<vmem>>, vector<1x32x1xf32>
    %492 = vector.shape_cast %491 : vector<1x32x1xf32> to vector<32x1xf32>
    %493 = vector.broadcast %492 : vector<32x1xf32> to vector<32x128xf32>
    %494 = arith.addf %490, %493 : vector<32x128xf32>
    %495 = vector.extract_strided_slice %494 {offsets = [16, 0], sizes = [16, 128], strides = [1, 1]} : vector<32x128xf32> to vector<16x128xf32>
    %496 = arith.addf %383, %495 : vector<16x128xf32>
    %c0_209 = arith.constant 0 : index
    %c0_210 = arith.constant 0 : index
    %497 = vector.load %arg19[%c0_209, %c0_210] : memref<8x16xbf16, #tpu.memory_space<vmem>>, vector<8x16xbf16>
    %c0_211 = arith.constant 0 : index
    %498 = memref.load %arg18[%c0_211] : memref<1xf32, #tpu.memory_space<smem>>
    %cst_212 = arith.constant 0.000000e+00 : f32
    %499 = vector.broadcast %cst_212 : f32 to vector<16x128xf32>
    %500 = arith.cmpf ogt, %496, %499 : vector<16x128xf32>
    %501 = vector.broadcast %498 : f32 to vector<16x128xf32>
    %502 = arith.mulf %496, %501 : vector<16x128xf32>
    %503 = arith.select %500, %496, %502 : vector<16x128xi1>, vector<16x128xf32>
    %504 = arith.truncf %503 : vector<16x128xf32> to vector<16x128xbf16>
    %cst_213 = arith.constant dense<0.000000e+00> : vector<8x128xf32>
    %505 = tpu.matmul %497, %504, %cst_213 {dimension_numbers = #tpu.dot_dimension_numbers<[1], [0], [0], [1], [0, 0, 1, 1], [], []>} : vector<8x16xbf16>, vector<16x128xbf16>, vector<8x128xf32> -> vector<8x128xf32>
    %c0_214 = arith.constant 0 : index
    %c0_215 = arith.constant 0 : index
    %506 = vector.load %arg20[%c0_214, %c0_215] : memref<8x1xf32, #tpu.memory_space<vmem>>, vector<8x1xf32>
    %507 = vector.broadcast %506 : vector<8x1xf32> to vector<8x128xf32>
    %508 = arith.addf %505, %507 : vector<8x128xf32>
    %c0_216 = arith.constant 0 : index
    %c0_217 = arith.constant 0 : index
    %c0_218 = arith.constant 0 : index
    %509 = vector.load %arg21[%c0_216, %c0_217, %c0_218] : memref<1x8x128xf32, #tpu.memory_space<vmem>>, vector<1x8x128xf32>
    %510 = vector.shape_cast %509 : vector<1x8x128xf32> to vector<8x128xf32>
    %511 = vector.shape_cast %508 : vector<8x128xf32> to vector<1x8x128xf32>
    tpu.vector_store %arg21[%c0_216, %c0_217, %c0_218], %511 {strides = array<i32>} : memref<1x8x128xf32, #tpu.memory_space<vmem>>, vector<1x8x128xf32>,
    return
  }
  func.func @transform_0(%arg0: i32) -> (i32, i32, i32) {
    %c0_i32 = arith.constant 0 : i32
    %c0_i32_0 = arith.constant 0 : i32
    %c0_i32_1 = arith.constant 0 : i32
    return %arg0, %c0_i32, %c0_i32_0 : i32, i32, i32
  }
  func.func @transform_1(%arg0: i32) -> (i32, i32) {
    %c0_i32 = arith.constant 0 : i32
    %c0_i32_0 = arith.constant 0 : i32
    %c0_i32_1 = arith.constant 0 : i32
    return %c0_i32, %c0_i32_0 : i32, i32
  }
  func.func @transform_2(%arg0: i32) -> (i32, i32) {
    %c0_i32 = arith.constant 0 : i32
    %c0_i32_0 = arith.constant 0 : i32
    %c0_i32_1 = arith.constant 0 : i32
    return %c0_i32, %c0_i32_0 : i32, i32
  }
  func.func @transform_3(%arg0: i32) -> (i32, i32) {
    %c0_i32 = arith.constant 0 : i32
    %c0_i32_0 = arith.constant 0 : i32
    %c0_i32_1 = arith.constant 0 : i32
    return %c0_i32, %c0_i32_0 : i32, i32
  }
  func.func @transform_4(%arg0: i32) -> (i32, i32) {
    %c0_i32 = arith.constant 0 : i32
    %c0_i32_0 = arith.constant 0 : i32
    %c0_i32_1 = arith.constant 0 : i32
    return %c0_i32, %c0_i32_0 : i32, i32
  }
  func.func @transform_5(%arg0: i32) -> (i32, i32, i32) {
    %c0_i32 = arith.constant 0 : i32
    %c0_i32_0 = arith.constant 0 : i32
    %c0_i32_1 = arith.constant 0 : i32
    %c0_i32_2 = arith.constant 0 : i32
    return %c0_i32, %c0_i32_0, %c0_i32_1 : i32, i32, i32
  }
  func.func @transform_6(%arg0: i32) -> (i32, i32, i32) {
    %c0_i32 = arith.constant 0 : i32
    %c0_i32_0 = arith.constant 0 : i32
    %c0_i32_1 = arith.constant 0 : i32
    %c0_i32_2 = arith.constant 0 : i32
    return %c0_i32, %c0_i32_0, %c0_i32_1 : i32, i32, i32
  }
  func.func @transform_7(%arg0: i32) -> i32 {
    %c0_i32 = arith.constant 0 : i32
    %c0_i32_0 = arith.constant 0 : i32
    return %c0_i32 : i32
  }
  func.func @transform_8(%arg0: i32) -> (i32, i32, i32) {
    %c0_i32 = arith.constant 0 : i32
    %c0_i32_0 = arith.constant 0 : i32
    %c0_i32_1 = arith.constant 0 : i32
    %c0_i32_2 = arith.constant 0 : i32
    return %c0_i32, %c0_i32_0, %c0_i32_1 : i32, i32, i32
  }
  func.func @transform_9(%arg0: i32) -> (i32, i32, i32) {
    %c0_i32 = arith.constant 0 : i32
    %c0_i32_0 = arith.constant 0 : i32
    %c0_i32_1 = arith.constant 0 : i32
    %c0_i32_2 = arith.constant 0 : i32
    return %c0_i32, %c0_i32_0, %c0_i32_1 : i32, i32, i32
  }
  func.func @transform_10(%arg0: i32) -> (i32, i32, i32) {
    %c0_i32 = arith.constant 0 : i32
    %c0_i32_0 = arith.constant 0 : i32
    %c0_i32_1 = arith.constant 0 : i32
    %c0_i32_2 = arith.constant 0 : i32
    return %c0_i32, %c0_i32_0, %c0_i32_1 : i32, i32, i32
  }
  func.func @transform_11(%arg0: i32) -> (i32, i32, i32) {
    %c0_i32 = arith.constant 0 : i32
    %c0_i32_0 = arith.constant 0 : i32
    %c0_i32_1 = arith.constant 0 : i32
    %c0_i32_2 = arith.constant 0 : i32
    return %c0_i32, %c0_i32_0, %c0_i32_1 : i32, i32, i32
  }
  func.func @transform_12(%arg0: i32) -> i32 {
    %c0_i32 = arith.constant 0 : i32
    %c0_i32_0 = arith.constant 0 : i32
    return %c0_i32 : i32
  }
  func.func @transform_13(%arg0: i32) -> (i32, i32, i32) {
    %c0_i32 = arith.constant 0 : i32
    %c0_i32_0 = arith.constant 0 : i32
    %c0_i32_1 = arith.constant 0 : i32
    %c0_i32_2 = arith.constant 0 : i32
    return %c0_i32, %c0_i32_0, %c0_i32_1 : i32, i32, i32
  }
  func.func @transform_14(%arg0: i32) -> (i32, i32, i32) {
    %c0_i32 = arith.constant 0 : i32
    %c0_i32_0 = arith.constant 0 : i32
    %c0_i32_1 = arith.constant 0 : i32
    %c0_i32_2 = arith.constant 0 : i32
    return %c0_i32, %c0_i32_0, %c0_i32_1 : i32, i32, i32
  }
  func.func @transform_15(%arg0: i32) -> (i32, i32, i32) {
    %c0_i32 = arith.constant 0 : i32
    %c0_i32_0 = arith.constant 0 : i32
    %c0_i32_1 = arith.constant 0 : i32
    %c0_i32_2 = arith.constant 0 : i32
    return %c0_i32, %c0_i32_0, %c0_i32_1 : i32, i32, i32
  }
  func.func @transform_16(%arg0: i32) -> (i32, i32, i32) {
    %c0_i32 = arith.constant 0 : i32
    %c0_i32_0 = arith.constant 0 : i32
    %c0_i32_1 = arith.constant 0 : i32
    %c0_i32_2 = arith.constant 0 : i32
    return %c0_i32, %c0_i32_0, %c0_i32_1 : i32, i32, i32
  }
  func.func @transform_17(%arg0: i32) -> i32 {
    %c0_i32 = arith.constant 0 : i32
    %c0_i32_0 = arith.constant 0 : i32
    return %c0_i32 : i32
  }
  func.func @transform_18(%arg0: i32) -> (i32, i32) {
    %c0_i32 = arith.constant 0 : i32
    %c0_i32_0 = arith.constant 0 : i32
    %c0_i32_1 = arith.constant 0 : i32
    return %c0_i32, %c0_i32_0 : i32, i32
  }
  func.func @transform_19(%arg0: i32) -> (i32, i32) {
    %c0_i32 = arith.constant 0 : i32
    %c0_i32_0 = arith.constant 0 : i32
    %c0_i32_1 = arith.constant 0 : i32
    return %c0_i32, %c0_i32_0 : i32, i32
  }
  func.func @transform_20(%arg0: i32) -> (i32, i32, i32) {
    %c0_i32 = arith.constant 0 : i32
    %c0_i32_0 = arith.constant 0 : i32
    %c0_i32_1 = arith.constant 0 : i32
    return %arg0, %c0_i32, %c0_i32_0 : i32, i32, i32
  }
}

</mosaic_0001>

<bundles_post_ra>
// kernel: tpu_custom_call.1
= control target key start
LH: loop header
LB: loop body
LE: loop exit
PB: predicated region body
PF: predicated region fallthrough
CT: control target
= control target key end

     0   :  { %s4938_s0 = inlined_call_operand.vmem [shape: f32[2,8,128], index: 0, kind: input, shape index: {}]   ;;  %s4939_s1 = inlined_call_operand.vmem [shape: f32[8,1], index: 1, kind: input, shape index: {}]   ;;  %s4940_s2 = inlined_call_operand.vmem [shape: f32[8,1], index: 2, kind: input, shape index: {}]   ;;  %s4941_s3 = inlined_call_operand.vmem [shape: bf16[16,8], index: 3, kind: input, shape index: {}]   ;;  %s4942_s4 = inlined_call_operand.vmem [shape: f32[16,1], index: 4, kind: input, shape index: {}]   ;;  %s4943_s5 = inlined_call_operand.vmem [shape: bf16[4,32,16], index: 5, kind: input, shape index: {}]   ;;  %s4944_s6 = inlined_call_operand.vmem [shape: f32[4,32,1], index: 6, kind: input, shape index: {}]   ;;  %s4945_s7 = inlined_call_operand.vmem [shape: f32[4], index: 7, kind: input, shape index: {}]   ;;  %s4946_s8 = inlined_call_operand.vmem [shape: f32[4,32,1], index: 8, kind: input, shape index: {}]   ;;  %s4947_s9 = inlined_call_operand.vmem [shape: f32[4,32,1], index: 9, kind: input, shape index: {}]   ;;  %s4948_s10 = inlined_call_operand.vmem [shape: f32[4,32,3], index: 10, kind: input, shape index: {}]   ;;  %s4949_s11 = inlined_call_operand.vmem [shape: f32[4,32,1], index: 11, kind: input, shape index: {}]   ;;  %s4950_s12 = inlined_call_operand.vmem [shape: f32[4], index: 12, kind: input, shape index: {}]   ;;  %s4951_s13 = inlined_call_operand.vmem [shape: f32[4,32,1], index: 13, kind: input, shape index: {}]   ;;  %s4952_s14 = inlined_call_operand.vmem [shape: f32[4,32,1], index: 14, kind: input, shape index: {}]   ;;  %s4953_s15 = inlined_call_operand.vmem [shape: bf16[4,32,32], index: 15, kind: input, shape index: {}]   ;;  %s4954_s16 = inlined_call_operand.vmem [shape: f32[4,32,1], index: 16, kind: input, shape index: {}]   ;;  %s4955_s17 = inlined_call_operand.<no memory space> [shape: f32[1], index: 17, kind: input, shape index: {}]   ;;  %s4956_s18 = inlined_call_operand.vmem [shape: bf16[8,16], index: 18, kind: input, shape index: {}]   ;;  %s4957_s19 = inlined_call_operand.vmem [shape: f32[8,1], index: 19, kind: input, shape index: {}]   ;;  %s4958_s20 = inlined_call_operand.hbm [shape: f32[2,8,128], index: 20, kind: output, shape index: {}]  }
   0x1   :  { %4976 = sst [smem:[#allocation17_spill]] %s4938_s0 }
   0x2   :  { %4977 = sst [smem:[#allocation18_spill]] %s4939_s1 }
   0x3   :  { %4978 = sst [smem:[#allocation19_spill]] %s4940_s2 }
   0x4   :  { %4979 = sst [smem:[#allocation20_spill]] %s4941_s3 }
   0x5   :  { %4980 = sst [smem:[#allocation21_spill]] %s4942_s4 }
   0x6   :  { %4981 = sst [smem:[#allocation22_spill]] %s4945_s7 }
   0x7   :  { %4982 = sst [smem:[#allocation23_spill]] %s4950_s12 }
   0x8   :  { %25 = sst [smem:[#allocation2]] %s4955_s17 }
   0x9   :  { %26 = vsyncpa [#allocation5], 0 }
   0xa   :  { %27 = vsyncpa [#allocation7], 0 }
   0xb   :  { %28 = vsyncpa [#allocation4], 0 }
   0xc   :  { %30 = vsyncpa [#allocation4 + $0x1], 0  ;;  %s3959_s23 = smov 0   ;;  %s3961_s24 = smov 0  }
   0xd   :  { %s3963_s2 = smov 0   ;;  %s3965_s25 = smov 0  }
   0xe LB: > { %4983 = sst [smem:[#allocation12_spill]] %s3824_s23  ;;  %s3980_s17 = sadd.s32 4294967295, %s3836_s25   ;;  %s3836_s25 = sphi %s3965_s25, %s5012_s25   ;;  %s3832_s2 = sphi %s3963_s2, %s5017_s2   ;;  %s3828_s24 = sphi %s3961_s24, %s5016_s24   ;;  %s3824_s23 = sphi %s3959_s23, %s5015_s23  }
   0xf   : > { %4984 = sst [smem:[#allocation13_spill]] %s3832_s2  ;;  %s3259_s3 = sadd.s32 4294967294, %s3836_s25  }
  0x10   : > { %s3984_s26 = sadd.s32 1, %s3836_s25   ;;  %s468_s27 = sadd.s32 1, %s3832_s2 }
  0x11   : > { %4985 = sst [smem:[#allocation14_spill]] %s3984_s26  ;;  %s465_s28 = ssub.s32 %s3836_s25, %s3984_s26 }
  0x12   : > { %p478_p0 = scmp.ne.s32.totalorder %s3832_s2, %s3828_s24  ;;  %p466_p1 = scmp.eq.s32.totalorder %s465_s28, 0 }
  0x13   : > { %p479_p2 = scmp.eq.s32.totalorder %s3980_s17, 1  ;;  %p484_p3 = scmp.ne.s32.totalorder %s3828_s24, %s3824_s23 }
  0x14   : > { %p485_p4 = scmp.eq.s32.totalorder %s3259_s3, 1  ;;  %p3260_p7 = scmp.ge.s32.totalorder %s3836_s25, 1 }
  0x15   : > { %s3995_s4 = scalar_select %p466_p1, %s3832_s2, %s468_s27  }
  0x16   : > { %p3997_p5 = por %p479_p2, %p478_p0  ;;  %p4001_p6 = por %p485_p4, %p484_p3 }
  0x17   : > { %4986 = sst [smem:[#allocation15_spill]] %s3995_s4  ;;  %p492_p8 = scmp.lt.s32.totalorder %s3836_s25, 3 }
  0x18   : > { %s4987_s29 = scalar_select %p3997_p5, 1, 0 }
  0x19   : > { %s4988_s30 = scalar_select %p4001_p6, 1, 0 }
  0x1a   : > { %p4961_p9 = scmp.eq.s32.totalorder %s3980_s17, 0  ;;  %p4008_p10 = pnand %p3260_p7, %p492_p8 }
  0x1b   : > { %4989 = sst [smem:[#allocation16_spill]] %s4988_s30  ;;  %s4991_s7 = sld [smem:[#allocation22_spill]] }
  0x1c   : > { %s4990_s0 = scalar_select %p4008_p10, 1, 0 }
  0x1d   : > { %p3599_p11 = pneg %p4008_p10  ;;  %s4992_s12 = sld [smem:[#allocation23_spill]] }
  0x1f   : > { %p4022_p12 = pnand %p4961_p9, %p3599_p11 }
  0x21   : > { %s523_s22 = sshll.u32 %s4991_s7, 4  ;;  %p3738_p0 = pneg %p4022_p12  ;;  %s524_s22 = int_to_ptr.vmem [resolvable:$true] %s523_s22 }
  0x22   : > { %s3736_s2 = scalar_lea.vmem %s524_s22, 16  ;;  %p3744_p3 = scmp.lt.s32.totalorder %s524_s22, %s524_s22 }
  0x23   : > { %s546_s28 = sshll.u32 %s4992_s12, 4  ;;  %p3737_p13 = scmp.ne.s32.totalorder %s524_s22, %s3736_s2  ;;  %s547_s28 = int_to_ptr.vmem [resolvable:$true] %s546_s28 }
  0x24   : > { %p3745_p4 = scmp.lt.s32.totalorder %s3736_s2, %s3736_s2 }
  0x25   : > { %p3739_p1 = pnand %p3738_p0, %p3737_p13 }
  0x26   : > { %p3746_p7 = por %p3745_p4, %p3744_p3 }
  0x27   : > { %p3740_p2 = pneg %p3739_p1 }
  0x29   : > { %p3747_p8 = pnand %p3746_p7, %p3740_p2 }
  0x2b   : > { %3750 = shalt.err (!%p3747_p8)
}
  0x2c   : > { %s3838_s21 = smov [#allocation3]   ;;  %s3751_s1 = scalar_lea.vmem %s547_s28, 16 }
  0x2d   : > { %3602 = dma.vmem_to_smem (!%p4022_p12), %s524_s22, 16, %s3838_s21, [#allocation5]  }
  0x2e   : > { %p3752_p11 = scmp.ne.s32.totalorder %s547_s28, %s3751_s1  ;;  %p3759_p5 = scmp.lt.s32.totalorder %s547_s28, %s547_s28 }
  0x2f   : > { %p3760_p10 = scmp.lt.s32.totalorder %s3751_s1, %s3751_s1 }
  0x30   : > { %p3754_p9 = pnand %p3752_p11, %p3738_p0 }
  0x31   : > { %p3761_p13 = por %p3760_p10, %p3759_p5 }
  0x32   : > { %p3755_p6 = pneg %p3754_p9 }
  0x34   : > { %p3762_p1 = pnand %p3761_p13, %p3755_p6 }
  0x36   : > { %3765 = shalt.err (!%p3762_p1)
}
  0x37   : > { %s3839_s3 = smov [#allocation6]   ;;  %p4994_p2 = scmp.ne.s32.totalorder %s4990_s0, 0 }
  0x38   : > { %3605 = dma.vmem_to_smem (!%p4022_p12), %s547_s28, 16, %s3839_s3, [#allocation7]  }
  0x39   : > { %587 = sbr.rel (%p4994_p2) target bundleno = 6730 (0x1a4a), region = 100  ;;  %p4995_p3 = scmp.eq.s32.totalorder (!%p4994_p2), %s3980_s17, 0 }
  0x40   : > { %3811 = dma.done.wait (%p4995_p3), [#allocation5], 16   ;;  %p4996_p4 = pmov %p4995_p3 }
  0x41   : > { %p4997_p9 = pmov %p4995_p3 }
  0x42   : > { %3813 = vsyncadd (%p4996_p4), [#allocation5], 4294967280 }
  0x43   : > { %3815 = dma.done.wait (%p4997_p9), [#allocation7], 16   ;;  %p4998_p5 = pmov %p4995_p3 }
  0x45   : > { %3817 = vsyncadd (%p4998_p5), [#allocation7], 4294967280 }
  0x46   : > { %597 = sfence }
  0x47   : > { %p649_p6 = scmp.lt.s32.totalorder %s3980_s17, 1  ;;  %s4999_s27 = sld [smem:[#allocation17_spill]]  ;;  %v3840_v12 = vmov 0   ;;  %v3842_v27 = vmov 0.0   ;;  %v785_v28 = vld [vmem:[%s4944_s6] sm:$0xff]  ;;  %vm3843_vm0 = vmmov 0   ;;  %v655_v53 = vlaneseq }
  0x48   : > { %3659 = vset.pattern.permute.xlu1 %v3840_v12  ;;  %3660 = vset.pattern.permute.xlu0 %v3840_v12  ;;  %s3841_s22 = smov 0.0   ;;  %s5000_s26 = sld [smem:[#allocation18_spill]]  ;;  %v786_v29 = vld [vmem:[%s4944_s6 + $0x8] sm:$0xff]  ;;  %v787_v30 = vld [vmem:[%s4944_s6 + $0x10] sm:$0xff]  ;;  %v788_v31 = vld [vmem:[%s4944_s6 + $0x18] sm:$0xff]  ;;  %vm735_vm1 = vcmask 1043456  }
  0x49   : > { %s650_s2 = scalar_select %p649_p6, %s3980_s17, 1  ;;  %3467 = vmatprep.subr.bf16.mxu0 %v3842_v27  ;;  %3469 = vmatprep.mubr.msk.bf16.mxu0 %vm3843_vm0, %v3842_v27  ;;  %vm731_vm2 = vcmask 64512   ;;  %v3702_v40 = vld [vmem:[%s4943_s5] sm:$0xff]   ;;  %vm819_vm3 = vcmask 130048   ;;  %v3703_v50 = vld [vmem:[%s4943_s5 + $0x8] sm:$0xff]   ;;  %v656_v55 = vand.u32 127, %v655_v53 }
  0x4a   : > { %s5003_s7 = sld [smem:[#allocation20_spill]]  ;;  %3475 = vmatprep.mubr.msk.bf16.mxu1 %vm819_vm3, %v3702_v40  ;;  %v892_v53 = vld [vmem:[%s4946_s8 + $0x18] sm:$0xff]  ;;  %s1128_s23 = sld [smem:[#allocation6]]  ;;  %vm1297_vm13 = vcmask 261120  }
  0x4b   : > { %s3268_s4 = sshll.u32 %s650_s2, 3  ;;  %vm657_vm4 = vcmp.lt.s32.totalorder %v656_v55, 64  ;;  %p5008_p12 = scmp.ne.s32.totalorder %s4987_s29, 0 }
  0x4d   : > { %s652_s28 = scalar_lea.vmem %s4999_s27, %s3268_s4 }
  0x4e   : > { %v4047_v0 = vld [vmem:[%s652_s28] sm:$0xff] }
  0x4f   : > { %664 = vadd.xlane.f32.xlu0 %v4047_v0  ;;  %v676_v1 = vmul.f32 %v4047_v0, %v4047_v0  ;;  %v662_v19 = vld [vmem:[%s5000_s26] sm:$0xff] }
  0x50   : > { %v3701_v39 = vld [vmem:[%s5003_s7] sm:$0xff]  }
  0x53   : > { %677 = vadd.xlane.f32.xlu0 %v676_v1 }
  0xdc   : > { %v665_v2 = vpop.xlane.xlu0 %664 }
  0xdd   : > { %v666_v3 = vrot.slane %v665_v2, 4 }
  0xdf   : > { %v667_v4 = vadd.f32 %v666_v3, %v665_v2  ;;  %v4101_v2 = vsel %vm657_vm4, 1.0, %v3842_v27 }
  0xe0   : > { %v678_v5 = vpop.xlane.xlu0 %677 }
  0xe1   : > { %v679_v6 = vrot.slane %v678_v5, 4  ;;  %v668_v7 = vrot.slane %v667_v4, 2 }
  0xe3   : > { %v680_v8 = vadd.f32 %v679_v6, %v678_v5  ;;  %v669_v9 = vadd.f32 %v668_v7, %v667_v4 }
  0xe5   : > { %v670_v10 = vrot.slane %v669_v9, 1  ;;  %v681_v11 = vrot.slane %v680_v8, 2 }
  0xe7   : > { %v671_v13 = vadd.f32 %v670_v10, %v669_v9  ;;  %v682_v14 = vadd.f32 %v681_v11, %v680_v8 }
  0xe9   : > { %3535 = vpush %v671_v13  ;;  %v683_v15 = vrot.slane %v682_v14, 1 }
  0xeb   : > { %v684_v16 = vadd.f32 %v683_v15, %v682_v14 }
  0xed   : > { %3537 = vpush %v684_v16 }
 0x11a   : > { %s3536_s21 = spop %3535 }
 0x11b   : > { %s675_s1 = smul.f32 0.001953125, %s3536_s21 }
 0x11d   : > { %s689_s3 = smul.f32 %s675_s1, %s675_s1  ;;  %v704_v22 = vstv %s675_s1  ;;  %s875_s1 = sld [smem:[#allocation3]] }
 0x11e   : > { %s3538_s2 = spop %3537 }
 0x11f   : > { %s688_s4 = smul.f32 0.001953125, %s3538_s2  ;;  %s5001_s2 = sld [smem:[#allocation19_spill]] }
 0x121   : > { %s690_s0 = ssub.f32 %s688_s4, %s689_s3 }
 0x123   : > { %s691_s27 = smax.f32 %s3841_s22, %s690_s0  ;;  %s5002_s0 = sld [smem:[#allocation21_spill]]  ;;  %v880_v57 = vstv %s875_s1 }
 0x124   : > { %s692_s28 = sadd.f32 1e-08, %s691_s27 }
 0x125   : > { %v663_v23 = vld [vmem:[%s5001_s2] sm:$0xff] }
 0x126   : > { %v693_v17 = vstv %s692_s28 }
 0x127   : > { %3718 = vrsqrt.f32 %v693_v17 }
 0x129   : > { %v715_v26 = vld [vmem:[%s5002_s0 + $0x8] sm:$0xff]  ;;  %v714_v32 = vld [vmem:[%s5002_s0] sm:$0xff] }
 0x12a   : > { %718 = vperm.xlu0 %3660, %v714_v32  }
 0x131   : > { %v3719_v18 = vpop.eup %3718 }
 0x132   : > { %3539 = vpush %v3719_v18 }
 0x163   : > { %s3540_s30 = spop %3539 }
 0x164   : > { %v696_v20 = vstv %s3540_s30 }
 0x165   : > { %v697_v21 = vmul.f32 %v696_v20, %v662_v19 }
 0x167   : > { %700 = vperm.xlu1 %3659, %v697_v21   ;;  %v705_v24 = vmul.f32 %v704_v22, %v697_v21 }
 0x169   : > { %v706_v25 = vsub.f32 %v663_v23, %v705_v24 }
 0x16b   : > { %709 = vperm.xlu1 %3659, %v706_v25  }
 0x16f   : > { %723 = vperm.xlu1 %3659, %v715_v26  }
 0x173   : > { %791 = vperm.xlu1 %3659, %v785_v28  }
 0x177   : > { %796 = vperm.xlu1 %3659, %v786_v29  }
 0x17b   : > { %801 = vperm.xlu1 %3659, %v787_v30  }
 0x17f   : > { %806 = vperm.xlu1 %3659, %v788_v31  }
 0x1a9   : > { %v719_v42 = vpop.permute.xlu0 %718 }
 0x1e6   : > { %v701_v33 = vpop.permute.xlu1 %700 }
 0x1e7   : > { %v703_v34 = vmul.f32 %v701_v33, %v4047_v0 }
 0x1ea   : > { %v710_v35 = vpop.permute.xlu1 %709 }
 0x1eb   : > { %v712_v36 = vadd.f32 %v710_v35, %v703_v34 }
 0x1ed   : > { %v713_v37 = vpack.c.bf16 %v712_v36, %v712_v36 }
 0x1ee   : > { %v724_v44 = vpop.permute.xlu1 %723 }
 0x1ef   : > { %v737_v38 = vsel %vm735_vm1, %v713_v37, 0 }
 0x1f0   : > { %3468 = vmatpush3.bf16.msra.mxu0 %v737_v38 }
 0x1f2   : > { %v792_v51 = vpop.permute.xlu1 %791 }
 0x1f3   : > { %3470 = vmatmul.mubr.msk.bf16.vlgmr.msra.gmra.mrb[0].mxu0 %vm731_vm2, %v3701_v39 }
 0x1f6   : > { %v797_v52 = vpop.permute.xlu1 %796 }
 0x1fa   : > { %v802_v54 = vpop.permute.xlu1 %801 }
 0x1fe   : > { %v807_v60 = vpop.permute.xlu1 %806 }
 0x2c6   : > { %v773_v41 = vpop.f32.mrb[0].mxu0 }
 0x2c7   : > { %v3471_v43 = vpop.f32.mrb[1].mxu0  ;;  %v4090_v46 = vadd.f32 %v773_v41, %v719_v42 }
 0x2c8   : > { %v776_v45 = vpop.f32.mrb[2].mxu0  ;;  %v891_v43 = vld [vmem:[%s4946_s8 + $0x10] sm:$0xff] }
 0x2c9   : > { %v4092_v47 = vadd.f32 %v776_v45, %v724_v44  ;;  %v3472_v48 = vpop.f32.mrb[3].mxu0  ;;  %v889_v44 = vld [vmem:[%s4946_s8] sm:$0xff] }
 0x2cb   : > { %v784_v49 = vpack.c.bf16 %v4092_v47, %v4090_v46 }
 0x2cd   : > { %3473 = vmatprep.subr.bf16.mxu1 %v784_v49 }
 0x2ce   : > { %3474 = vmatpush3.bf16.msra.mxu1 %v784_v49 }
 0x2d1   : > { %3476 = vmatmul.mubr.msk.bf16.vlgmr.msra.gmra.mrb[0].mxu1 %vm819_vm3, %v3703_v50  ;;  %v890_v50 = vld [vmem:[%s4946_s8 + $0x8] sm:$0xff] }
 0x3a4   : > { %v3477_v56 = vpop.f32.mrb[0].mxu1 }
 0x3a5   : > { %v869_v58 = vadd.f32 %v3477_v56, %v802_v54  ;;  %v860_v59 = vpop.f32.mrb[1].mxu1  ;;  %v3844_v54 = vmov 1  }
 0x3a6   : > { %v861_v61 = vadd.f32 %v860_v59, %v792_v51  ;;  %v3478_v62 = vpop.f32.mrb[2].mxu1  ;;  %v893_v59 = vld [vmem:[%s4947_s9] sm:$0xff] }
 0x3a7   : > { %vm878_vm5 = vcmp.gt.f32.partialorder %v869_v58, 0.0  ;;  %v883_v63 = vmul.f32 %v880_v57, %v869_v58  ;;  %v872_v0 = vadd.f32 %v3478_v62, %v807_v60  ;;  %v863_v1 = vpop.f32.mrb[3].mxu1  ;;  %v894_v62 = vld [vmem:[%s4947_s9 + $0x8] sm:$0xff] }
 0x3a8   : > { %vm876_vm6 = vcmp.gt.f32.partialorder %v861_v61, 0.0  ;;  %v881_v3 = vmul.f32 %v880_v57, %v861_v61  ;;  %v864_v4 = vadd.f32 %v863_v1, %v797_v52  ;;  %v1008_v52 = vld [vmem:[%s4948_s10] sm:$0xff] }
 0x3a9   : > { %vm879_vm7 = vcmp.gt.f32.partialorder %v872_v0, 0.0  ;;  %v884_v5 = vmul.f32 %v880_v57, %v872_v0  ;;  %v887_v6 = vsel %vm878_vm5, %v869_v58, %v883_v63  ;;  %v1010_v58 = vld [vmem:[%s4948_s10 + $0x10] sm:$0xff]  ;;  %v1009_v63 = vld [vmem:[%s4948_s10 + $0x8] sm:$0xff] }
 0x3aa   : > { %v885_v7 = vsel %vm876_vm6, %v861_v61, %v881_v3  ;;  %vm877_vm8 = vcmp.gt.f32.partialorder %v864_v4, 0.0  ;;  %v882_v8 = vmul.f32 %v880_v57, %v864_v4  ;;  %v4107_v13 = vmul.f32 %v4101_v2, %v887_v6 }
 0x3ab   : > { %v4104_v9 = vmul.f32 %v4101_v2, %v885_v7  ;;  %v888_v10 = vsel %vm879_vm7, %v872_v0, %v884_v5  ;;  %v3845_v0 = vmov 2   ;;  %v896_v7 = vld [vmem:[%s4947_s9 + $0x18] sm:$0xff] }
 0x3ac   : > { %v886_v11 = vsel %vm877_vm8, %v864_v4, %v882_v8  ;;  %v4113_v15 = vmul.f32 %v4101_v2, %v888_v10  ;;  %v918_v20 = vmul.f32 %v4107_v13, %v4107_v13  ;;  %v895_v4 = vld [vmem:[%s4947_s9 + $0x10] sm:$0xff]  ;;  %v1100_v10 = vld [vmem:[%s4949_s11] sm:$0xff] }
 0x3ad   : > { %v4110_v14 = vmul.f32 %v4101_v2, %v886_v11  ;;  %v916_v17 = vmul.f32 %v4104_v9, %v4104_v9  ;;  %v1011_v11 = vld [vmem:[%s4948_s10 + $0x18] sm:$0xff] }
 0x3ae   : > { %v919_v23 = vmul.f32 %v4113_v15, %v4113_v15 }
 0x3af   : > { %v901_v16 = vadd.f32 %v4110_v14, %v4104_v9  ;;  %v917_v18 = vmul.f32 %v4110_v14, %v4110_v14 }
 0x3b1   : > { %v902_v19 = vadd.f32 %v901_v16, %v4107_v13  ;;  %v920_v21 = vadd.f32 %v917_v18, %v916_v17  ;;  %v1101_v16 = vld [vmem:[%s4949_s11 + $0x8] sm:$0xff]  ;;  %v1102_v17 = vld [vmem:[%s4949_s11 + $0x10] sm:$0xff]  ;;  %v1103_v18 = vld [vmem:[%s4949_s11 + $0x18] sm:$0xff] }
 0x3b3   : > { %v903_v22 = vadd.f32 %v902_v19, %v4113_v15  ;;  %v921_v24 = vadd.f32 %v920_v21, %v918_v20 }
 0x3b5   : > { %904 = vadd.xlane.f32.xlu1 %v903_v22  ;;  %v922_v25 = vadd.f32 %v921_v24, %v919_v23 }
 0x3b7   : > { %923 = vadd.xlane.f32.xlu0 %v922_v25 }
 0x442   : > { %v905_v26 = vpop.xlane.xlu1 %904 }
 0x443   : > { %v906_v28 = vrot.slane %v905_v26, 4 }
 0x444   : > { %v924_v29 = vpop.xlane.xlu0 %923 }
 0x445   : > { %v907_v30 = vadd.f32 %v906_v28, %v905_v26  ;;  %v925_v31 = vrot.slane %v924_v29, 4 }
 0x447   : > { %v926_v32 = vadd.f32 %v925_v31, %v924_v29  ;;  %v908_v33 = vrot.slane %v907_v30, 2 }
 0x449   : > { %v909_v34 = vadd.f32 %v908_v33, %v907_v30  ;;  %v927_v35 = vrot.slane %v926_v32, 2 }
 0x44b   : > { %v910_v36 = vrot.slane %v909_v34, 1  ;;  %v928_v37 = vadd.f32 %v927_v35, %v926_v32 }
 0x44d   : > { %v911_v38 = vadd.f32 %v910_v36, %v909_v34  ;;  %v929_v39 = vrot.slane %v928_v37, 1 }
 0x44f   : > { %3541 = vpush %v911_v38  ;;  %v930_v40 = vadd.f32 %v929_v39, %v928_v37 }
 0x451   : > { %3543 = vpush %v930_v40 }
 0x480   : > { %s3542_s27 = spop %3541 }
 0x481   : > { %s915_s28 = smul.f32 0.00048828125, %s3542_s27 }
 0x482   : > { %s3544_s21 = spop %3543 }
 0x483   : > { %s935_s2 = smul.f32 %s915_s28, %s915_s28  ;;  %v971_v55 = vstv %s915_s28 }
 0x484   : > { %s934_s3 = smul.f32 0.00048828125, %s3544_s21 }
 0x486   : > { %s936_s4 = ssub.f32 %s934_s3, %s935_s2 }
 0x488   : > { %s937_s7 = smax.f32 %s3841_s22, %s936_s4  ;;  %s3292_s4 = sld [smem:[#allocation3 + $0x1]] }
 0x489   : > { %s938_s12 = sadd.f32 1e-08, %s937_s7  ;;  %s4970_s7 = smov 1  }
 0x48b   : > { %v939_v41 = vstv %s938_s12  ;;  %s4968_s12 = smov 127  }
 0x48c   : > { %3720 = vrsqrt.f32 %v939_v41 }
 0x496   : > { %v3721_v42 = vpop.eup %3720 }
 0x497   : > { %3545 = vpush %v3721_v42 }
 0x4c8   : > { %s3546_s27 = spop %3545 }
 0x4c9   : > { %v942_v45 = vstv %s3546_s27 }
 0x4ca   : > { %v945_v48 = vmul.f32 %v942_v45, %v891_v43  ;;  %v943_v49 = vmul.f32 %v942_v45, %v889_v44  ;;  %v944_v51 = vmul.f32 %v942_v45, %v890_v50  ;;  %v946_v56 = vmul.f32 %v942_v45, %v892_v53 }
 0x4cc   : > { %959 = vperm.xlu0 %3660, %v945_v48   ;;  %949 = vperm.xlu1 %3659, %v943_v49   ;;  %v972_v57 = vmul.f32 %v971_v55, %v943_v49  ;;  %v973_v61 = vmul.f32 %v971_v55, %v944_v51  ;;  %v974_v3 = vmul.f32 %v971_v55, %v945_v48 }
 0x4cd   : > { %v975_v6 = vmul.f32 %v971_v55, %v946_v56 }
 0x4ce   : > { %v976_v60 = vsub.f32 %v893_v59, %v972_v57  ;;  %v977_v1 = vsub.f32 %v894_v62, %v973_v61  ;;  %v978_v5 = vsub.f32 %v895_v4, %v974_v3 }
 0x4cf   : > { %v979_v8 = vsub.f32 %v896_v7, %v975_v6 }
 0x4d0   : > { %954 = vperm.xlu1 %3659, %v944_v51   ;;  %3661 = vset.pattern.permute.xlu0 %v3844_v54 }
 0x4d1   : > { %1045 = vperm.xlu0 %3661, %v1008_v52  }
 0x4d4   : > { %964 = vperm.xlu1 %3659, %v946_v56  }
 0x4d5   : > { %1053 = vperm.xlu0 %3661, %v1010_v58  }
 0x4d8   : > { %982 = vperm.xlu1 %3659, %v976_v60  }
 0x4d9   : > { %3665 = vset.pattern.permute.xlu0 %v3845_v0 }
 0x4da   : > { %1081 = vperm.xlu0 %3665, %v1009_v63  }
 0x4dc   : > { %987 = vperm.xlu1 %3659, %v977_v1  }
 0x4de   : > { %1085 = vperm.xlu0 %3665, %v1010_v58  }
 0x4e0   : > { %992 = vperm.xlu1 %3659, %v978_v5  }
 0x4e2   : > { %3668 = vset.pattern.permute.xlu0 %v3840_v12 }
 0x4e3   : > { %1022 = vperm.xlu0 %3668, %v1008_v52  }
 0x4e4   : > { %997 = vperm.xlu1 %3659, %v979_v8  }
 0x4e7   : > { %1106 = vperm.xlu0 %3668, %v1100_v10  }
 0x4e8   : > { %1027 = vperm.xlu1 %3659, %v1009_v63  }
 0x4ec   : > { %3662 = vset.pattern.permute.xlu1 %v3844_v54 }
 0x4ed   : > { %1049 = vperm.xlu1 %3662, %v1009_v63  }
 0x4f1   : > { %3663 = vset.pattern.permute.xlu1 %v3840_v12 }
 0x4f2   : > { %1032 = vperm.xlu1 %3663, %v1010_v58  }
 0x4f6   : > { %3664 = vset.pattern.permute.xlu1 %v3845_v0 }
 0x4f7   : > { %1077 = vperm.xlu1 %3664, %v1008_v52  }
 0x4fb   : > { %3666 = vset.pattern.permute.xlu1 %v3840_v12 }
 0x4fc   : > { %1037 = vperm.xlu1 %3666, %v1011_v11  }
 0x500   : > { %3667 = vset.pattern.permute.xlu1 %v3844_v54 }
 0x501   : > { %1057 = vperm.xlu1 %3667, %v1011_v11  }
 0x505   : > { %3669 = vset.pattern.permute.xlu1 %v3845_v0 }
 0x506   : > { %1089 = vperm.xlu1 %3669, %v1011_v11   ;;  %v1133_v11 = vstv %s1128_s23 }
 0x50a   : > { %3670 = vset.pattern.permute.xlu1 %v3840_v12 }
 0x50b   : > { %1111 = vperm.xlu1 %3670, %v1101_v16  }
 0x50f   : > { %1116 = vperm.xlu1 %3670, %v1102_v17  }
 0x513   : > { %1121 = vperm.xlu1 %3670, %v1103_v18  }
 0x54b   : > { %v950_v19 = vpop.permute.xlu1 %949  ;;  %v960_v28 = vpop.permute.xlu0 %959 }
 0x54c   : > { %v967_v22 = vmul.f32 %v950_v19, %v4104_v9  ;;  %v969_v31 = vmul.f32 %v960_v28, %v4107_v13 }
 0x54f   : > { %v955_v20 = vpop.permute.xlu1 %954 }
 0x550   : > { %v968_v25 = vmul.f32 %v955_v20, %v4110_v14 }
 0x553   : > { %v965_v21 = vpop.permute.xlu1 %964 }
 0x554   : > { %v970_v35 = vmul.f32 %v965_v21, %v4113_v15  ;;  %v1046_v15 = vpop.permute.xlu0 %1045 }
 0x557   : > { %v983_v23 = vpop.permute.xlu1 %982 }
 0x558   : > { %v1000_v24 = vadd.f32 %v983_v23, %v967_v22  ;;  %v1054_v44 = vpop.permute.xlu0 %1053 }
 0x55a   : > { %v1004_v26 = vmul.f32 %v4101_v2, %v1000_v24 }
 0x55b   : > { %v988_v29 = vpop.permute.xlu1 %987 }
 0x55c   : > { %v1001_v30 = vadd.f32 %v988_v29, %v968_v25  ;;  %1012 = vrot.lane.b32.xlu1 %v1004_v26, %s4970_s7  ;;  %v1082_v45 = vpop.permute.xlu0 %1081  ;;  %v1060_v57 = vmul.f32 %v1046_v15, %v1004_v26 }
 0x55e   : > { %v1005_v32 = vmul.f32 %v4101_v2, %v1001_v30 }
 0x55f   : > { %v993_v33 = vpop.permute.xlu1 %992 }
 0x560   : > { %v1002_v34 = vadd.f32 %v993_v33, %v969_v31  ;;  %1068 = vrot.lane.b32.xlu1 %v1004_v26, %s4968_s12  ;;  %1014 = vrot.lane.b32.xlu0 %v1005_v32, %s4970_s7  ;;  %v1086_v49 = vpop.permute.xlu0 %1085 }
 0x562   : > { %v1006_v9 = vmul.f32 %v4101_v2, %v1002_v34 }
 0x563   : > { %v998_v14 = vpop.permute.xlu1 %997 }
 0x564   : > { %1072 = vrot.lane.b32.xlu1 %v1006_v9, %s4968_s12  ;;  %1016 = vrot.lane.b32.xlu0 %v1006_v9, %s4970_s7  ;;  %v1003_v36 = vadd.f32 %v998_v14, %v970_v35  ;;  %v1023_v51 = vpop.permute.xlu0 %1022  ;;  %v1062_v3 = vmul.f32 %v1054_v44, %v1006_v9 }
 0x566   : > { %v1007_v13 = vmul.f32 %v4101_v2, %v1003_v36 }
 0x567   : > { %v1028_v37 = vpop.permute.xlu1 %1027 }
 0x568   : > { %1070 = vrot.lane.b32.xlu0 %v1005_v32, %s4968_s12  ;;  %v1107_v53 = vpop.permute.xlu0 %1106 }
 0x56c   : > { %1018 = vrot.lane.b32.xlu0 %v1007_v13, %s4970_s7  ;;  %v1050_v38 = vpop.permute.xlu1 %1049 }
 0x56d   : > { %v1061_v6 = vmul.f32 %v1050_v38, %v1005_v32 }
 0x570   : > { %1074 = vrot.lane.b32.xlu0 %v1007_v13, %s4968_s12  ;;  %s3309_s12 = sld [smem:[#allocation6 + $0x1]] }
 0x571   : > { %v1033_v39 = vpop.permute.xlu1 %1032 }
 0x576   : > { %v1078_v40 = vpop.permute.xlu1 %1077 }
 0x57b   : > { %v1038_v41 = vpop.permute.xlu1 %1037 }
 0x580   : > { %v1058_v42 = vpop.permute.xlu1 %1057 }
 0x581   : > { %v1063_v26 = vmul.f32 %v1058_v42, %v1007_v13 }
 0x585   : > { %v1090_v43 = vpop.permute.xlu1 %1089 }
 0x58a   : > { %v1112_v48 = vpop.permute.xlu1 %1111 }
 0x58e   : > { %v1117_v50 = vpop.permute.xlu1 %1116 }
 0x592   : > { %v1122_v52 = vpop.permute.xlu1 %1121 }
 0x5ce   : > { %v1013_v55 = vpop.permute.xlu1 %1012 }
 0x5cf   : > { %v1040_v56 = vmul.f32 %v1023_v51, %v1013_v55 }
 0x5d1   : > { %v1064_v60 = vadd.f32 %v1060_v57, %v1040_v56 }
 0x5d2   : > { %v1015_v58 = vpop.permute.xlu0 %1014  ;;  %v1069_v59 = vpop.permute.xlu1 %1068 }
 0x5d3   : > { %v1092_v61 = vmul.f32 %v1078_v40, %v1069_v59  ;;  %v1041_v4 = vmul.f32 %v1028_v37, %v1015_v58 }
 0x5d5   : > { %v1096_v62 = vadd.f32 %v1092_v61, %v1064_v60  ;;  %v1065_v17 = vadd.f32 %v1061_v6, %v1041_v4 }
 0x5d6   : > { %v1017_v63 = vpop.permute.xlu0 %1016  ;;  %v1073_v1 = vpop.permute.xlu1 %1072 }
 0x5d7   : > { %v1042_v5 = vmul.f32 %v1033_v39, %v1017_v63  ;;  %v1124_v7 = vadd.f32 %v1107_v53, %v1096_v62  ;;  %v1094_v10 = vmul.f32 %v1086_v49, %v1073_v1 }
 0x5d9   : > { %v1066_v8 = vadd.f32 %v1062_v3, %v1042_v5  ;;  %v1134_v20 = vmul.f32 %v1133_v11, %v1124_v7  ;;  %vm1129_vm9 = vcmp.gt.f32.partialorder %v1124_v7, 0.0 }
 0x5da   : > { %v1071_v16 = vpop.permute.xlu0 %1070 }
 0x5db   : > { %v1098_v18 = vadd.f32 %v1094_v10, %v1066_v8  ;;  %v1093_v19 = vmul.f32 %v1082_v45, %v1071_v16  ;;  %v1138_v28 = vsel %vm1129_vm9, %v1124_v7, %v1134_v20  ;;  %v1143_v7 = vld [vmem:[%s4951_s13 + $0x8] sm:$0xff]  ;;  %v1142_v8 = vld [vmem:[%s4951_s13] sm:$0xff] }
 0x5dc   : > { %v4203_v9 = vmul.f32 %v4101_v2, %v1138_v28 }
 0x5dd   : > { %v1126_v21 = vadd.f32 %v1117_v50, %v1098_v18  ;;  %v1097_v22 = vadd.f32 %v1093_v19, %v1065_v17  ;;  %v1144_v17 = vld [vmem:[%s4951_s13 + $0x10] sm:$0xff]  ;;  %v1145_v18 = vld [vmem:[%s4951_s13 + $0x18] sm:$0xff] }
 0x5de   : > { %v1019_v23 = vpop.permute.xlu0 %1018  ;;  %v1169_v40 = vmul.f32 %v4203_v9, %v4203_v9 }
 0x5df   : > { %v1125_v24 = vadd.f32 %v1112_v48, %v1097_v22  ;;  %v1043_v25 = vmul.f32 %v1038_v41, %v1019_v23  ;;  %v1136_v29 = vmul.f32 %v1133_v11, %v1126_v21  ;;  %vm1131_vm11 = vcmp.gt.f32.partialorder %v1126_v21, 0.0 }
 0x5e1   : > { %vm1130_vm10 = vcmp.gt.f32.partialorder %v1125_v24, 0.0  ;;  %v1135_v30 = vmul.f32 %v1133_v11, %v1125_v24  ;;  %v1067_v33 = vadd.f32 %v1063_v26, %v1043_v25  ;;  %v1140_v36 = vsel %vm1131_vm11, %v1126_v21, %v1136_v29  ;;  %v1146_v25 = vld [vmem:[%s4952_s14] sm:$0xff] }
 0x5e2   : > { %v1075_v31 = vpop.permute.xlu0 %1074  ;;  %v4211_v38 = vmul.f32 %v4101_v2, %v1140_v36  ;;  %v1263_v36 = vld [vmem:[%s4954_s16] sm:$0xff] }
 0x5e3   : > { %v1139_v32 = vsel %vm1130_vm10, %v1125_v24, %v1135_v30  ;;  %v1095_v34 = vmul.f32 %v1090_v43, %v1075_v31  ;;  %v1147_v24 = vld [vmem:[%s4952_s14 + $0x8] sm:$0xff]  ;;  %v1149_v31 = vld [vmem:[%s4952_s14 + $0x18] sm:$0xff] }
 0x5e4   : > { %v4206_v14 = vmul.f32 %v4101_v2, %v1139_v32  ;;  %v1171_v45 = vmul.f32 %v4211_v38, %v4211_v38  ;;  %v1148_v32 = vld [vmem:[%s4952_s14 + $0x10] sm:$0xff] }
 0x5e5   : > { %v1099_v35 = vadd.f32 %v1095_v34, %v1067_v33 }
 0x5e6   : > { %v1170_v13 = vmul.f32 %v4206_v14, %v4206_v14  ;;  %v1154_v39 = vadd.f32 %v4206_v14, %v4203_v9 }
 0x5e7   : > { %v1127_v37 = vadd.f32 %v1122_v52, %v1099_v35  ;;  %v1264_v35 = vld [vmem:[%s4954_s16 + $0x8] sm:$0xff] }
 0x5e8   : > { %v1173_v42 = vadd.f32 %v1170_v13, %v1169_v40  ;;  %v1155_v44 = vadd.f32 %v1154_v39, %v4211_v38  ;;  %v3285_v13 = vld [vmem:[%s4944_s6 + $0x28] sm:$0xff]  ;;  %v3704_v39 = vld [vmem:[%s4953_s15] sm:$0xff]   ;;  %v3287_v40 = vld [vmem:[%s4944_s6 + $0x38] sm:$0xff] }
 0x5e9   : > { %v1137_v41 = vmul.f32 %v1133_v11, %v1127_v37  ;;  %vm1132_vm12 = vcmp.gt.f32.partialorder %v1127_v37, 0.0  ;;  %3483 = vmatprep.mubr.msk.bf16.mxu0 %vm1297_vm13, %v3704_v39 }
 0x5ea   : > { %v1174_v50 = vadd.f32 %v1173_v42, %v1171_v45 }
 0x5eb   : > { %v1141_v15 = vsel %vm1132_vm12, %v1127_v37, %v1137_v41  ;;  %v3284_v37 = vld [vmem:[%s4944_s6 + $0x20] sm:$0xff]  ;;  %v3286_v41 = vld [vmem:[%s4944_s6 + $0x30] sm:$0xff] }
 0x5ec   : > { %v4218_v43 = vmul.f32 %v4101_v2, %v1141_v15 }
 0x5ee   : > { %v1156_v48 = vadd.f32 %v1155_v44, %v4218_v43  ;;  %v1172_v49 = vmul.f32 %v4218_v43, %v4218_v43 }
 0x5f0   : > { %1157 = vadd.xlane.f32.xlu1 %v1156_v48  ;;  %v1175_v51 = vadd.f32 %v1174_v50, %v1172_v49 }
 0x5f2   : > { %1176 = vadd.xlane.f32.xlu0 %v1175_v51 }
 0x67d   : > { %v1158_v52 = vpop.xlane.xlu1 %1157 }
 0x67e   : > { %v1159_v53 = vrot.slane %v1158_v52, 4 }
 0x67f   : > { %v1177_v55 = vpop.xlane.xlu0 %1176 }
 0x680   : > { %v1160_v56 = vadd.f32 %v1159_v53, %v1158_v52  ;;  %v1178_v57 = vrot.slane %v1177_v55, 4 }
 0x682   : > { %v1179_v58 = vadd.f32 %v1178_v57, %v1177_v55  ;;  %v1161_v59 = vrot.slane %v1160_v56, 2 }
 0x684   : > { %v1162_v60 = vadd.f32 %v1161_v59, %v1160_v56  ;;  %v1180_v61 = vrot.slane %v1179_v58, 2 }
 0x686   : > { %v1163_v62 = vrot.slane %v1162_v60, 1  ;;  %v1181_v63 = vadd.f32 %v1180_v61, %v1179_v58 }
 0x688   : > { %v1164_v1 = vadd.f32 %v1163_v62, %v1162_v60  ;;  %v1182_v3 = vrot.slane %v1181_v63, 1 }
 0x68a   : > { %3547 = vpush %v1164_v1  ;;  %v1183_v4 = vadd.f32 %v1182_v3, %v1181_v63 }
 0x68c   : > { %3549 = vpush %v1183_v4 }
 0x6bb   : > { %s3548_s26 = spop %3547 }
 0x6bc   : > { %s1168_s30 = smul.f32 0.00048828125, %s3548_s26 }
 0x6bd   : > { %s3550_s1 = spop %3549 }
 0x6be   : > { %s1188_s27 = smul.f32 %s1168_s30, %s1168_s30  ;;  %v1224_v19 = vstv %s1168_s30 }
 0x6bf   : > { %s1187_s21 = smul.f32 0.00048828125, %s3550_s1 }
 0x6c1   : > { %s1189_s28 = ssub.f32 %s1187_s21, %s1188_s27 }
 0x6c3   : > { %s1190_s2 = smax.f32 %s3841_s22, %s1189_s28 }
 0x6c4   : > { %s1191_s3 = sadd.f32 1e-08, %s1190_s2 }
 0x6c6   : > { %v1192_v5 = vstv %s1191_s3 }
 0x6c7   : > { %3722 = vrsqrt.f32 %v1192_v5 }
 0x6d1   : > { %v3723_v6 = vpop.eup %3722 }
 0x6d2   : > { %3551 = vpush %v3723_v6 }
 0x703   : > { %s3552_s26 = spop %3551 }
 0x704   : > { %v1195_v10 = vstv %s3552_s26 }
 0x705   : > { %v1197_v11 = vmul.f32 %v1195_v10, %v1143_v7  ;;  %v1196_v16 = vmul.f32 %v1195_v10, %v1142_v8  ;;  %v1198_v20 = vmul.f32 %v1195_v10, %v1144_v17  ;;  %v1199_v21 = vmul.f32 %v1195_v10, %v1145_v18 }
 0x707   : > { %1207 = vperm.xlu1 %3670, %v1197_v11   ;;  %1202 = vperm.xlu0 %3668, %v1196_v16   ;;  %v1226_v22 = vmul.f32 %v1224_v19, %v1197_v11  ;;  %v1225_v23 = vmul.f32 %v1224_v19, %v1196_v16  ;;  %v1228_v29 = vmul.f32 %v1224_v19, %v1199_v21  ;;  %v3707_v11 = vld [vmem:[%s4943_s5 + $0x18] sm:$0xff]  }
 0x708   : > { %v1227_v30 = vmul.f32 %v1224_v19, %v1198_v20  ;;  %v1456_v19 = vstv %s3292_s4 }
 0x709   : > { %v1230_v26 = vsub.f32 %v1147_v24, %v1226_v22  ;;  %v1229_v28 = vsub.f32 %v1146_v25, %v1225_v23  ;;  %v1232_v33 = vsub.f32 %v1149_v31, %v1228_v29 }
 0x70a   : > { %v1231_v34 = vsub.f32 %v1148_v32, %v1227_v30 }
 0x70b   : > { %1212 = vperm.xlu1 %3670, %v1198_v20   ;;  %1217 = vperm.xlu0 %3668, %v1199_v21  }
 0x70f   : > { %1240 = vperm.xlu0 %3668, %v1230_v26   ;;  %1235 = vperm.xlu1 %3670, %v1229_v28  }
 0x713   : > { %1250 = vperm.xlu0 %3668, %v1232_v33   ;;  %1245 = vperm.xlu1 %3670, %v1231_v34  }
 0x717   : > { %1274 = vperm.xlu0 %3668, %v1264_v35   ;;  %1269 = vperm.xlu1 %3670, %v1263_v36  }
 0x71b   : > { %1373 = vperm.xlu0 %3668, %v3285_v13   ;;  %1368 = vperm.xlu1 %3670, %v3284_v37  }
 0x71f   : > { %1383 = vperm.xlu0 %3668, %v3287_v40   ;;  %1378 = vperm.xlu1 %3670, %v3286_v41  }
 0x786   : > { %v1208_v42 = vpop.permute.xlu1 %1207  ;;  %v1203_v15 = vpop.permute.xlu0 %1202 }
 0x787   : > { %v1221_v48 = vmul.f32 %v1208_v42, %v4206_v14  ;;  %v1220_v49 = vmul.f32 %v1203_v15, %v4203_v9  ;;  %v3705_v9 = vld [vmem:[%s4953_s15 + $0x8] sm:$0xff]   ;;  %v3706_v14 = vld [vmem:[%s4943_s5 + $0x10] sm:$0xff]  }
 0x788   : > { %3489 = vmatprep.mubr.msk.bf16.mxu1 %vm819_vm3, %v3706_v14 }
 0x78a   : > { %v1213_v44 = vpop.permute.xlu1 %1212  ;;  %v1218_v45 = vpop.permute.xlu0 %1217 }
 0x78b   : > { %v1222_v55 = vmul.f32 %v1213_v44, %v4211_v38  ;;  %v1223_v56 = vmul.f32 %v1218_v45, %v4218_v43 }
 0x78e   : > { %v1241_v50 = vpop.permute.xlu0 %1240  ;;  %v1236_v51 = vpop.permute.xlu1 %1235 }
 0x78f   : > { %v1254_v52 = vadd.f32 %v1241_v50, %v1221_v48  ;;  %v1253_v53 = vadd.f32 %v1236_v51, %v1220_v49 }
 0x791   : > { %v1261_v57 = vpack.c.bf16 %v1254_v52, %v1253_v53 }
 0x792   : > { %v1251_v58 = vpop.permute.xlu0 %1250  ;;  %v1246_v59 = vpop.permute.xlu1 %1245 }
 0x793   : > { %v1256_v60 = vadd.f32 %v1251_v58, %v1223_v56  ;;  %v1255_v61 = vadd.f32 %v1246_v59, %v1222_v55  ;;  %3479 = vmatprep.subr.bf16.mxu0 %v1261_v57 }
 0x794   : > { %3480 = vmatpush3.bf16.msra.mxu0 %v1261_v57 }
 0x795   : > { %v1262_v62 = vpack.c.bf16 %v1256_v60, %v1255_v61 }
 0x796   : > { %v1270_v43 = vpop.permute.xlu1 %1269  ;;  %v1275_v4 = vpop.permute.xlu0 %1274 }
 0x797   : > { %3481 = vmatprep.subr.bf16.mxu0 %v1262_v62 }
 0x798   : > { %3482 = vmatpush3.bf16.msra.mxu0 %v1262_v62 }
 0x79a   : > { %v1369_v16 = vpop.permute.xlu1 %1368  ;;  %v1374_v17 = vpop.permute.xlu0 %1373 }
 0x79b   : > { %3484 = vmatmul.mubr.msk.bf16.vlgmr.msra.gmra.mrb[4].mxu0 %vm1297_vm13, %v3705_v9 }
 0x79e   : > { %v1379_v18 = vpop.permute.xlu1 %1378  ;;  %v1384_v21 = vpop.permute.xlu0 %1383 }
 0x86e   : > { %v4285_v38 = vpop.f32.mrb[4].mxu0 }
 0x86f   : > { %v1338_v63 = vpop.f32.mrb[5].mxu0 }
 0x870   : > { %v1339_v1 = vadd.f32 %v1338_v63, %v1270_v43  ;;  %v4287_v3 = vpop.f32.mrb[6].mxu0 }
 0x871   : > { %v1341_v5 = vpop.f32.mrb[7].mxu0 }
 0x872   : > { %v1342_v6 = vadd.f32 %v1341_v5, %v1275_v4  ;;  %v4290_v7 = vadd.f32 %v1339_v1, %v4090_v46  ;;  %v3294_v5 = vld [vmem:[%s4946_s8 + $0x28] sm:$0xff] }
 0x874   : > { %v4293_v8 = vadd.f32 %v1342_v6, %v4092_v47  ;;  %v3293_v6 = vld [vmem:[%s4946_s8 + $0x20] sm:$0xff] }
 0x876   : > { %v1360_v10 = vpack.c.bf16 %v4293_v8, %v4290_v7 }
 0x878   : > { %3487 = vmatprep.subr.bf16.mxu1 %v1360_v10 }
 0x879   : > { %3488 = vmatpush3.bf16.msra.mxu1 %v1360_v10 }
 0x87c   : > { %3490 = vmatmul.mubr.msk.bf16.vlgmr.msra.gmra.mrb[4].mxu1 %vm819_vm3, %v3707_v11 }
 0x94f   : > { %v3491_v46 = vpop.f32.mrb[4].mxu1 }
 0x950   : > { %v1445_v20 = vadd.f32 %v3491_v46, %v1379_v18  ;;  %v1436_v47 = vpop.f32.mrb[5].mxu1  ;;  %v3296_v18 = vld [vmem:[%s4946_s8 + $0x38] sm:$0xff] }
 0x951   : > { %v1437_v22 = vadd.f32 %v1436_v47, %v1369_v16  ;;  %v3492_v23 = vpop.f32.mrb[6].mxu1 }
 0x952   : > { %vm1454_vm14 = vcmp.gt.f32.partialorder %v1445_v20, 0.0  ;;  %v1459_v24 = vmul.f32 %v1456_v19, %v1445_v20  ;;  %v1448_v25 = vadd.f32 %v3492_v23, %v1384_v21  ;;  %v1439_v26 = vpop.f32.mrb[7].mxu1  ;;  %v3297_v23 = vld [vmem:[%s4947_s9 + $0x20] sm:$0xff] }
 0x953   : > { %vm1452_vm15 = vcmp.gt.f32.partialorder %v1437_v22, 0.0  ;;  %v1457_v28 = vmul.f32 %v1456_v19, %v1437_v22  ;;  %v1440_v29 = vadd.f32 %v1439_v26, %v1374_v17  ;;  %v3295_v17 = vld [vmem:[%s4946_s8 + $0x30] sm:$0xff] }
 0x954   : > { %vm1455_vm1 = vcmp.gt.f32.partialorder %v1448_v25, 0.0  ;;  %v1460_v30 = vmul.f32 %v1456_v19, %v1448_v25  ;;  %v1463_v31 = vsel %vm1454_vm14, %v1445_v20, %v1459_v24 }
 0x955   : > { %v1461_v32 = vsel %vm1452_vm15, %v1437_v22, %v1457_v28  ;;  %vm1453_vm2 = vcmp.gt.f32.partialorder %v1440_v29, 0.0  ;;  %v1458_v33 = vmul.f32 %v1456_v19, %v1440_v29  ;;  %v4305_v13 = vmul.f32 %v4101_v2, %v1463_v31  ;;  %v3298_v22 = vld [vmem:[%s4947_s9 + $0x28] sm:$0xff] }
 0x956   : > { %v4302_v34 = vmul.f32 %v4101_v2, %v1461_v32  ;;  %v1464_v35 = vsel %vm1455_vm1, %v1448_v25, %v1460_v30  ;;  %v3300_v30 = vld [vmem:[%s4947_s9 + $0x38] sm:$0xff] }
 0x957   : > { %v1462_v36 = vsel %vm1453_vm2, %v1440_v29, %v1458_v33  ;;  %v4311_v39 = vmul.f32 %v4101_v2, %v1464_v35  ;;  %v1496_v44 = vmul.f32 %v4305_v13, %v4305_v13  ;;  %v3299_v29 = vld [vmem:[%s4947_s9 + $0x30] sm:$0xff]  ;;  %v3301_v33 = vld [vmem:[%s4948_s10 + $0x20] sm:$0xff]  ;;  %v3302_v35 = vld [vmem:[%s4948_s10 + $0x28] sm:$0xff] }
 0x958   : > { %v4308_v37 = vmul.f32 %v4101_v2, %v1462_v36  ;;  %v1494_v41 = vmul.f32 %v4302_v34, %v4302_v34  ;;  %v3303_v36 = vld [vmem:[%s4948_s10 + $0x30] sm:$0xff] }
 0x959   : > { %v1497_v49 = vmul.f32 %v4311_v39, %v4311_v39 }
 0x95a   : > { %v1479_v40 = vadd.f32 %v4308_v37, %v4302_v34  ;;  %v1495_v42 = vmul.f32 %v4308_v37, %v4308_v37 }
 0x95c   : > { %v1480_v15 = vadd.f32 %v1479_v40, %v4305_v13  ;;  %v1498_v45 = vadd.f32 %v1495_v42, %v1494_v41  ;;  %v3304_v40 = vld [vmem:[%s4948_s10 + $0x38] sm:$0xff]  ;;  %v3305_v41 = vld [vmem:[%s4949_s11 + $0x20] sm:$0xff]  ;;  %v3306_v42 = vld [vmem:[%s4949_s11 + $0x28] sm:$0xff] }
 0x95e   : > { %v1481_v48 = vadd.f32 %v1480_v15, %v4311_v39  ;;  %v1499_v50 = vadd.f32 %v1498_v45, %v1496_v44  ;;  %v3307_v15 = vld [vmem:[%s4949_s11 + $0x30] sm:$0xff]  ;;  %v3308_v44 = vld [vmem:[%s4949_s11 + $0x38] sm:$0xff] }
 0x960   : > { %1482 = vadd.xlane.f32.xlu1 %v1481_v48  ;;  %v1500_v51 = vadd.f32 %v1499_v50, %v1497_v49 }
 0x962   : > { %1501 = vadd.xlane.f32.xlu0 %v1500_v51 }
 0x9ed   : > { %v1483_v52 = vpop.xlane.xlu1 %1482 }
 0x9ee   : > { %v1484_v53 = vrot.slane %v1483_v52, 4 }
 0x9ef   : > { %v1502_v55 = vpop.xlane.xlu0 %1501 }
 0x9f0   : > { %v1485_v56 = vadd.f32 %v1484_v53, %v1483_v52  ;;  %v1503_v57 = vrot.slane %v1502_v55, 4 }
 0x9f2   : > { %v1504_v58 = vadd.f32 %v1503_v57, %v1502_v55  ;;  %v1486_v59 = vrot.slane %v1485_v56, 2 }
 0x9f4   : > { %v1487_v60 = vadd.f32 %v1486_v59, %v1485_v56  ;;  %v1505_v61 = vrot.slane %v1504_v58, 2 }
 0x9f6   : > { %v1488_v62 = vrot.slane %v1487_v60, 1  ;;  %v1506_v9 = vadd.f32 %v1505_v61, %v1504_v58 }
 0x9f8   : > { %v1489_v14 = vadd.f32 %v1488_v62, %v1487_v60  ;;  %v1507_v43 = vrot.slane %v1506_v9, 1 }
 0x9fa   : > { %3553 = vpush %v1489_v14  ;;  %v1508_v63 = vadd.f32 %v1507_v43, %v1506_v9 }
 0x9fc   : > { %3555 = vpush %v1508_v63 }
 0xa2b   : > { %s3554_s30 = spop %3553 }
 0xa2c   : > { %s1493_s23 = smul.f32 0.00048828125, %s3554_s30 }
 0xa2d   : > { %s3556_s26 = spop %3555 }
 0xa2e   : > { %s1513_s1 = smul.f32 %s1493_s23, %s1493_s23  ;;  %v1549_v46 = vstv %s1493_s23 }
 0xa2f   : > { %s1512_s27 = smul.f32 0.00048828125, %s3556_s26 }
 0xa31   : > { %s1514_s21 = ssub.f32 %s1512_s27, %s1513_s1 }
 0xa33   : > { %s1515_s28 = smax.f32 %s3841_s22, %s1514_s21  ;;  %s3342_s21 = sld [smem:[#allocation3 + $0x2]] }
 0xa34   : > { %s1516_s7 = sadd.f32 1e-08, %s1515_s28  ;;  %s4974_s28 = smov 2  }
 0xa36   : > { %v1517_v1 = vstv %s1516_s7  ;;  %s4972_s7 = smov 126  }
 0xa37   : > { %3724 = vrsqrt.f32 %v1517_v1 }
 0xa41   : > { %v3725_v4 = vpop.eup %3724 }
 0xa42   : > { %3557 = vpush %v3725_v4 }
 0xa73   : > { %s3558_s30 = spop %3557 }
 0xa74   : > { %v1520_v10 = vstv %s3558_s30 }
 0xa75   : > { %v1522_v11 = vmul.f32 %v3294_v5, %v1520_v10  ;;  %v1521_v16 = vmul.f32 %v3293_v6, %v1520_v10  ;;  %v1523_v19 = vmul.f32 %v3295_v17, %v1520_v10  ;;  %v1524_v20 = vmul.f32 %v3296_v18, %v1520_v10 }
 0xa77   : > { %1532 = vperm.xlu1 %3670, %v1522_v11   ;;  %1527 = vperm.xlu0 %3668, %v1521_v16   ;;  %v1551_v47 = vmul.f32 %v1549_v46, %v1522_v11  ;;  %v1550_v21 = vmul.f32 %v1549_v46, %v1521_v16  ;;  %v1552_v26 = vmul.f32 %v1549_v46, %v1523_v19 }
 0xa78   : > { %v1553_v28 = vmul.f32 %v1549_v46, %v1524_v20 }
 0xa79   : > { %v1555_v24 = vsub.f32 %v3298_v22, %v1551_v47  ;;  %v1554_v25 = vsub.f32 %v3297_v23, %v1550_v21  ;;  %v1556_v31 = vsub.f32 %v3299_v29, %v1552_v26 }
 0xa7a   : > { %v1557_v32 = vsub.f32 %v3300_v30, %v1553_v28 }
 0xa7b   : > { %1537 = vperm.xlu1 %3670, %v1523_v19   ;;  %1542 = vperm.xlu0 %3668, %v1524_v20  }
 0xa7f   : > { %1565 = vperm.xlu1 %3670, %v1555_v24   ;;  %1560 = vperm.xlu0 %3668, %v1554_v25  }
 0xa83   : > { %1570 = vperm.xlu1 %3670, %v1556_v31   ;;  %1575 = vperm.xlu0 %3668, %v1557_v32  }
 0xa87   : > { %1601 = vperm.xlu1 %3670, %v3301_v33   ;;  %3674 = vset.pattern.permute.xlu0 %v3845_v0 }
 0xa88   : > { %1656 = vperm.xlu0 %3674, %v3301_v33  }
 0xa8b   : > { %3671 = vset.pattern.permute.xlu1 %v3844_v54 }
 0xa8c   : > { %1624 = vperm.xlu1 %3671, %v3301_v33   ;;  %3675 = vset.pattern.permute.xlu0 %v3844_v54 }
 0xa8d   : > { %1628 = vperm.xlu0 %3675, %v3302_v35  }
 0xa90   : > { %3672 = vset.pattern.permute.xlu1 %v3840_v12 }
 0xa91   : > { %1611 = vperm.xlu1 %3672, %v3303_v36   ;;  %1636 = vperm.xlu0 %3675, %v3304_v40  }
 0xa95   : > { %3673 = vset.pattern.permute.xlu1 %v3844_v54  ;;  %3678 = vset.pattern.permute.xlu0 %v3840_v12 }
 0xa96   : > { %1632 = vperm.xlu1 %3673, %v3303_v36   ;;  %1606 = vperm.xlu0 %3678, %v3302_v35  }
 0xa9a   : > { %3676 = vset.pattern.permute.xlu1 %v3845_v0  ;;  %1686 = vperm.xlu0 %3678, %v3305_v41  }
 0xa9b   : > { %1660 = vperm.xlu1 %3676, %v3302_v35  }
 0xa9f   : > { %3677 = vset.pattern.permute.xlu1 %v3840_v12 }
 0xaa0   : > { %1616 = vperm.xlu1 %3677, %v3304_v40  }
 0xaa4   : > { %3679 = vset.pattern.permute.xlu1 %v3845_v0 }
 0xaa5   : > { %1664 = vperm.xlu1 %3679, %v3303_v36  }
 0xaa9   : > { %1668 = vperm.xlu1 %3679, %v3304_v40   ;;  %v1713_v40 = vstv %s3309_s12 }
 0xaad   : > { %3680 = vset.pattern.permute.xlu1 %v3840_v12 }
 0xaae   : > { %1691 = vperm.xlu1 %3680, %v3306_v42  }
 0xab2   : > { %1696 = vperm.xlu1 %3680, %v3307_v15  }
 0xab6   : > { %1701 = vperm.xlu1 %3680, %v3308_v44  }
 0xaf6   : > { %v1533_v45 = vpop.permute.xlu1 %1532  ;;  %v1528_v48 = vpop.permute.xlu0 %1527 }
 0xaf7   : > { %v1546_v51 = vmul.f32 %v1533_v45, %v4308_v37  ;;  %v1545_v52 = vmul.f32 %v1528_v48, %v4302_v34 }
 0xafa   : > { %v1538_v49 = vpop.permute.xlu1 %1537  ;;  %v1543_v50 = vpop.permute.xlu0 %1542 }
 0xafb   : > { %v1547_v58 = vmul.f32 %v1538_v49, %v4305_v13  ;;  %v1548_v9 = vmul.f32 %v1543_v50, %v4311_v39 }
 0xafe   : > { %v1566_v53 = vpop.permute.xlu1 %1565  ;;  %v1561_v55 = vpop.permute.xlu0 %1560 }
 0xaff   : > { %v1579_v56 = vadd.f32 %v1566_v53, %v1546_v51  ;;  %v1578_v57 = vadd.f32 %v1561_v55, %v1545_v52 }
 0xb01   : > { %v1583_v59 = vmul.f32 %v4101_v2, %v1579_v56  ;;  %v1582_v60 = vmul.f32 %v4101_v2, %v1578_v57 }
 0xb02   : > { %v1571_v61 = vpop.permute.xlu1 %1570  ;;  %v1576_v34 = vpop.permute.xlu0 %1575 }
 0xb03   : > { %v1580_v62 = vadd.f32 %v1571_v61, %v1547_v58  ;;  %1593 = vrot.lane.b32.xlu0 %v1583_v59, %s4974_s28  ;;  %1591 = vrot.lane.b32.xlu1 %v1582_v60, %s4974_s28  ;;  %v1581_v13 = vadd.f32 %v1576_v34, %v1548_v9 }
 0xb05   : > { %v1584_v37 = vmul.f32 %v4101_v2, %v1580_v62  ;;  %v1585_v14 = vmul.f32 %v4101_v2, %v1581_v13 }
 0xb06   : > { %v1602_v43 = vpop.permute.xlu1 %1601 }
 0xb07   : > { %1595 = vrot.lane.b32.xlu0 %v1584_v37, %s4974_s28  ;;  %1647 = vrot.lane.b32.xlu1 %v1582_v60, %s4972_s7  ;;  %v1657_v10 = vpop.permute.xlu0 %1656 }
 0xb0b   : > { %1649 = vrot.lane.b32.xlu0 %v1583_v59, %s4972_s7  ;;  %1651 = vrot.lane.b32.xlu1 %v1584_v37, %s4972_s7  ;;  %v1625_v63 = vpop.permute.xlu1 %1624 }
 0xb0c   : > { %v1629_v16 = vpop.permute.xlu0 %1628  ;;  %v1639_v24 = vmul.f32 %v1625_v63, %v1582_v60 }
 0xb0d   : > { %v1640_v32 = vmul.f32 %v1629_v16, %v1583_v59 }
 0xb0f   : > { %1597 = vrot.lane.b32.xlu0 %v1585_v14, %s4974_s28 }
 0xb10   : > { %v1612_v1 = vpop.permute.xlu1 %1611  ;;  %v1637_v18 = vpop.permute.xlu0 %1636 }
 0xb11   : > { %v1642_v57 = vmul.f32 %v1637_v18, %v1585_v14 }
 0xb13   : > { %1653 = vrot.lane.b32.xlu0 %v1585_v14, %s4972_s7  ;;  %s3359_s7 = sld [smem:[#allocation6 + $0x2]] }
 0xb15   : > { %v1633_v39 = vpop.permute.xlu1 %1632  ;;  %v1607_v46 = vpop.permute.xlu0 %1606 }
 0xb16   : > { %v1641_v33 = vmul.f32 %v1633_v39, %v1584_v37 }
 0xb19   : > { %v1687_v20 = vpop.permute.xlu0 %1686 }
 0xb1a   : > { %v1661_v4 = vpop.permute.xlu1 %1660 }
 0xb1f   : > { %v1617_v5 = vpop.permute.xlu1 %1616 }
 0xb24   : > { %v1665_v6 = vpop.permute.xlu1 %1664 }
 0xb28   : > { %v1669_v11 = vpop.permute.xlu1 %1668 }
 0xb2d   : > { %v1692_v17 = vpop.permute.xlu1 %1691 }
 0xb31   : > { %v1697_v19 = vpop.permute.xlu1 %1696 }
 0xb35   : > { %v1702_v47 = vpop.permute.xlu1 %1701 }
 0xb75   : > { %v1592_v21 = vpop.permute.xlu1 %1591  ;;  %v1594_v22 = vpop.permute.xlu0 %1593 }
 0xb76   : > { %v1619_v23 = vmul.f32 %v1602_v43, %v1592_v21  ;;  %v1620_v25 = vmul.f32 %v1607_v46, %v1594_v22 }
 0xb78   : > { %v1643_v29 = vadd.f32 %v1639_v24, %v1619_v23  ;;  %v1644_v36 = vadd.f32 %v1640_v32, %v1620_v25 }
 0xb79   : > { %v1648_v26 = vpop.permute.xlu1 %1647  ;;  %v1596_v28 = vpop.permute.xlu0 %1595 }
 0xb7a   : > { %v1671_v30 = vmul.f32 %v1657_v10, %v1648_v26  ;;  %v1621_v31 = vmul.f32 %v1612_v1, %v1596_v28 }
 0xb7c   : > { %v1675_v35 = vadd.f32 %v1671_v30, %v1643_v29  ;;  %v1645_v44 = vadd.f32 %v1641_v33, %v1621_v31 }
 0xb7d   : > { %v1652_v41 = vpop.permute.xlu1 %1651  ;;  %v1650_v42 = vpop.permute.xlu0 %1649 }
 0xb7e   : > { %v1704_v15 = vadd.f32 %v1687_v20, %v1675_v35  ;;  %v1673_v45 = vmul.f32 %v1665_v6, %v1652_v41  ;;  %v1672_v48 = vmul.f32 %v1661_v4, %v1650_v42  ;;  %v3311_v42 = vld [vmem:[%s4951_s13 + $0x28] sm:$0xff] }
 0xb80   : > { %v1714_v49 = vmul.f32 %v1713_v40, %v1704_v15  ;;  %v1677_v50 = vadd.f32 %v1673_v45, %v1645_v44  ;;  %v1676_v51 = vadd.f32 %v1672_v48, %v1644_v36  ;;  %vm1709_vm4 = vcmp.gt.f32.partialorder %v1704_v15, 0.0 }
 0xb81   : > { %v1598_v52 = vpop.permute.xlu0 %1597 }
 0xb82   : > { %v1706_v53 = vadd.f32 %v1697_v19, %v1677_v50  ;;  %v1705_v55 = vadd.f32 %v1692_v17, %v1676_v51  ;;  %v1622_v56 = vmul.f32 %v1617_v5, %v1598_v52  ;;  %v1718_v58 = vsel %vm1709_vm4, %v1704_v15, %v1714_v49  ;;  %v3310_v15 = vld [vmem:[%s4951_s13 + $0x20] sm:$0xff]  ;;  %v3312_v49 = vld [vmem:[%s4951_s13 + $0x30] sm:$0xff]  ;;  %v3313_v50 = vld [vmem:[%s4951_s13 + $0x38] sm:$0xff] }
 0xb83   : > { %v4401_v9 = vmul.f32 %v4101_v2, %v1718_v58  ;;  %v3314_v58 = vld [vmem:[%s4952_s14 + $0x20] sm:$0xff] }
 0xb84   : > { %v1716_v59 = vmul.f32 %v1713_v40, %v1706_v53  ;;  %vm1710_vm5 = vcmp.gt.f32.partialorder %v1705_v55, 0.0  ;;  %v1715_v60 = vmul.f32 %v1713_v40, %v1705_v55  ;;  %vm1711_vm6 = vcmp.gt.f32.partialorder %v1706_v53, 0.0 }
 0xb85   : > { %v1654_v61 = vpop.permute.xlu0 %1653  ;;  %v1646_v37 = vadd.f32 %v1642_v57, %v1622_v56  ;;  %v1751_v5 = vmul.f32 %v4401_v9, %v4401_v9  ;;  %v3315_v57 = vld [vmem:[%s4952_s14 + $0x28] sm:$0xff] }
 0xb86   : > { %v1719_v62 = vsel %vm1710_vm5, %v1705_v55, %v1715_v60  ;;  %v1674_v34 = vmul.f32 %v1669_v11, %v1654_v61  ;;  %v1720_v43 = vsel %vm1711_vm6, %v1706_v53, %v1716_v59 }
 0xb87   : > { %v4404_v13 = vmul.f32 %v4101_v2, %v1719_v62  ;;  %v4409_v39 = vmul.f32 %v4101_v2, %v1720_v43 }
 0xb88   : > { %v1678_v63 = vadd.f32 %v1674_v34, %v1646_v37  ;;  %v3317_v37 = vld [vmem:[%s4952_s14 + $0x38] sm:$0xff]  ;;  %v3316_v34 = vld [vmem:[%s4952_s14 + $0x30] sm:$0xff] }
 0xb89   : > { %v1752_v14 = vmul.f32 %v4404_v13, %v4404_v13  ;;  %v1736_v4 = vadd.f32 %v4404_v13, %v4401_v9  ;;  %v1753_v18 = vmul.f32 %v4409_v39, %v4409_v39 }
 0xb8a   : > { %v1707_v1 = vadd.f32 %v1702_v47, %v1678_v63 }
 0xb8b   : > { %v1755_v10 = vadd.f32 %v1752_v14, %v1751_v5  ;;  %v1737_v17 = vadd.f32 %v1736_v4, %v4409_v39  ;;  %v3323_v14 = vld [vmem:[%s4954_s16 + $0x28] sm:$0xff]  ;;  %v3334_v5 = vld [vmem:[%s4944_s6 + $0x40] sm:$0xff] }
 0xb8c   : > { %vm1712_vm7 = vcmp.gt.f32.partialorder %v1707_v1, 0.0  ;;  %v1717_v6 = vmul.f32 %v1713_v40, %v1707_v1  ;;  %v3335_v4 = vld [vmem:[%s4944_s6 + $0x48] sm:$0xff] }
 0xb8d   : > { %v1756_v20 = vadd.f32 %v1755_v10, %v1753_v18  ;;  %v3337_v10 = vld [vmem:[%s4944_s6 + $0x58] sm:$0xff] }
 0xb8e   : > { %v1721_v11 = vsel %vm1712_vm7, %v1707_v1, %v1717_v6  ;;  %v3322_v1 = vld [vmem:[%s4954_s16 + $0x20] sm:$0xff]  ;;  %v3708_v6 = vld [vmem:[%s4953_s15 + $0x10] sm:$0xff]  }
 0xb8f   : > { %v4416_v16 = vmul.f32 %v4101_v2, %v1721_v11  ;;  %3497 = vmatprep.mubr.msk.bf16.mxu0 %vm1297_vm13, %v3708_v6  ;;  %v3336_v11 = vld [vmem:[%s4944_s6 + $0x50] sm:$0xff] }
 0xb91   : > { %v1738_v46 = vadd.f32 %v1737_v17, %v4416_v16  ;;  %v1754_v19 = vmul.f32 %v4416_v16, %v4416_v16 }
 0xb93   : > { %1739 = vadd.xlane.f32.xlu1 %v1738_v46  ;;  %v1757_v47 = vadd.f32 %v1756_v20, %v1754_v19 }
 0xb95   : > { %1758 = vadd.xlane.f32.xlu0 %v1757_v47 }
 0xc20   : > { %v1740_v21 = vpop.xlane.xlu1 %1739 }
 0xc21   : > { %v1741_v22 = vrot.slane %v1740_v21, 4 }
 0xc22   : > { %v1759_v23 = vpop.xlane.xlu0 %1758 }
 0xc23   : > { %v1742_v24 = vadd.f32 %v1741_v22, %v1740_v21  ;;  %v1760_v25 = vrot.slane %v1759_v23, 4 }
 0xc25   : > { %v1761_v26 = vadd.f32 %v1760_v25, %v1759_v23  ;;  %v1743_v28 = vrot.slane %v1742_v24, 2 }
 0xc27   : > { %v1744_v29 = vadd.f32 %v1743_v28, %v1742_v24  ;;  %v1762_v30 = vrot.slane %v1761_v26, 2 }
 0xc29   : > { %v1745_v31 = vrot.slane %v1744_v29, 1  ;;  %v1763_v32 = vadd.f32 %v1762_v30, %v1761_v26 }
 0xc2b   : > { %v1746_v33 = vadd.f32 %v1745_v31, %v1744_v29  ;;  %v1764_v35 = vrot.slane %v1763_v32, 1 }
 0xc2d   : > { %3559 = vpush %v1746_v33  ;;  %v1765_v36 = vadd.f32 %v1764_v35, %v1763_v32 }
 0xc2f   : > { %3561 = vpush %v1765_v36 }
 0xc5e   : > { %s3560_s2 = spop %3559 }
 0xc5f   : > { %s1750_s3 = smul.f32 0.00048828125, %s3560_s2 }
 0xc60   : > { %s3562_s23 = spop %3561 }
 0xc61   : > { %s1770_s4 = smul.f32 %s1750_s3, %s1750_s3  ;;  %v1806_v51 = vstv %s1750_s3 }
 0xc62   : > { %s1769_s30 = smul.f32 0.00048828125, %s3562_s23 }
 0xc64   : > { %s1771_s26 = ssub.f32 %s1769_s30, %s1770_s4 }
 0xc66   : > { %s1772_s1 = smax.f32 %s3841_s22, %s1771_s26 }
 0xc67   : > { %s1773_s27 = sadd.f32 1e-08, %s1772_s1 }
 0xc69   : > { %v1774_v40 = vstv %s1773_s27 }
 0xc6a   : > { %3726 = vrsqrt.f32 %v1774_v40 }
 0xc74   : > { %v3727_v41 = vpop.eup %3726 }
 0xc75   : > { %3563 = vpush %v3727_v41 }
 0xca6   : > { %s3564_s2 = spop %3563 }
 0xca7   : > { %v1777_v44 = vstv %s3564_s2 }
 0xca8   : > { %v1779_v45 = vmul.f32 %v3311_v42, %v1777_v44  ;;  %v1778_v48 = vmul.f32 %v3310_v15, %v1777_v44  ;;  %v1780_v52 = vmul.f32 %v3312_v49, %v1777_v44  ;;  %v1781_v55 = vmul.f32 %v3313_v50, %v1777_v44  ;;  %v3711_v49 = vld [vmem:[%s4943_s5 + $0x28] sm:$0xff]  }
 0xcaa   : > { %1789 = vperm.xlu1 %3680, %v1779_v45   ;;  %1784 = vperm.xlu0 %3678, %v1778_v48   ;;  %v1807_v53 = vmul.f32 %v1806_v51, %v1778_v48  ;;  %v1808_v56 = vmul.f32 %v1806_v51, %v1779_v45  ;;  %v1809_v59 = vmul.f32 %v1806_v51, %v1780_v52 }
 0xcab   : > { %v1810_v62 = vmul.f32 %v1806_v51, %v1781_v55 }
 0xcac   : > { %v1812_v60 = vsub.f32 %v3315_v57, %v1808_v56  ;;  %v1811_v61 = vsub.f32 %v3314_v58, %v1807_v53  ;;  %v1813_v63 = vsub.f32 %v3316_v34, %v1809_v59  ;;  %v2041_v53 = vstv %s3342_s21 }
 0xcad   : > { %v1814_v43 = vsub.f32 %v3317_v37, %v1810_v62 }
 0xcae   : > { %1794 = vperm.xlu1 %3680, %v1780_v52   ;;  %1799 = vperm.xlu0 %3678, %v1781_v55  }
 0xcb2   : > { %1822 = vperm.xlu0 %3678, %v1812_v60   ;;  %1817 = vperm.xlu1 %3680, %v1811_v61  }
 0xcb6   : > { %1832 = vperm.xlu0 %3678, %v1814_v43   ;;  %1827 = vperm.xlu1 %3680, %v1813_v63  }
 0xcba   : > { %1858 = vperm.xlu0 %3678, %v3323_v14   ;;  %1853 = vperm.xlu1 %3680, %v3322_v1  }
 0xcbe   : > { %1958 = vperm.xlu0 %3678, %v3335_v4   ;;  %1953 = vperm.xlu1 %3680, %v3334_v5  }
 0xcc2   : > { %1968 = vperm.xlu0 %3678, %v3337_v10   ;;  %1963 = vperm.xlu1 %3680, %v3336_v11  }
 0xd29   : > { %v1790_v17 = vpop.permute.xlu1 %1789  ;;  %v1785_v18 = vpop.permute.xlu0 %1784 }
 0xd2a   : > { %v1803_v20 = vmul.f32 %v1790_v17, %v4404_v13  ;;  %v1802_v47 = vmul.f32 %v1785_v18, %v4401_v9  ;;  %v3709_v9 = vld [vmem:[%s4953_s15 + $0x18] sm:$0xff]   ;;  %v3710_v13 = vld [vmem:[%s4943_s5 + $0x20] sm:$0xff]  }
 0xd2b   : > { %3503 = vmatprep.mubr.msk.bf16.mxu1 %vm819_vm3, %v3710_v13 }
 0xd2d   : > { %v1795_v46 = vpop.permute.xlu1 %1794  ;;  %v1800_v19 = vpop.permute.xlu0 %1799 }
 0xd2e   : > { %v1804_v25 = vmul.f32 %v1795_v46, %v4409_v39  ;;  %v1805_v26 = vmul.f32 %v1800_v19, %v4416_v16 }
 0xd31   : > { %v1823_v21 = vpop.permute.xlu0 %1822  ;;  %v1818_v22 = vpop.permute.xlu1 %1817 }
 0xd32   : > { %v1836_v23 = vadd.f32 %v1823_v21, %v1803_v20  ;;  %v1835_v24 = vadd.f32 %v1818_v22, %v1802_v47 }
 0xd34   : > { %v1844_v28 = vpack.c.bf16 %v1836_v23, %v1835_v24 }
 0xd35   : > { %v1833_v29 = vpop.permute.xlu0 %1832  ;;  %v1828_v30 = vpop.permute.xlu1 %1827 }
 0xd36   : > { %v1838_v31 = vadd.f32 %v1833_v29, %v1805_v26  ;;  %v1837_v32 = vadd.f32 %v1828_v30, %v1804_v25  ;;  %3493 = vmatprep.subr.bf16.mxu0 %v1844_v28 }
 0xd37   : > { %3494 = vmatpush3.bf16.msra.mxu0 %v1844_v28 }
 0xd38   : > { %v1845_v33 = vpack.c.bf16 %v1838_v31, %v1837_v32 }
 0xd39   : > { %v1854_v16 = vpop.permute.xlu1 %1853  ;;  %v1859_v41 = vpop.permute.xlu0 %1858 }
 0xd3a   : > { %3495 = vmatprep.subr.bf16.mxu0 %v1845_v33 }
 0xd3b   : > { %3496 = vmatpush3.bf16.msra.mxu0 %v1845_v33 }
 0xd3d   : > { %v1954_v50 = vpop.permute.xlu1 %1953  ;;  %v1959_v51 = vpop.permute.xlu0 %1958 }
 0xd3e   : > { %3498 = vmatmul.mubr.msk.bf16.vlgmr.msra.gmra.mrb[8].mxu0 %vm1297_vm13, %v3709_v9 }
 0xd41   : > { %v1964_v52 = vpop.permute.xlu1 %1963  ;;  %v1969_v56 = vpop.permute.xlu0 %1968 }
 0xe11   : > { %v4483_v39 = vpop.f32.mrb[8].mxu0 }
 0xe12   : > { %v1921_v35 = vpop.f32.mrb[9].mxu0 }
 0xe13   : > { %v1922_v36 = vadd.f32 %v1921_v35, %v1854_v16  ;;  %v4485_v40 = vpop.f32.mrb[10].mxu0 }
 0xe14   : > { %v1924_v42 = vpop.f32.mrb[11].mxu0 }
 0xe15   : > { %v1925_v15 = vadd.f32 %v1924_v42, %v1859_v41  ;;  %v4488_v44 = vadd.f32 %v1922_v36, %v4290_v7 }
 0xe17   : > { %v4491_v45 = vadd.f32 %v1925_v15, %v4293_v8 }
 0xe19   : > { %v1945_v48 = vpack.c.bf16 %v4491_v45, %v4488_v44 }
 0xe1b   : > { %3501 = vmatprep.subr.bf16.mxu1 %v1945_v48 }
 0xe1c   : > { %3502 = vmatpush3.bf16.msra.mxu1 %v1945_v48  ;;  %v3344_v48 = vld [vmem:[%s4946_s8 + $0x48] sm:$0xff] }
 0xe1f   : > { %3504 = vmatmul.mubr.msk.bf16.vlgmr.msra.gmra.mrb[8].mxu1 %vm819_vm3, %v3711_v49  ;;  %v3343_v49 = vld [vmem:[%s4946_s8 + $0x40] sm:$0xff] }
 0xef2   : > { %v3505_v7 = vpop.f32.mrb[8].mxu1 }
 0xef3   : > { %v2030_v55 = vadd.f32 %v3505_v7, %v1964_v52  ;;  %v2021_v8 = vpop.f32.mrb[9].mxu1  ;;  %v3345_v7 = vld [vmem:[%s4946_s8 + $0x50] sm:$0xff] }
 0xef4   : > { %v2022_v57 = vadd.f32 %v2021_v8, %v1954_v50  ;;  %v3506_v58 = vpop.f32.mrb[10].mxu1 }
 0xef5   : > { %vm2039_vm8 = vcmp.gt.f32.partialorder %v2030_v55, 0.0  ;;  %v2044_v59 = vmul.f32 %v2041_v53, %v2030_v55  ;;  %v2033_v60 = vadd.f32 %v3506_v58, %v1969_v56  ;;  %v2024_v61 = vpop.f32.mrb[11].mxu1 }
 0xef6   : > { %vm2037_vm9 = vcmp.gt.f32.partialorder %v2022_v57, 0.0  ;;  %v2042_v62 = vmul.f32 %v2041_v53, %v2022_v57  ;;  %v2025_v37 = vadd.f32 %v2024_v61, %v1959_v51 }
 0xef7   : > { %vm2040_vm10 = vcmp.gt.f32.partialorder %v2033_v60, 0.0  ;;  %v2045_v34 = vmul.f32 %v2041_v53, %v2033_v60  ;;  %v2048_v43 = vsel %vm2039_vm8, %v2030_v55, %v2044_v59  ;;  %v3348_v59 = vld [vmem:[%s4947_s9 + $0x48] sm:$0xff] }
 0xef8   : > { %v2046_v63 = vsel %vm2037_vm9, %v2022_v57, %v2042_v62  ;;  %vm2038_vm11 = vcmp.gt.f32.partialorder %v2025_v37, 0.0  ;;  %v2043_v14 = vmul.f32 %v2041_v53, %v2025_v37  ;;  %v4503_v6 = vmul.f32 %v4101_v2, %v2048_v43  ;;  %v3346_v53 = vld [vmem:[%s4946_s8 + $0x58] sm:$0xff]  ;;  %v3349_v43 = vld [vmem:[%s4947_s9 + $0x50] sm:$0xff] }
 0xef9   : > { %v4500_v1 = vmul.f32 %v4101_v2, %v2046_v63  ;;  %v2049_v4 = vsel %vm2040_vm10, %v2033_v60, %v2045_v34  ;;  %v3347_v60 = vld [vmem:[%s4947_s9 + $0x40] sm:$0xff]  ;;  %v3350_v63 = vld [vmem:[%s4947_s9 + $0x58] sm:$0xff] }
 0xefa   : > { %v2047_v5 = vsel %vm2038_vm11, %v2025_v37, %v2043_v14  ;;  %v4509_v11 = vmul.f32 %v4101_v2, %v2049_v4  ;;  %v2081_v20 = vmul.f32 %v4503_v6, %v4503_v6 }
 0xefb   : > { %v4506_v10 = vmul.f32 %v4101_v2, %v2047_v5  ;;  %v2079_v18 = vmul.f32 %v4500_v1, %v4500_v1  ;;  %v3351_v5 = vld [vmem:[%s4948_s10 + $0x40] sm:$0xff] }
 0xefc   : > { %v2082_v22 = vmul.f32 %v4509_v11, %v4509_v11 }
 0xefd   : > { %v2064_v17 = vadd.f32 %v4506_v10, %v4500_v1  ;;  %v2080_v46 = vmul.f32 %v4506_v10, %v4506_v10 }
 0xeff   : > { %v2065_v19 = vadd.f32 %v2064_v17, %v4503_v6  ;;  %v2083_v47 = vadd.f32 %v2080_v46, %v2079_v18  ;;  %v3352_v17 = vld [vmem:[%s4948_s10 + $0x48] sm:$0xff]  ;;  %v3353_v18 = vld [vmem:[%s4948_s10 + $0x50] sm:$0xff]  ;;  %v3354_v46 = vld [vmem:[%s4948_s10 + $0x58] sm:$0xff] }
 0xf01   : > { %v2066_v21 = vadd.f32 %v2065_v19, %v4509_v11  ;;  %v2084_v23 = vadd.f32 %v2083_v47, %v2081_v20  ;;  %v3355_v19 = vld [vmem:[%s4949_s11 + $0x40] sm:$0xff]  ;;  %v3356_v20 = vld [vmem:[%s4949_s11 + $0x48] sm:$0xff]  ;;  %v3357_v47 = vld [vmem:[%s4949_s11 + $0x50] sm:$0xff] }
 0xf03   : > { %2067 = vadd.xlane.f32.xlu1 %v2066_v21  ;;  %v2085_v24 = vadd.f32 %v2084_v23, %v2082_v22  ;;  %v3358_v21 = vld [vmem:[%s4949_s11 + $0x58] sm:$0xff] }
 0xf05   : > { %2086 = vadd.xlane.f32.xlu0 %v2085_v24 }
 0xf90   : > { %v2068_v25 = vpop.xlane.xlu1 %2067 }
 0xf91   : > { %v2069_v26 = vrot.slane %v2068_v25, 4 }
 0xf92   : > { %v2087_v28 = vpop.xlane.xlu0 %2086 }
 0xf93   : > { %v2070_v29 = vadd.f32 %v2069_v26, %v2068_v25  ;;  %v2088_v30 = vrot.slane %v2087_v28, 4 }
 0xf95   : > { %v2089_v31 = vadd.f32 %v2088_v30, %v2087_v28  ;;  %v2071_v32 = vrot.slane %v2070_v29, 2 }
 0xf97   : > { %v2090_v33 = vrot.slane %v2089_v31, 2  ;;  %v2072_v9 = vadd.f32 %v2071_v32, %v2070_v29 }
 0xf99   : > { %v2073_v13 = vrot.slane %v2072_v9, 1  ;;  %v2091_v16 = vadd.f32 %v2090_v33, %v2089_v31 }
 0xf9b   : > { %v2074_v35 = vadd.f32 %v2073_v13, %v2072_v9  ;;  %v2092_v36 = vrot.slane %v2091_v16, 1 }
 0xf9d   : > { %3565 = vpush %v2074_v35  ;;  %v2093_v41 = vadd.f32 %v2092_v36, %v2091_v16 }
 0xf9f   : > { %3567 = vpush %v2093_v41 }
 0xfce   : > { %s3566_s3 = spop %3565 }
 0xfcf   : > { %s2078_s12 = smul.f32 0.00048828125, %s3566_s3 }
 0xfd0   : > { %s3568_s2 = spop %3567 }
 0xfd1   : > { %s2098_s23 = smul.f32 %s2078_s12, %s2078_s12  ;;  %v2134_v55 = vstv %s2078_s12 }
 0xfd2   : > { %s2097_s4 = smul.f32 0.00048828125, %s3568_s2 }
 0xfd4   : > { %s2099_s30 = ssub.f32 %s2097_s4, %s2098_s23 }
 0xfd6   : > { %s2100_s26 = smax.f32 %s3841_s22, %s2099_s30 }
 0xfd7   : > { %s2101_s28 = sadd.f32 1e-08, %s2100_s26  ;;  %s5004_s26 = smov 1  }
 0xfd9   : > { %v2102_v42 = vstv %s2101_s28  ;;  %s5005_s28 = smov 127  }
 0xfda   : > { %3728 = vrsqrt.f32 %v2102_v42 }
 0xfe4   : > { %v3729_v15 = vpop.eup %3728 }
 0xfe5   : > { %3569 = vpush %v3729_v15 }
0x1016   : > { %s3570_s3 = spop %3569 }
0x1017   : > { %v2105_v50 = vstv %s3570_s3 }
0x1018   : > { %v2107_v51 = vmul.f32 %v3344_v48, %v2105_v50  ;;  %v2106_v52 = vmul.f32 %v3343_v49, %v2105_v50  ;;  %v2108_v8 = vmul.f32 %v3345_v7, %v2105_v50  ;;  %v2109_v56 = vmul.f32 %v3346_v53, %v2105_v50 }
0x101a   : > { %2117 = vperm.xlu1 %3680, %v2107_v51   ;;  %2112 = vperm.xlu0 %3678, %v2106_v52   ;;  %v2136_v57 = vmul.f32 %v2134_v55, %v2107_v51  ;;  %v2135_v58 = vmul.f32 %v2134_v55, %v2106_v52  ;;  %v2137_v61 = vmul.f32 %v2134_v55, %v2108_v8 }
0x101b   : > { %v2138_v62 = vmul.f32 %v2134_v55, %v2109_v56 }
0x101c   : > { %v2140_v37 = vsub.f32 %v3348_v59, %v2136_v57  ;;  %v2139_v34 = vsub.f32 %v3347_v60, %v2135_v58  ;;  %v2141_v14 = vsub.f32 %v3349_v43, %v2137_v61 }
0x101d   : > { %v2142_v4 = vsub.f32 %v3350_v63, %v2138_v62 }
0x101e   : > { %2122 = vperm.xlu1 %3680, %v2108_v8   ;;  %2127 = vperm.xlu0 %3678, %v2109_v56  }
0x1022   : > { %2150 = vperm.xlu1 %3680, %v2140_v37   ;;  %2145 = vperm.xlu0 %3678, %v2139_v34  }
0x1026   : > { %2155 = vperm.xlu1 %3680, %v2141_v14   ;;  %2160 = vperm.xlu0 %3678, %v2142_v4  }
0x102a   : > { %2186 = vperm.xlu1 %3680, %v3351_v5   ;;  %3684 = vset.pattern.permute.xlu0 %v3845_v0 }
0x102b   : > { %2241 = vperm.xlu0 %3684, %v3351_v5  }
0x102e   : > { %3681 = vset.pattern.permute.xlu1 %v3844_v54 }
0x102f   : > { %2209 = vperm.xlu1 %3681, %v3351_v5   ;;  %3685 = vset.pattern.permute.xlu0 %v3844_v54 }
0x1030   : > { %2213 = vperm.xlu0 %3685, %v3352_v17  }
0x1033   : > { %3682 = vset.pattern.permute.xlu1 %v3840_v12 }
0x1034   : > { %2196 = vperm.xlu1 %3682, %v3353_v18   ;;  %2221 = vperm.xlu0 %3685, %v3354_v46  }
0x1038   : > { %3683 = vset.pattern.permute.xlu1 %v3844_v54  ;;  %3688 = vset.pattern.permute.xlu0 %v3840_v12 }
0x1039   : > { %2217 = vperm.xlu1 %3683, %v3353_v18   ;;  %2191 = vperm.xlu0 %3688, %v3352_v17  }
0x103d   : > { %3686 = vset.pattern.permute.xlu1 %v3845_v0  ;;  %2271 = vperm.xlu0 %3688, %v3355_v19  }
0x103e   : > { %2245 = vperm.xlu1 %3686, %v3352_v17  }
0x1042   : > { %3687 = vset.pattern.permute.xlu1 %v3840_v12 }
0x1043   : > { %2201 = vperm.xlu1 %3687, %v3354_v46  }
0x1047   : > { %3689 = vset.pattern.permute.xlu1 %v3845_v0 }
0x1048   : > { %2249 = vperm.xlu1 %3689, %v3353_v18  }
0x104c   : > { %2253 = vperm.xlu1 %3689, %v3354_v46  }
0x1050   : > { %3690 = vset.pattern.permute.xlu1 %v3840_v12 }
0x1051   : > { %2276 = vperm.xlu1 %3690, %v3356_v20   ;;  %v2298_v20 = vstv %s3359_s7 }
0x1055   : > { %2281 = vperm.xlu1 %3690, %v3357_v47  }
0x1059   : > { %2286 = vperm.xlu1 %3690, %v3358_v21  }
0x1099   : > { %v2118_v22 = vpop.permute.xlu1 %2117  ;;  %v2113_v23 = vpop.permute.xlu0 %2112 }
0x109a   : > { %v2131_v26 = vmul.f32 %v2118_v22, %v4506_v10  ;;  %v2130_v28 = vmul.f32 %v2113_v23, %v4500_v1 }
0x109d   : > { %v2123_v24 = vpop.permute.xlu1 %2122  ;;  %v2128_v25 = vpop.permute.xlu0 %2127 }
0x109e   : > { %v2132_v33 = vmul.f32 %v2123_v24, %v4503_v6  ;;  %v2133_v1 = vmul.f32 %v2128_v25, %v4509_v11 }
0x10a1   : > { %v2151_v29 = vpop.permute.xlu1 %2150  ;;  %v2146_v30 = vpop.permute.xlu0 %2145 }
0x10a2   : > { %v2164_v31 = vadd.f32 %v2151_v29, %v2131_v26  ;;  %v2163_v32 = vadd.f32 %v2146_v30, %v2130_v28 }
0x10a4   : > { %v2168_v9 = vmul.f32 %v4101_v2, %v2164_v31  ;;  %v2167_v13 = vmul.f32 %v4101_v2, %v2163_v32 }
0x10a5   : > { %v2156_v16 = vpop.permute.xlu1 %2155  ;;  %v2161_v36 = vpop.permute.xlu0 %2160 }
0x10a6   : > { %v2165_v35 = vadd.f32 %v2156_v16, %v2132_v33  ;;  %2178 = vrot.lane.b32.xlu0 %v2168_v9, %s5004_s26  ;;  %2176 = vrot.lane.b32.xlu1 %v2167_v13, %s5004_s26  ;;  %v2166_v6 = vadd.f32 %v2161_v36, %v2133_v1 }
0x10a8   : > { %v2169_v10 = vmul.f32 %v4101_v2, %v2165_v35  ;;  %v2170_v41 = vmul.f32 %v4101_v2, %v2166_v6 }
0x10a9   : > { %v2187_v42 = vpop.permute.xlu1 %2186 }
0x10aa   : > { %2180 = vrot.lane.b32.xlu0 %v2169_v10, %s5004_s26  ;;  %2232 = vrot.lane.b32.xlu1 %v2167_v13, %s5005_s28  ;;  %v2242_v52 = vpop.permute.xlu0 %2241 }
0x10ae   : > { %2234 = vrot.lane.b32.xlu0 %v2168_v9, %s5005_s28  ;;  %2236 = vrot.lane.b32.xlu1 %v2169_v10, %s5005_s28  ;;  %v2210_v15 = vpop.permute.xlu1 %2209 }
0x10af   : > { %v2214_v53 = vpop.permute.xlu0 %2213  ;;  %v2224_v37 = vmul.f32 %v2210_v15, %v2167_v13 }
0x10b0   : > { %v2225_v17 = vmul.f32 %v2214_v53, %v2168_v9 }
0x10b2   : > { %2182 = vrot.lane.b32.xlu0 %v2170_v41, %s5004_s26 }
0x10b3   : > { %v2197_v48 = vpop.permute.xlu1 %2196  ;;  %v2222_v8 = vpop.permute.xlu0 %2221 }
0x10b4   : > { %v2227_v13 = vmul.f32 %v2222_v8, %v2170_v41 }
0x10b6   : > { %2238 = vrot.lane.b32.xlu0 %v2170_v41, %s5005_s28 }
0x10b8   : > { %v2218_v49 = vpop.permute.xlu1 %2217  ;;  %v2192_v56 = vpop.permute.xlu0 %2191 }
0x10b9   : > { %v2226_v18 = vmul.f32 %v2218_v49, %v2169_v10 }
0x10bc   : > { %v2272_v58 = vpop.permute.xlu0 %2271 }
0x10bd   : > { %v2246_v11 = vpop.permute.xlu1 %2245 }
0x10c2   : > { %v2202_v50 = vpop.permute.xlu1 %2201 }
0x10c7   : > { %v2250_v51 = vpop.permute.xlu1 %2249 }
0x10cb   : > { %v2254_v7 = vpop.permute.xlu1 %2253 }
0x10d0   : > { %v2277_v55 = vpop.permute.xlu1 %2276 }
0x10d4   : > { %v2282_v57 = vpop.permute.xlu1 %2281 }
0x10d8   : > { %v2287_v59 = vpop.permute.xlu1 %2286 }
0x1118   : > { %v2177_v60 = vpop.permute.xlu1 %2176  ;;  %v2179_v61 = vpop.permute.xlu0 %2178 }
0x1119   : > { %v2204_v62 = vmul.f32 %v2187_v42, %v2177_v60  ;;  %v2205_v34 = vmul.f32 %v2192_v56, %v2179_v61 }
0x111b   : > { %v2228_v14 = vadd.f32 %v2224_v37, %v2204_v62  ;;  %v2229_v19 = vadd.f32 %v2225_v17, %v2205_v34 }
0x111c   : > { %v2233_v43 = vpop.permute.xlu1 %2232  ;;  %v2181_v63 = vpop.permute.xlu0 %2180 }
0x111d   : > { %v2256_v4 = vmul.f32 %v2242_v52, %v2233_v43  ;;  %v2206_v5 = vmul.f32 %v2197_v48, %v2181_v63 }
0x111f   : > { %v2260_v46 = vadd.f32 %v2256_v4, %v2228_v14  ;;  %v2230_v23 = vadd.f32 %v2226_v18, %v2206_v5 }
0x1120   : > { %v2237_v47 = vpop.permute.xlu1 %2236  ;;  %v2235_v21 = vpop.permute.xlu0 %2234 }
0x1121   : > { %v2289_v22 = vadd.f32 %v2272_v58, %v2260_v46  ;;  %v2258_v24 = vmul.f32 %v2250_v51, %v2237_v47  ;;  %v2257_v25 = vmul.f32 %v2246_v11, %v2235_v21 }
0x1123   : > { %v2299_v26 = vmul.f32 %v2298_v20, %v2289_v22  ;;  %v2262_v28 = vadd.f32 %v2258_v24, %v2230_v23  ;;  %v2261_v29 = vadd.f32 %v2257_v25, %v2229_v19  ;;  %vm2294_vm12 = vcmp.gt.f32.partialorder %v2289_v22, 0.0  ;;  %v3360_v23 = vld [vmem:[%s4951_s13 + $0x40] sm:$0xff]  ;;  %v3361_v24 = vld [vmem:[%s4951_s13 + $0x48] sm:$0xff] }
0x1124   : > { %v2183_v30 = vpop.permute.xlu0 %2182 }
0x1125   : > { %v2291_v31 = vadd.f32 %v2282_v57, %v2262_v28  ;;  %v2290_v32 = vadd.f32 %v2277_v55, %v2261_v29  ;;  %v2207_v33 = vmul.f32 %v2202_v50, %v2183_v30  ;;  %v2303_v9 = vsel %vm2294_vm12, %v2289_v22, %v2299_v26  ;;  %v3362_v29 = vld [vmem:[%s4951_s13 + $0x50] sm:$0xff]  ;;  %v3363_v30 = vld [vmem:[%s4951_s13 + $0x58] sm:$0xff] }
0x1126   : > { %v4599_v42 = vmul.f32 %v4101_v2, %v2303_v9 }
0x1127   : > { %v2301_v16 = vmul.f32 %v2298_v20, %v2291_v31  ;;  %vm2295_vm14 = vcmp.gt.f32.partialorder %v2290_v32, 0.0  ;;  %v2300_v35 = vmul.f32 %v2298_v20, %v2290_v32  ;;  %vm2296_vm15 = vcmp.gt.f32.partialorder %v2291_v31, 0.0 }
0x1128   : > { %v2239_v10 = vpop.permute.xlu0 %2238  ;;  %v2231_v1 = vadd.f32 %v2227_v13, %v2207_v33  ;;  %v2336_v52 = vmul.f32 %v4599_v42, %v4599_v42 }
0x1129   : > { %v2304_v36 = vsel %vm2295_vm14, %v2290_v32, %v2300_v35  ;;  %v2259_v6 = vmul.f32 %v2254_v7, %v2239_v10  ;;  %v2305_v48 = vsel %vm2296_vm15, %v2291_v31, %v2301_v16  ;;  %v3364_v16 = vld [vmem:[%s4952_s14 + $0x40] sm:$0xff]  ;;  %v3365_v35 = vld [vmem:[%s4952_s14 + $0x48] sm:$0xff] }
0x112a   : > { %v4602_v15 = vmul.f32 %v4101_v2, %v2304_v36  ;;  %v4607_v50 = vmul.f32 %v4101_v2, %v2305_v48  ;;  %v3366_v48 = vld [vmem:[%s4952_s14 + $0x50] sm:$0xff] }
0x112b   : > { %v2263_v49 = vadd.f32 %v2259_v6, %v2231_v1 }
0x112c   : > { %v2337_v41 = vmul.f32 %v4602_v15, %v4602_v15  ;;  %v2321_v51 = vadd.f32 %v4602_v15, %v4599_v42  ;;  %v2338_v57 = vmul.f32 %v4607_v50, %v4607_v50 }
0x112d   : > { %v2292_v11 = vadd.f32 %v2287_v59, %v2263_v49  ;;  %v3367_v49 = vld [vmem:[%s4952_s14 + $0x58] sm:$0xff] }
0x112e   : > { %v2340_v53 = vadd.f32 %v2337_v41, %v2336_v52  ;;  %v2322_v56 = vadd.f32 %v2321_v51, %v4607_v50  ;;  %v3372_v51 = vld [vmem:[%s4954_s16 + $0x40] sm:$0xff]  ;;  %v3373_v52 = vld [vmem:[%s4954_s16 + $0x48] sm:$0xff] }
0x112f   : > { %vm2297_vm1 = vcmp.gt.f32.partialorder %v2292_v11, 0.0  ;;  %v2302_v7 = vmul.f32 %v2298_v20, %v2292_v11 }
0x1130   : > { %v2341_v60 = vadd.f32 %v2340_v53, %v2338_v57  ;;  %v3385_v53 = vld [vmem:[%s4944_s6 + $0x68] sm:$0xff]  ;;  %v3387_v57 = vld [vmem:[%s4944_s6 + $0x78] sm:$0xff] }
0x1131   : > { %v2306_v55 = vsel %vm2297_vm1, %v2292_v11, %v2302_v7  ;;  %v3384_v7 = vld [vmem:[%s4944_s6 + $0x60] sm:$0xff] }
0x1132   : > { %v4614_v8 = vmul.f32 %v4101_v2, %v2306_v55  ;;  %v3712_v55 = vld [vmem:[%s4953_s15 + $0x20] sm:$0xff]  }
0x1133   : > { %3511 = vmatprep.mubr.msk.bf16.mxu0 %vm1297_vm13, %v3712_v55 }
0x1134   : > { %v2323_v58 = vadd.f32 %v2322_v56, %v4614_v8  ;;  %v2339_v59 = vmul.f32 %v4614_v8, %v4614_v8  ;;  %v3386_v56 = vld [vmem:[%s4944_s6 + $0x70] sm:$0xff] }
0x1136   : > { %2324 = vadd.xlane.f32.xlu1 %v2323_v58  ;;  %v2342_v61 = vadd.f32 %v2341_v60, %v2339_v59 }
0x1138   : > { %2343 = vadd.xlane.f32.xlu0 %v2342_v61 }
0x11c3   : > { %v2325_v62 = vpop.xlane.xlu1 %2324 }
0x11c4   : > { %v2326_v37 = vrot.slane %v2325_v62, 4 }
0x11c5   : > { %v2344_v34 = vpop.xlane.xlu0 %2343 }
0x11c6   : > { %v2327_v43 = vadd.f32 %v2326_v37, %v2325_v62  ;;  %v2345_v63 = vrot.slane %v2344_v34, 4 }
0x11c8   : > { %v2328_v14 = vrot.slane %v2327_v43, 2  ;;  %v2346_v4 = vadd.f32 %v2345_v63, %v2344_v34 }
0x11ca   : > { %v2347_v5 = vrot.slane %v2346_v4, 2  ;;  %v2329_v17 = vadd.f32 %v2328_v14, %v2327_v43 }
0x11cc   : > { %v2330_v18 = vrot.slane %v2329_v17, 1  ;;  %v2348_v46 = vadd.f32 %v2347_v5, %v2346_v4 }
0x11ce   : > { %v2331_v19 = vadd.f32 %v2330_v18, %v2329_v17  ;;  %v2349_v20 = vrot.slane %v2348_v46, 1 }
0x11d0   : > { %3571 = vpush %v2331_v19  ;;  %v2350_v47 = vadd.f32 %v2349_v20, %v2348_v46 }
0x11d2   : > { %3573 = vpush %v2350_v47 }
0x1201   : > { %s3572_s1 = spop %3571 }
0x1202   : > { %s2335_s27 = smul.f32 0.00048828125, %s3572_s1 }
0x1203   : > { %s3574_s12 = spop %3573 }
0x1204   : > { %s2355_s21 = smul.f32 %s2335_s27, %s2335_s27  ;;  %v2391_v31 = vstv %s2335_s27  ;;  %s3392_s27 = sld [smem:[#allocation3 + $0x3]] }
0x1205   : > { %s2354_s3 = smul.f32 0.00048828125, %s3574_s12 }
0x1207   : > { %s2356_s2 = ssub.f32 %s2354_s3, %s2355_s21 }
0x1209   : > { %s2357_s23 = smax.f32 %s3841_s22, %s2356_s2 }
0x120a   : > { %s2358_s4 = sadd.f32 1e-08, %s2357_s23 }
0x120c   : > { %v2359_v21 = vstv %s2358_s4  ;;  %s3409_s4 = sld [smem:[#allocation6 + $0x3]] }
0x120d   : > { %3730 = vrsqrt.f32 %v2359_v21 }
0x1217   : > { %v3731_v22 = vpop.eup %3730 }
0x1218   : > { %3575 = vpush %v3731_v22 }
0x1249   : > { %s3576_s1 = spop %3575 }
0x124a   : > { %v2362_v25 = vstv %s3576_s1 }
0x124b   : > { %v2363_v26 = vmul.f32 %v3360_v23, %v2362_v25  ;;  %v2364_v28 = vmul.f32 %v3361_v24, %v2362_v25  ;;  %v2365_v32 = vmul.f32 %v3362_v29, %v2362_v25  ;;  %v2366_v13 = vmul.f32 %v3363_v30, %v2362_v25 }
0x124d   : > { %2374 = vperm.xlu1 %3690, %v2364_v28   ;;  %2369 = vperm.xlu0 %3688, %v2363_v26   ;;  %v2392_v33 = vmul.f32 %v2391_v31, %v2363_v26  ;;  %v2393_v9 = vmul.f32 %v2391_v31, %v2364_v28  ;;  %v2394_v10 = vmul.f32 %v2391_v31, %v2365_v32 }
0x124e   : > { %v2395_v1 = vmul.f32 %v2391_v31, %v2366_v13  ;;  %v3715_v31 = vld [vmem:[%s4943_s5 + $0x38] sm:$0xff]  }
0x124f   : > { %v2396_v36 = vsub.f32 %v3364_v16, %v2392_v33  ;;  %v2397_v6 = vsub.f32 %v3365_v35, %v2393_v9  ;;  %v2398_v41 = vsub.f32 %v3366_v48, %v2394_v10 }
0x1250   : > { %v2399_v11 = vsub.f32 %v3367_v49, %v2395_v1 }
0x1251   : > { %2379 = vperm.xlu1 %3690, %v2365_v32   ;;  %2384 = vperm.xlu0 %3688, %v2366_v13  }
0x1255   : > { %2402 = vperm.xlu1 %3690, %v2396_v36   ;;  %2407 = vperm.xlu0 %3688, %v2397_v6  }
0x1259   : > { %2412 = vperm.xlu1 %3690, %v2398_v41   ;;  %2417 = vperm.xlu0 %3688, %v2399_v11  }
0x125d   : > { %2438 = vperm.xlu1 %3690, %v3372_v51   ;;  %2443 = vperm.xlu0 %3688, %v3373_v52  }
0x1261   : > { %2538 = vperm.xlu1 %3690, %v3384_v7   ;;  %2543 = vperm.xlu0 %3688, %v3385_v53  }
0x1265   : > { %2548 = vperm.xlu1 %3690, %v3386_v56   ;;  %2553 = vperm.xlu0 %3688, %v3387_v57  }
0x12cc   : > { %v2375_v58 = vpop.permute.xlu1 %2374  ;;  %v2370_v59 = vpop.permute.xlu0 %2369 }
0x12cd   : > { %v2387_v62 = vmul.f32 %v2370_v59, %v4599_v42  ;;  %v2388_v37 = vmul.f32 %v2375_v58, %v4602_v15  ;;  %v3713_v42 = vld [vmem:[%s4953_s15 + $0x28] sm:$0xff]   ;;  %v3714_v15 = vld [vmem:[%s4943_s5 + $0x30] sm:$0xff]  }
0x12ce   : > { %3517 = vmatprep.mubr.msk.bf16.mxu1 %vm819_vm3, %v3714_v15 }
0x12d0   : > { %v2380_v60 = vpop.permute.xlu1 %2379  ;;  %v2385_v61 = vpop.permute.xlu0 %2384 }
0x12d1   : > { %v2389_v4 = vmul.f32 %v2380_v60, %v4607_v50  ;;  %v2390_v5 = vmul.f32 %v2385_v61, %v4614_v8 }
0x12d4   : > { %v2403_v34 = vpop.permute.xlu1 %2402  ;;  %v2408_v43 = vpop.permute.xlu0 %2407 }
0x12d5   : > { %v2420_v63 = vadd.f32 %v2403_v34, %v2387_v62  ;;  %v2421_v14 = vadd.f32 %v2408_v43, %v2388_v37 }
0x12d7   : > { %v2429_v17 = vpack.c.bf16 %v2421_v14, %v2420_v63 }
0x12d8   : > { %v2413_v18 = vpop.permute.xlu1 %2412  ;;  %v2418_v46 = vpop.permute.xlu0 %2417 }
0x12d9   : > { %v2422_v19 = vadd.f32 %v2413_v18, %v2389_v4  ;;  %v2423_v20 = vadd.f32 %v2418_v46, %v2390_v5  ;;  %3507 = vmatprep.subr.bf16.mxu0 %v2429_v17 }
0x12da   : > { %3508 = vmatpush3.bf16.msra.mxu0 %v2429_v17 }
0x12db   : > { %v2430_v47 = vpack.c.bf16 %v2423_v20, %v2422_v19 }
0x12dc   : > { %v2439_v8 = vpop.permute.xlu1 %2438  ;;  %v2444_v24 = vpop.permute.xlu0 %2443 }
0x12dd   : > { %3509 = vmatprep.subr.bf16.mxu0 %v2430_v47 }
0x12de   : > { %3510 = vmatpush3.bf16.msra.mxu0 %v2430_v47 }
0x12e0   : > { %v2539_v32 = vpop.permute.xlu1 %2538  ;;  %v2544_v33 = vpop.permute.xlu0 %2543 }
0x12e1   : > { %3512 = vmatmul.mubr.msk.bf16.vlgmr.msra.gmra.mrb[12].mxu0 %vm1297_vm13, %v3713_v42 }
0x12e4   : > { %v2554_v35 = vpop.permute.xlu0 %2553 }
0x13b4   : > { %v4681_v50 = vpop.f32.mrb[12].mxu0 }
0x13b5   : > { %v2506_v21 = vpop.f32.mrb[13].mxu0 }
0x13b6   : > { %v2507_v22 = vadd.f32 %v2506_v21, %v2439_v8  ;;  %v4683_v23 = vpop.f32.mrb[14].mxu0 }
0x13b7   : > { %v2509_v25 = vpop.f32.mrb[15].mxu0 }
0x13b8   : > { %v2510_v26 = vadd.f32 %v2509_v25, %v2444_v24  ;;  %v2521_v28 = vadd.f32 %v2507_v22, %v4488_v44  ;;  %v2549_v44 = vpop.permute.xlu1 %2548 }
0x13ba   : > { %v2522_v29 = vadd.f32 %v2510_v26, %v4491_v45  ;;  %v2626_v45 = vstv %s3392_s27 }
0x13bc   : > { %v2530_v30 = vpack.c.bf16 %v2522_v29, %v2521_v28  ;;  %v3393_v29 = vld [vmem:[%s4946_s8 + $0x60] sm:$0xff] }
0x13be   : > { %3515 = vmatprep.subr.bf16.mxu1 %v2530_v30 }
0x13bf   : > { %3516 = vmatpush3.bf16.msra.mxu1 %v2530_v30  ;;  %v3394_v30 = vld [vmem:[%s4946_s8 + $0x68] sm:$0xff] }
0x13c0   : > { %3529 = vmatprep.subr.bf16.mxu1 %v3842_v27 }
0x13c2   : > { %3518 = vmatmul.mubr.msk.bf16.vlgmr.msra.gmra.mrb[12].mxu1 %vm819_vm3, %v3715_v31 }
0x13c3   : > { %3531 = vmatprep.mubr.msk.bf16.mxu1 %vm3843_vm0, %v3842_v27 }
0x1495   : > { %v3519_v13 = vpop.f32.mrb[12].mxu1 }
0x1496   : > { %v2615_v9 = vadd.f32 %v3519_v13, %v2549_v44  ;;  %v2606_v16 = vpop.f32.mrb[13].mxu1  ;;  %v3395_v44 = vld [vmem:[%s4946_s8 + $0x70] sm:$0xff]  ;;  %v3396_v13 = vld [vmem:[%s4946_s8 + $0x78] sm:$0xff] }
0x1497   : > { %v2607_v10 = vadd.f32 %v2606_v16, %v2539_v32  ;;  %v3520_v36 = vpop.f32.mrb[14].mxu1 }
0x1498   : > { %vm2624_vm2 = vcmp.gt.f32.partialorder %v2615_v9, 0.0  ;;  %v2629_v1 = vmul.f32 %v2626_v45, %v2615_v9  ;;  %v2618_v6 = vadd.f32 %v3520_v36, %v2554_v35  ;;  %v2609_v48 = vpop.f32.mrb[15].mxu1  ;;  %v3398_v36 = vld [vmem:[%s4947_s9 + $0x68] sm:$0xff] }
0x1499   : > { %vm2622_vm4 = vcmp.gt.f32.partialorder %v2607_v10, 0.0  ;;  %v2627_v49 = vmul.f32 %v2626_v45, %v2607_v10  ;;  %v2610_v41 = vadd.f32 %v2609_v48, %v2544_v33 }
0x149a   : > { %vm2625_vm5 = vcmp.gt.f32.partialorder %v2618_v6, 0.0  ;;  %v2630_v27 = vmul.f32 %v2626_v45, %v2618_v6  ;;  %v2633_v11 = vsel %vm2624_vm2, %v2615_v9, %v2629_v1  ;;  %v3397_v1 = vld [vmem:[%s4947_s9 + $0x60] sm:$0xff] }
0x149b   : > { %v2631_v51 = vsel %vm2622_vm4, %v2607_v10, %v2627_v49  ;;  %vm2623_vm0 = vcmp.gt.f32.partialorder %v2610_v41, 0.0  ;;  %v2628_v52 = vmul.f32 %v2626_v45, %v2610_v41  ;;  %v4698_v56 = vmul.f32 %v4101_v2, %v2633_v11  ;;  %v3400_v11 = vld [vmem:[%s4947_s9 + $0x78] sm:$0xff] }
0x149c   : > { %v4695_v7 = vmul.f32 %v4101_v2, %v2631_v51  ;;  %v2634_v53 = vsel %vm2625_vm5, %v2618_v6, %v2630_v27  ;;  %v3399_v27 = vld [vmem:[%s4947_s9 + $0x70] sm:$0xff] }
0x149d   : > { %v2632_v55 = vsel %vm2623_vm0, %v2610_v41, %v2628_v52  ;;  %v4704_v58 = vmul.f32 %v4101_v2, %v2634_v53  ;;  %v2666_v37 = vmul.f32 %v4698_v56, %v4698_v56  ;;  %v3401_v53 = vld [vmem:[%s4948_s10 + $0x60] sm:$0xff] }
0x149e   : > { %v4701_v57 = vmul.f32 %v4101_v2, %v2632_v55  ;;  %v2664_v60 = vmul.f32 %v4695_v7, %v4695_v7  ;;  %v3402_v55 = vld [vmem:[%s4948_s10 + $0x68] sm:$0xff] }
0x149f   : > { %v2667_v63 = vmul.f32 %v4704_v58, %v4704_v58 }
0x14a0   : > { %v2649_v59 = vadd.f32 %v4701_v57, %v4695_v7  ;;  %v2665_v61 = vmul.f32 %v4701_v57, %v4701_v57 }
0x14a2   : > { %v2650_v62 = vadd.f32 %v2649_v59, %v4698_v56  ;;  %v2668_v34 = vadd.f32 %v2665_v61, %v2664_v60  ;;  %v3403_v59 = vld [vmem:[%s4948_s10 + $0x70] sm:$0xff]  ;;  %v3404_v60 = vld [vmem:[%s4948_s10 + $0x78] sm:$0xff]  ;;  %v3405_v61 = vld [vmem:[%s4949_s11 + $0x60] sm:$0xff] }
0x14a4   : > { %v2651_v43 = vadd.f32 %v2650_v62, %v4704_v58  ;;  %v2669_v14 = vadd.f32 %v2668_v34, %v2666_v37  ;;  %v3407_v62 = vld [vmem:[%s4949_s11 + $0x70] sm:$0xff]  ;;  %v3408_v37 = vld [vmem:[%s4949_s11 + $0x78] sm:$0xff] }
0x14a6   : > { %2652 = vadd.xlane.f32.xlu1 %v2651_v43  ;;  %v2670_v4 = vadd.f32 %v2669_v14, %v2667_v63 }
0x14a8   : > { %2671 = vadd.xlane.f32.xlu0 %v2670_v4 }
0x1533   : > { %v2653_v5 = vpop.xlane.xlu1 %2652 }
0x1534   : > { %v2654_v17 = vrot.slane %v2653_v5, 4 }
0x1535   : > { %v2672_v18 = vpop.xlane.xlu0 %2671 }
0x1536   : > { %v2655_v46 = vadd.f32 %v2654_v17, %v2653_v5  ;;  %v2673_v19 = vrot.slane %v2672_v18, 4 }
0x1538   : > { %v2656_v20 = vrot.slane %v2655_v46, 2  ;;  %v2674_v47 = vadd.f32 %v2673_v19, %v2672_v18 }
0x153a   : > { %v2675_v42 = vrot.slane %v2674_v47, 2  ;;  %v2657_v15 = vadd.f32 %v2656_v20, %v2655_v46 }
0x153c   : > { %v2658_v8 = vrot.slane %v2657_v15, 1  ;;  %v2676_v21 = vadd.f32 %v2675_v42, %v2674_v47 }
0x153e   : > { %v2659_v22 = vadd.f32 %v2658_v8, %v2657_v15  ;;  %v2677_v24 = vrot.slane %v2676_v21, 1 }
0x1540   : > { %3577 = vpush %v2659_v22  ;;  %v2678_v25 = vadd.f32 %v2677_v24, %v2676_v21 }
0x1542   : > { %3579 = vpush %v2678_v25 }
0x1571   : > { %s3578_s28 = spop %3577 }
0x1572   : > { %s2663_s7 = smul.f32 0.00048828125, %s3578_s28 }
0x1573   : > { %s3580_s1 = spop %3579 }
0x1574   : > { %s2683_s12 = smul.f32 %s2663_s7, %s2663_s7  ;;  %v2719_v45 = vstv %s2663_s7 }
0x1575   : > { %s2682_s21 = smul.f32 0.00048828125, %s3580_s1 }
0x1577   : > { %s2684_s3 = ssub.f32 %s2682_s21, %s2683_s12 }
0x1579   : > { %s2685_s2 = smax.f32 %s3841_s22, %s2684_s3  ;;  %s3850_s3 = smov [#allocation8]  }
0x157a   : > { %s2686_s23 = sadd.f32 1e-08, %s2685_s2  ;;  %s5006_s2 = smov 2  }
0x157c   : > { %v2687_v26 = vstv %s2686_s23  ;;  %s5007_s23 = smov 126  }
0x157d   : > { %3732 = vrsqrt.f32 %v2687_v26 }
0x1587   : > { %v3733_v28 = vpop.eup %3732 }
0x1588   : > { %3581 = vpush %v3733_v28 }
0x15b9   : > { %s3582_s28 = spop %3581 }
0x15ba   : > { %v2690_v31 = vstv %s3582_s28 }
0x15bb   : > { %v2691_v32 = vmul.f32 %v3393_v29, %v2690_v31  ;;  %v2692_v33 = vmul.f32 %v3394_v30, %v2690_v31  ;;  %v2693_v9 = vmul.f32 %v3395_v44, %v2690_v31  ;;  %v2694_v35 = vmul.f32 %v3396_v13, %v2690_v31 }
0x15bd   : > { %2702 = vperm.xlu1 %3690, %v2692_v33   ;;  %2697 = vperm.xlu0 %3688, %v2691_v32   ;;  %v2721_v16 = vmul.f32 %v2719_v45, %v2692_v33  ;;  %v2720_v10 = vmul.f32 %v2719_v45, %v2691_v32  ;;  %v2722_v6 = vmul.f32 %v2719_v45, %v2693_v9 }
0x15be   : > { %v2723_v49 = vmul.f32 %v2719_v45, %v2694_v35 }
0x15bf   : > { %v2725_v48 = vsub.f32 %v3398_v36, %v2721_v16  ;;  %v2724_v41 = vsub.f32 %v3397_v1, %v2720_v10  ;;  %v2726_v51 = vsub.f32 %v3399_v27, %v2722_v6 }
0x15c0   : > { %v2727_v52 = vsub.f32 %v3400_v11, %v2723_v49 }
0x15c1   : > { %2707 = vperm.xlu1 %3690, %v2693_v9   ;;  %2712 = vperm.xlu0 %3688, %v2694_v35  }
0x15c5   : > { %2735 = vperm.xlu1 %3690, %v2725_v48   ;;  %2730 = vperm.xlu0 %3688, %v2724_v41  }
0x15c9   : > { %2740 = vperm.xlu1 %3690, %v2726_v51   ;;  %2745 = vperm.xlu0 %3688, %v2727_v52  }
0x15cd   : > { %2771 = vperm.xlu1 %3690, %v3401_v53   ;;  %3694 = vset.pattern.permute.xlu0 %v3845_v0 }
0x15ce   : > { %2826 = vperm.xlu0 %3694, %v3401_v53  }
0x15d1   : > { %3691 = vset.pattern.permute.xlu1 %v3844_v54 }
0x15d2   : > { %2794 = vperm.xlu1 %3691, %v3401_v53   ;;  %3695 = vset.pattern.permute.xlu0 %v3844_v54 }
0x15d3   : > { %2798 = vperm.xlu0 %3695, %v3402_v55  }
0x15d6   : > { %3692 = vset.pattern.permute.xlu1 %v3840_v12 }
0x15d7   : > { %2781 = vperm.xlu1 %3692, %v3403_v59   ;;  %2806 = vperm.xlu0 %3695, %v3404_v60  }
0x15db   : > { %3693 = vset.pattern.permute.xlu1 %v3844_v54  ;;  %3698 = vset.pattern.permute.xlu0 %v3840_v12  ;;  %v3406_v54 = vld [vmem:[%s4949_s11 + $0x68] sm:$0xff] }
0x15dc   : > { %2802 = vperm.xlu1 %3693, %v3403_v59   ;;  %2776 = vperm.xlu0 %3698, %v3402_v55  }
0x15e0   : > { %3696 = vset.pattern.permute.xlu1 %v3845_v0  ;;  %2856 = vperm.xlu0 %3698, %v3405_v61  }
0x15e1   : > { %2830 = vperm.xlu1 %3696, %v3402_v55  }
0x15e5   : > { %3697 = vset.pattern.permute.xlu1 %v3840_v12 }
0x15e6   : > { %2786 = vperm.xlu1 %3697, %v3404_v60  }
0x15ea   : > { %3699 = vset.pattern.permute.xlu1 %v3845_v0 }
0x15eb   : > { %2834 = vperm.xlu1 %3699, %v3403_v59   ;;  %v2883_v59 = vstv %s3409_s4  ;;  %s646_s4 = sand.u32 1, %s3828_s24  }
0x15ef   : > { %2838 = vperm.xlu1 %3699, %v3404_v60  }
0x15f3   : > { %3700 = vset.pattern.permute.xlu1 %v3840_v12 }
0x15f4   : > { %2861 = vperm.xlu1 %3700, %v3406_v54  }
0x15f8   : > { %2866 = vperm.xlu1 %3700, %v3407_v62  }
0x15fc   : > { %2871 = vperm.xlu1 %3700, %v3408_v37  }
0x163c   : > { %v2703_v0 = vpop.permute.xlu1 %2702  ;;  %v2698_v34 = vpop.permute.xlu0 %2697 }
0x163d   : > { %v2716_v14 = vmul.f32 %v2703_v0, %v4701_v57  ;;  %v2715_v4 = vmul.f32 %v2698_v34, %v4695_v7 }
0x1640   : > { %v2708_v43 = vpop.permute.xlu1 %2707  ;;  %v2713_v63 = vpop.permute.xlu0 %2712 }
0x1641   : > { %v2717_v46 = vmul.f32 %v2708_v43, %v4698_v56  ;;  %v2718_v7 = vmul.f32 %v2713_v63, %v4704_v58 }
0x1644   : > { %v2736_v12 = vpop.permute.xlu1 %2735  ;;  %v2731_v17 = vpop.permute.xlu0 %2730 }
0x1645   : > { %v2749_v5 = vadd.f32 %v2736_v12, %v2716_v14  ;;  %v2748_v18 = vadd.f32 %v2731_v17, %v2715_v4 }
0x1647   : > { %v2753_v19 = vmul.f32 %v4101_v2, %v2749_v5  ;;  %v2752_v20 = vmul.f32 %v4101_v2, %v2748_v18 }
0x1648   : > { %v2741_v47 = vpop.permute.xlu1 %2740  ;;  %v2746_v15 = vpop.permute.xlu0 %2745 }
0x1649   : > { %v2750_v42 = vadd.f32 %v2741_v47, %v2717_v46  ;;  %2763 = vrot.lane.b32.xlu0 %v2753_v19, %s5006_s2  ;;  %2761 = vrot.lane.b32.xlu1 %v2752_v20, %s5006_s2  ;;  %v2751_v56 = vadd.f32 %v2746_v15, %v2718_v7 }
0x164b   : > { %v2754_v57 = vmul.f32 %v4101_v2, %v2750_v42  ;;  %v2755_v8 = vmul.f32 %v4101_v2, %v2751_v56 }
0x164c   : > { %v2772_v21 = vpop.permute.xlu1 %2771 }
0x164d   : > { %2765 = vrot.lane.b32.xlu0 %v2754_v57, %s5006_s2  ;;  %2817 = vrot.lane.b32.xlu1 %v2752_v20, %s5007_s23  ;;  %v2827_v29 = vpop.permute.xlu0 %2826 }
0x1651   : > { %2819 = vrot.lane.b32.xlu0 %v2753_v19, %s5007_s23  ;;  %2821 = vrot.lane.b32.xlu1 %v2754_v57, %s5007_s23  ;;  %v2795_v22 = vpop.permute.xlu1 %2794 }
0x1652   : > { %v2799_v31 = vpop.permute.xlu0 %2798  ;;  %v2809_v36 = vmul.f32 %v2795_v22, %v2752_v20 }
0x1653   : > { %v2810_v11 = vmul.f32 %v2799_v31, %v2753_v19 }
0x1655   : > { %2767 = vrot.lane.b32.xlu0 %v2755_v8, %s5006_s2 }
0x1656   : > { %v2782_v24 = vpop.permute.xlu1 %2781  ;;  %v2807_v33 = vpop.permute.xlu0 %2806 }
0x1657   : > { %v2812_v5 = vmul.f32 %v2807_v33, %v2755_v8 }
0x1659   : > { %2823 = vrot.lane.b32.xlu0 %v2755_v8, %s5007_s23 }
0x165b   : > { %v2803_v25 = vpop.permute.xlu1 %2802  ;;  %v2777_v44 = vpop.permute.xlu0 %2776 }
0x165c   : > { %v2811_v51 = vmul.f32 %v2803_v25, %v2754_v57 }
0x165f   : > { %v2857_v45 = vpop.permute.xlu0 %2856 }
0x1660   : > { %v2831_v58 = vpop.permute.xlu1 %2830 }
0x1665   : > { %v2787_v26 = vpop.permute.xlu1 %2786 }
0x166a   : > { %v2835_v28 = vpop.permute.xlu1 %2834 }
0x166e   : > { %v2839_v30 = vpop.permute.xlu1 %2838 }
0x1673   : > { %v2862_v32 = vpop.permute.xlu1 %2861 }
0x1677   : > { %v2867_v13 = vpop.permute.xlu1 %2866 }
0x167b   : > { %v2872_v9 = vpop.permute.xlu1 %2871 }
0x16bb   : > { %v2764_v16 = vpop.permute.xlu0 %2763  ;;  %v2762_v35 = vpop.permute.xlu1 %2761 }
0x16bc   : > { %v2789_v10 = vmul.f32 %v2772_v21, %v2762_v35  ;;  %v2790_v6 = vmul.f32 %v2777_v44, %v2764_v16 }
0x16be   : > { %v2813_v49 = vadd.f32 %v2809_v36, %v2789_v10  ;;  %v2814_v55 = vadd.f32 %v2810_v11, %v2790_v6 }
0x16bf   : > { %v2766_v1 = vpop.permute.xlu0 %2765  ;;  %v2818_v48 = vpop.permute.xlu1 %2817 }
0x16c0   : > { %v2841_v41 = vmul.f32 %v2827_v29, %v2818_v48  ;;  %v2791_v27 = vmul.f32 %v2782_v24, %v2766_v1 }
0x16c2   : > { %v2845_v52 = vadd.f32 %v2841_v41, %v2813_v49  ;;  %v2815_v62 = vadd.f32 %v2811_v51, %v2791_v27 }
0x16c3   : > { %v2820_v53 = vpop.permute.xlu0 %2819  ;;  %v2822_v60 = vpop.permute.xlu1 %2821 }
0x16c4   : > { %v2842_v61 = vmul.f32 %v2831_v58, %v2820_v53  ;;  %v2874_v54 = vadd.f32 %v2857_v45, %v2845_v52  ;;  %v2843_v37 = vmul.f32 %v2835_v28, %v2822_v60  ;;  %v3410_v53 = vld [vmem:[%s4951_s13 + $0x60] sm:$0xff] }
0x16c6   : > { %v2846_v0 = vadd.f32 %v2842_v61, %v2814_v55  ;;  %vm2879_vm6 = vcmp.gt.f32.partialorder %v2874_v54, 0.0  ;;  %v2884_v34 = vmul.f32 %v2883_v59, %v2874_v54  ;;  %v2847_v43 = vadd.f32 %v2843_v37, %v2815_v62  ;;  %v3411_v55 = vld [vmem:[%s4951_s13 + $0x68] sm:$0xff]  ;;  %v3413_v62 = vld [vmem:[%s4951_s13 + $0x78] sm:$0xff] }
0x16c7   : > { %v2768_v63 = vpop.permute.xlu0 %2767 }
0x16c8   : > { %v2875_v14 = vadd.f32 %v2862_v32, %v2846_v0  ;;  %v2792_v4 = vmul.f32 %v2787_v26, %v2768_v63  ;;  %v2876_v12 = vadd.f32 %v2867_v13, %v2847_v43  ;;  %v2888_v17 = vsel %vm2879_vm6, %v2874_v54, %v2884_v34  ;;  %v3412_v54 = vld [vmem:[%s4951_s13 + $0x70] sm:$0xff] }
0x16c9   : > { %v4794_v57 = vmul.f32 %v4101_v2, %v2888_v17 }
0x16ca   : > { %vm2880_vm7 = vcmp.gt.f32.partialorder %v2875_v14, 0.0  ;;  %v2885_v18 = vmul.f32 %v2883_v59, %v2875_v14  ;;  %vm2881_vm8 = vcmp.gt.f32.partialorder %v2876_v12, 0.0  ;;  %v2886_v46 = vmul.f32 %v2883_v59, %v2876_v12 }
0x16cb   : > { %v2824_v19 = vpop.permute.xlu0 %2823  ;;  %v2816_v47 = vadd.f32 %v2812_v5, %v2792_v4  ;;  %v2921_v25 = vmul.f32 %v4794_v57, %v4794_v57  ;;  %v3415_v4 = vld [vmem:[%s4952_s14 + $0x68] sm:$0xff] }
0x16cc   : > { %v2889_v20 = vsel %vm2880_vm7, %v2875_v14, %v2885_v18  ;;  %v2844_v42 = vmul.f32 %v2839_v30, %v2824_v19  ;;  %v2890_v7 = vsel %vm2881_vm8, %v2876_v12, %v2886_v46  ;;  %v3414_v14 = vld [vmem:[%s4952_s14 + $0x60] sm:$0xff]  ;;  %v3416_v46 = vld [vmem:[%s4952_s14 + $0x70] sm:$0xff]  ;;  %v3417_v19 = vld [vmem:[%s4952_s14 + $0x78] sm:$0xff] }
0x16cd   : > { %v4797_v15 = vmul.f32 %v4101_v2, %v2889_v20  ;;  %v4802_v22 = vmul.f32 %v4101_v2, %v2890_v7  ;;  %v1266_v7 = vld [vmem:[%s4954_s16 + $0x18] sm:$0xff] }
0x16ce   : > { %v2848_v56 = vadd.f32 %v2844_v42, %v2816_v47  ;;  %v1265_v42 = vld [vmem:[%s4954_s16 + $0x10] sm:$0xff] }
0x16cf   : > { %v2922_v8 = vmul.f32 %v4797_v15, %v4797_v15  ;;  %v2906_v24 = vadd.f32 %v4797_v15, %v4794_v57  ;;  %v2923_v31 = vmul.f32 %v4802_v22, %v4802_v22 }
0x16d0   : > { %v2877_v21 = vadd.f32 %v2872_v9, %v2848_v56  ;;  %v3324_v56 = vld [vmem:[%s4954_s16 + $0x30] sm:$0xff] }
0x16d1   : > { %v2925_v26 = vadd.f32 %v2922_v8, %v2921_v25  ;;  %v2907_v30 = vadd.f32 %v2906_v24, %v4802_v22  ;;  %v3325_v8 = vld [vmem:[%s4954_s16 + $0x38] sm:$0xff]  ;;  %v3374_v24 = vld [vmem:[%s4954_s16 + $0x50] sm:$0xff] }
0x16d2   : > { %vm2882_vm9 = vcmp.gt.f32.partialorder %v2877_v21, 0.0  ;;  %v2887_v58 = vmul.f32 %v2883_v59, %v2877_v21  ;;  %v3375_v25 = vld [vmem:[%s4954_s16 + $0x58] sm:$0xff] }
0x16d3   : > { %v2926_v44 = vadd.f32 %v2925_v26, %v2923_v31  ;;  %v3425_v26 = vld [vmem:[%s4954_s16 + $0x78] sm:$0xff] }
0x16d4   : > { %v2891_v28 = vsel %vm2882_vm9, %v2877_v21, %v2887_v58  ;;  %v3716_v21 = vld [vmem:[%s4953_s15 + $0x30] sm:$0xff]  }
0x16d5   : > { %v4809_v29 = vmul.f32 %v4101_v2, %v2891_v28  ;;  %3525 = vmatprep.mubr.msk.bf16.mxu0 %vm1297_vm13, %v3716_v21  ;;  %v3424_v58 = vld [vmem:[%s4954_s16 + $0x70] sm:$0xff]  ;;  %v3114_v28 = vld [vmem:[%s4957_s19] sm:$0xff] }
0x16d7   : > { %v2908_v32 = vadd.f32 %v2907_v30, %v4809_v29  ;;  %v2924_v33 = vmul.f32 %v4809_v29, %v4809_v29 }
0x16d9   : > { %2909 = vadd.xlane.f32.xlu1 %v2908_v32  ;;  %v2927_v13 = vadd.f32 %v2926_v44, %v2924_v33 }
0x16db   : > { %2928 = vadd.xlane.f32.xlu0 %v2927_v13 }
0x1766   : > { %v2910_v45 = vpop.xlane.xlu1 %2909 }
0x1767   : > { %v2911_v9 = vrot.slane %v2910_v45, 4 }
0x1768   : > { %v2929_v16 = vpop.xlane.xlu0 %2928 }
0x1769   : > { %v2912_v35 = vadd.f32 %v2911_v9, %v2910_v45  ;;  %v2930_v2 = vrot.slane %v2929_v16, 4 }
0x176b   : > { %v2913_v10 = vrot.slane %v2912_v35, 2  ;;  %v2931_v36 = vadd.f32 %v2930_v2, %v2929_v16 }
0x176d   : > { %v2932_v1 = vrot.slane %v2931_v36, 2  ;;  %v2914_v6 = vadd.f32 %v2913_v10, %v2912_v35 }
0x176f   : > { %v2915_v48 = vrot.slane %v2914_v6, 1  ;;  %v2933_v49 = vadd.f32 %v2932_v1, %v2931_v36 }
0x1771   : > { %v2916_v41 = vadd.f32 %v2915_v48, %v2914_v6  ;;  %v2934_v27 = vrot.slane %v2933_v49, 1 }
0x1773   : > { %3583 = vpush %v2916_v41  ;;  %v2935_v11 = vadd.f32 %v2934_v27, %v2933_v49 }
0x1775   : > { %3585 = vpush %v2935_v11 }
0x17a4   : > { %s3584_s30 = spop %3583 }
0x17a5   : > { %s2920_s7 = smul.f32 0.00048828125, %s3584_s30 }
0x17a6   : > { %s3586_s26 = spop %3585 }
0x17a7   : > { %s2940_s27 = smul.f32 %s2920_s7, %s2920_s7  ;;  %v2976_v37 = vstv %s2920_s7  ;;  %s3105_s7 = sld [smem:[#allocation2]] }
0x17a8   : > { %s2939_s28 = smul.f32 0.00048828125, %s3586_s26  ;;  %s3432_s26 = sshll.u32 %s3980_s17, 7 }
0x17a9   : > { %s3165_s17 = scalar_lea.sflag [#allocation4], %s646_s4 }
0x17aa   : > { %s2941_s1 = ssub.f32 %s2939_s28, %s2940_s27 }
0x17ac   : > { %s2942_s12 = smax.f32 %s3841_s22, %s2941_s1 }
0x17ad   : > { %s2943_s21 = sadd.f32 1e-08, %s2942_s12  ;;  %s4896_s12 = scalar_lea.hbm %s4958_s20, %s3432_s26 }
0x17af   : > { %v2944_v51 = vstv %s2943_s21 }
0x17b0   : > { %3734 = vrsqrt.f32 %v2944_v51 }
0x17ba   : > { %v3735_v52 = vpop.eup %3734 }
0x17bb   : > { %3587 = vpush %v3735_v52 }
0x17ec   : > { %s3588_s30 = spop %3587 }
0x17ed   : > { %v2947_v59 = vstv %s3588_s30  ;;  %s3267_s30 = sshll.u32 %s646_s4, 3 }
0x17ee   : > { %v2948_v60 = vmul.f32 %v3410_v53, %v2947_v59  ;;  %v2949_v61 = vmul.f32 %v3411_v55, %v2947_v59  ;;  %v2950_v0 = vmul.f32 %v3412_v54, %v2947_v59  ;;  %v2951_v43 = vmul.f32 %v3413_v62, %v2947_v59  ;;  %s648_s27 = scalar_lea.vmem [#allocation8], %s3267_s30 }
0x17ef   : > { %s3178_s22 = sshll.u32 %s648_s27, 4  ;;  %s4898_s22 = int_to_ptr.vmem [resolvable:$true] %s3178_s22 }
0x17f0   : > { %2959 = vperm.xlu1 %3700, %v2949_v61   ;;  %2954 = vperm.xlu0 %3698, %v2948_v60   ;;  %v2977_v34 = vmul.f32 %v2976_v37, %v2948_v60  ;;  %v2978_v63 = vmul.f32 %v2976_v37, %v2949_v61  ;;  %v2979_v12 = vmul.f32 %v2976_v37, %v2950_v0  ;;  %s3766_s21 = scalar_lea.vmem %s4898_s22, 128 }
0x17f1   : > { %v2980_v17 = vmul.f32 %v2976_v37, %v2951_v43  ;;  %p3767_p10 = scmp.ne.s32.totalorder %s4898_s22, %s3766_s21 }
0x17f2   : > { %v2981_v5 = vsub.f32 %v3414_v14, %v2977_v34  ;;  %v2982_v18 = vsub.f32 %v3415_v4, %v2978_v63  ;;  %v2983_v20 = vsub.f32 %v3416_v46, %v2979_v12  ;;  %v3108_v63 = vstv %s3105_s7  ;;  %s3770_s7 = sshll.u32 %s3850_s3, 4  ;;  %s3771_s7 = int_to_ptr.vmem [resolvable:$false] %s3770_s7 }
0x17f3   : > { %v2984_v47 = vsub.f32 %v3417_v19, %v2980_v17  ;;  %v3104_v19 = vld [vmem:[%s4956_s18] sm:$0xf]  ;;  %p3768_p0 = pnand %p3767_p10, %p5008_p12  ;;  %s3772_s2 = scalar_lea.vmem %s3771_s7, 256 }
0x17f4   : > { %2964 = vperm.xlu1 %3700, %v2950_v0   ;;  %2969 = vperm.xlu0 %3698, %v2951_v43   ;;  %p3773_p8 = scmp.lt.s32.totalorder %s4898_s22, %s3771_s7  ;;  %p3774_p11 = scmp.lt.s32.totalorder %s3772_s2, %s3766_s21 }
0x17f5   : > { %p3769_p7 = pneg %p3768_p0 }
0x17f6   : > { %p3775_p13 = por %p3774_p11, %p3773_p8 }
0x17f8   : > { %2987 = vperm.xlu1 %3700, %v2981_v5   ;;  %2992 = vperm.xlu0 %3698, %v2982_v18   ;;  %p3776_p1 = pnand %p3775_p13, %p3769_p7 }
0x17fc   : > { %2997 = vperm.xlu1 %3700, %v2983_v20   ;;  %3002 = vperm.xlu0 %3698, %v2984_v47  }
0x1800   : > { %1279 = vperm.xlu1 %3700, %v1265_v42   ;;  %1284 = vperm.xlu0 %3698, %v1266_v7  }
0x1804   : > { %1863 = vperm.xlu1 %3700, %v3324_v56   ;;  %1868 = vperm.xlu0 %3698, %v3325_v8  }
0x1808   : > { %2448 = vperm.xlu1 %3700, %v3374_v24   ;;  %2453 = vperm.xlu0 %3698, %v3375_v25  }
0x180c   : > { %3031 = vperm.xlu1 %3700, %v3424_v58   ;;  %3036 = vperm.xlu0 %3698, %v3425_v26  }
0x1810   : > { %3117 = vperm.xlu1 %3700, %v3114_v28  }
0x186f   : > { %v2960_v30 = vpop.permute.xlu1 %2959  ;;  %v2955_v31 = vpop.permute.xlu0 %2954 }
0x1870   : > { %v2972_v44 = vmul.f32 %v2955_v31, %v4794_v57  ;;  %v2973_v13 = vmul.f32 %v2960_v30, %v4797_v15  ;;  %v3717_v15 = vld [vmem:[%s4953_s15 + $0x38] sm:$0xff]  }
0x1873   : > { %v2965_v32 = vpop.permute.xlu1 %2964  ;;  %v2970_v33 = vpop.permute.xlu0 %2969 }
0x1874   : > { %v2974_v2 = vmul.f32 %v2965_v32, %v4802_v22  ;;  %v2975_v10 = vmul.f32 %v2970_v33, %v4809_v29 }
0x1877   : > { %v2988_v45 = vpop.permute.xlu1 %2987  ;;  %v2993_v9 = vpop.permute.xlu0 %2992 }
0x1878   : > { %v3005_v16 = vadd.f32 %v2988_v45, %v2972_v44  ;;  %v3006_v35 = vadd.f32 %v2993_v9, %v2973_v13 }
0x187a   : > { %v3014_v36 = vpack.c.bf16 %v3006_v35, %v3005_v16 }
0x187b   : > { %v2998_v1 = vpop.permute.xlu1 %2997  ;;  %v3003_v6 = vpop.permute.xlu0 %3002 }
0x187c   : > { %v3007_v48 = vadd.f32 %v2998_v1, %v2974_v2  ;;  %v3008_v49 = vadd.f32 %v3003_v6, %v2975_v10  ;;  %3521 = vmatprep.subr.bf16.mxu0 %v3014_v36 }
0x187d   : > { %3522 = vmatpush3.bf16.msra.mxu0 %v3014_v36 }
0x187e   : > { %v3015_v41 = vpack.c.bf16 %v3008_v49, %v3007_v48 }
0x187f   : > { %v1280_v27 = vpop.permute.xlu1 %1279  ;;  %v1285_v57 = vpop.permute.xlu0 %1284 }
0x1880   : > { %3523 = vmatprep.subr.bf16.mxu0 %v3015_v41  ;;  %v1347_v22 = vadd.f32 %v4285_v38, %v1280_v27  ;;  %v1350_v52 = vadd.f32 %v4287_v3, %v1285_v57 }
0x1881   : > { %3524 = vmatpush3.bf16.msra.mxu0 %v3015_v41 }
0x1883   : > { %v1864_v11 = vpop.permute.xlu1 %1863  ;;  %v1869_v29 = vpop.permute.xlu0 %1868 }
0x1884   : > { %v1930_v51 = vadd.f32 %v4483_v39, %v1864_v11  ;;  %v1933_v53 = vadd.f32 %v4485_v40, %v1869_v29  ;;  %3526 = vmatmul.mubr.msk.bf16.vlgmr.msra.gmra.mrb[16].mxu0 %vm1297_vm13, %v3717_v15 }
0x1886   : > { %v1938_v55 = vadd.f32 %v1930_v51, %v1347_v22  ;;  %v1939_v59 = vadd.f32 %v1933_v53, %v1350_v52 }
0x1887   : > { %v2449_v60 = vpop.permute.xlu1 %2448  ;;  %v2454_v61 = vpop.permute.xlu0 %2453 }
0x1888   : > { %v2515_v54 = vadd.f32 %v4681_v50, %v2449_v60  ;;  %v2518_v62 = vadd.f32 %v4683_v23, %v2454_v61 }
0x188a   : > { %v2523_v37 = vadd.f32 %v2515_v54, %v1938_v55  ;;  %v2524_v0 = vadd.f32 %v2518_v62, %v1939_v59 }
0x188b   : > { %v3032_v38 = vpop.permute.xlu1 %3031  ;;  %v3037_v3 = vpop.permute.xlu0 %3036 }
0x188f   : > { %v3118_v20 = vpop.permute.xlu1 %3117 }
0x1957   : > { %v3527_v34 = vpop.f32.mrb[16].mxu0 }
0x1958   : > { %v3096_v39 = vadd.f32 %v3527_v34, %v3032_v38  ;;  %v3089_v43 = vpop.f32.mrb[17].mxu0 }
0x1959   : > { %v3528_v40 = vpop.f32.mrb[18].mxu0 }
0x195a   : > { %v3102_v14 = vadd.f32 %v3096_v39, %v2523_v37  ;;  %v3099_v4 = vadd.f32 %v3528_v40, %v3037_v3  ;;  %v3091_v12 = vpop.f32.mrb[19].mxu0 }
0x195c   : > { %v3109_v5 = vmul.f32 %v3108_v63, %v3102_v14  ;;  %v3103_v17 = vadd.f32 %v3099_v4, %v2524_v0  ;;  %vm3106_vm13 = vcmp.gt.f32.partialorder %v3102_v14, 0.0 }
0x195e   : > { %vm3107_vm10 = vcmp.gt.f32.partialorder %v3103_v17, 0.0  ;;  %v3110_v50 = vmul.f32 %v3108_v63, %v3103_v17  ;;  %v3111_v23 = vsel %vm3106_vm13, %v3102_v14, %v3109_v5 }
0x1960   : > { %v3112_v18 = vsel %vm3107_vm10, %v3103_v17, %v3110_v50 }
0x1961   : > { %v3113_v46 = vpack.c.bf16 %v3112_v18, %v3111_v23 }
0x1963   : > { %3530 = vmatpush3.bf16.msra.mxu1 %v3113_v46 }
0x1966   : > { %3532 = vmatmul.mubr.msk.bf16.vlgmr.msra.gmra.mrb[16].mxu1 %vm819_vm3, %v3104_v19 }
0x1a39   : > { %v3157_v47 = vpop.f32.mrb[16].mxu1 }
0x1a3a   : > { %v3158_v42 = vadd.f32 %v3157_v47, %v3118_v20  ;;  %v3533_v7 = vpop.f32.mrb[17].mxu1 }
0x1a3b   : > { %v3160_v56 = vpop.f32.mrb[18].mxu1 }
0x1a3c   : > { %3163 = vst [vmem:[%s648_s27] sm:$0xff] %v3158_v42  ;;  %v3534_v8 = vpop.f32.mrb[19].mxu1 }
0x1a3d   : > { %3779 = shalt.err (!%p3776_p1)
}
0x1a3e   : > { %s3780_s23 = scalar_lea.hbm %s4896_s12, 128  ;;  %s3784_s26 = scalar_lea.hbm %s4958_s20, 256 }
0x1a3f   : > { %p3781_p2 = scmp.ne.s32.totalorder %s4896_s12, %s3780_s23  ;;  %p3785_p9 = scmp.lt.u32.totalorder %s4896_s12, %s4958_s20 }
0x1a40   : > { %p3786_p5 = scmp.lt.u32.totalorder %s3784_s26, %s3780_s23  ;;  %p3788_p10 = scmp.lt.u32.totalorder %s3780_s23, %s4896_s12 }
0x1a41   : > { %p3782_p3 = pnand %p3781_p2, %p5008_p12 }
0x1a42   : > { %p3787_p6 = por %p3786_p5, %p3785_p9 }
0x1a43   : > { %p3783_p4 = pneg %p3782_p3 }
0x1a44   : > { %p3789_p0 = por %p3788_p10, %p3787_p6 }
0x1a46   : > { %p3790_p7 = pnand %p3789_p0, %p3783_p4 }
0x1a48   : > { %3793 = shalt.err (!%p3790_p7)
}
0x1a49   : > { %3597 = dma.vmem_to_hbm [thread:$0]  (%p5008_p12), %s4898_s22, 128, %s4896_s12, %s3165_s17  }
0x1a4a PF: > { %s5009_s1 = sld [smem:[#allocation12_spill]]  ;;  %s5010_s21 = sld [smem:[#allocation16_spill]] }
0x1a4b   : > { %p3614_p8 = scmp.ge.s32.totalorder %s3836_s25, 2 }
0x1a50   : > { %s3190_s3 = sand.u32 1, %s5009_s1   ;;  %p5011_p11 = scmp.ne.s32.totalorder %s5010_s21, 0 }
0x1a51   : > { %s3191_s7 = scalar_lea.sflag [#allocation4], %s3190_s3 }
0x1a52   : > { %p3607_p13 = pnand %p3614_p8, %p5011_p11 }
0x1a54   : > { %3819 = dma.done.wait (!%p3607_p13), %s3191_s7, 128  }
0x1a55   : > { %3821 = vsyncadd (!%p3607_p13), %s3191_s7, 4294967168  ;;  %s5012_s25 = sld [smem:[#allocation14_spill]]  ;;  %s5013_s2 = sld [smem:[#allocation13_spill]] }
0x1a56   : > { %s5014_s4 = sld [smem:[#allocation15_spill]]  ;;  %s5015_s23 = smov %s3828_s24 }
0x1a5b   : > { %p33_p1 = scmp.ge.s32.totalorder %s5012_s25, 4   ;;  %s5016_s24 = smov %s5013_s2 }
0x1a5c   : > { %s5017_s2 = smov %s5014_s4 }
0x1a5d   :  { %35 = sbr.rel (!%p33_p1) target bundleno = 14 (0xe), region = 174 }
0x1a64   :  { %3196 = vsyncpa [#allocation4], 1 }
0x1a65   :  { %3198 = vsyncpa [#allocation4 + $0x1], 1 }
0x1a66   :  { %3199 = vsyncpa [#allocation5], 1 }
0x1a67   :  { %3201 = vsyncpa [#allocation5 + $0x1], 1 }
0x1a68   :  { %3202 = vsyncpa [#allocation7], 1 }

</bundles_post_ra>
